<compile_context>
chip_gen: v7x
topology: tpu7x:2x2x1
jax: 0.10.0
libtpu: 0.0.40
codegen_flags: <defaults>
</compile_context>

<pallas_src>
import math
import jax
import jax.numpy as jnp
from jax.experimental import pallas as pl
from jax.experimental.pallas import tpu as pltpu

# ---- module hyper-parameters (scaled-down, consistent with prior version) ----
IN_CH = 8          # in_channels
MID_CH = 32        # mid_channels (d_model)
N_HEADS = 4
HEAD_DIM = MID_CH // N_HEADS
FF = 64            # dim_feedforward
LN_EPS = 1e-5      # PyTorch LayerNorm default

# ---- packed weight slab layout (transposed weights, 8/16-aligned rows) ------
R_WIN = 0                       # (MID_CH, IN_CH)
R_WQKV = R_WIN + MID_CH         # (3*MID_CH, MID_CH)   q rows pre-scaled
R_WO = R_WQKV + 3 * MID_CH      # (MID_CH, MID_CH)
R_W1 = R_WO + MID_CH            # (FF, MID_CH)
R_W2 = R_W1 + FF                # (MID_CH, FF)
R_WOUT = R_W2 + MID_CH          # (MID_CH, MID_CH)
W_ROWS = R_WOUT + MID_CH        # = 288
W_COLS = 64                     # max(IN_CH, MID_CH, FF)

# ---- packed bias / LayerNorm slab layout (one column per parameter) ---------
B_ROWS = 3 * MID_CH             # = 96 (longest vector: bqkv)
B_COLS = 16
(BC_BIN, BC_BQKV, BC_BO, BC_G1, BC_BT1,
 BC_B1, BC_B2, BC_G2, BC_BT2, BC_BOUT) = range(10)


def _layernorm_cols(xT, gamma_col, beta_col):
    """LayerNorm over the channel axis (sublanes, axis 0); xT: (C, S) f32."""
    mean = jnp.mean(xT, axis=0, keepdims=True)                 # (1, S)
    cen = xT - mean
    var = jnp.mean(cen * cen, axis=0, keepdims=True)           # (1, S)
    inv = jax.lax.rsqrt(var + LN_EPS)
    return cen * inv * gamma_col + beta_col                    # (C,1) bcasts on lanes


def transformer_bottleneck_kernel(x_ref, w_ref, b_ref, o_ref):
    # One grid step == one batch element, transposed token layout.
    xT = x_ref[0]                                              # (Cin, S) bf16

    # ---- packed parameters (static, aligned slices) ----
    w_in = w_ref[R_WIN:R_WIN + MID_CH, 0:IN_CH]                # (32, 8)  bf16
    wqkv = w_ref[R_WQKV:R_WQKV + 3 * MID_CH, 0:MID_CH]         # (96, 32)
    wo = w_ref[R_WO:R_WO + MID_CH, 0:MID_CH]                   # (32, 32)
    w1 = w_ref[R_W1:R_W1 + FF, 0:MID_CH]                       # (64, 32)
    w2 = w_ref[R_W2:R_W2 + MID_CH, 0:FF]                       # (32, 64)
    wout = w_ref[R_WOUT:R_WOUT + MID_CH, 0:MID_CH]             # (32, 32)

    b_in = b_ref[0:MID_CH, BC_BIN:BC_BIN + 1]                  # (32, 1) f32
    bqkv = b_ref[0:3 * MID_CH, BC_BQKV:BC_BQKV + 1]            # (96, 1)
    bo = b_ref[0:MID_CH, BC_BO:BC_BO + 1]
    g1 = b_ref[0:MID_CH, BC_G1:BC_G1 + 1]
    bt1 = b_ref[0:MID_CH, BC_BT1:BC_BT1 + 1]
    b1 = b_ref[0:FF, BC_B1:BC_B1 + 1]
    b2 = b_ref[0:MID_CH, BC_B2:BC_B2 + 1]
    g2 = b_ref[0:MID_CH, BC_G2:BC_G2 + 1]
    bt2 = b_ref[0:MID_CH, BC_BT2:BC_BT2 + 1]
    bout = b_ref[0:MID_CH, BC_BOUT:BC_BOUT + 1]

    # ---- proj_in: Conv2d 1x1 == channel matmul; hT: (Cmid, S) f32 ----
    hT = jnp.dot(w_in, xT, preferred_element_type=jnp.float32) + b_in

    # ---- MHA in-projection (scale already folded into q rows) ----
    qkvT = jnp.dot(wqkv, hT.astype(jnp.bfloat16),
                   preferred_element_type=jnp.float32) + bqkv  # (3*Cmid, S) f32

    # ---- self-attention: heads are 8-row sublane slices of qkvT ----
    head_outs = []
    for h in range(N_HEADS):                                   # static unroll
        r = h * HEAD_DIM
        qhT = qkvT[r:r + HEAD_DIM, :]                          # (d, S)
        khT = qkvT[MID_CH + r:MID_CH + r + HEAD_DIM, :]        # (d, S)
        vhT = qkvT[2 * MID_CH + r:2 * MID_CH + r + HEAD_DIM, :]
        qh = qhT.T                                             # (S, d) small xpose
        s = jnp.dot(qh.astype(jnp.bfloat16), khT.astype(jnp.bfloat16),
                    preferred_element_type=jnp.float32)        # (S, S), lane-dense
        s = s - jnp.max(s, axis=-1, keepdims=True)             # stable softmax
        p = jnp.exp(s)
        p = p * pl.reciprocal(jnp.sum(p, axis=-1, keepdims=True), approx=True)
        # out_hT[d, i] = sum_j vhT[d, j] * p[i, j]   (contract last dims)
        out_hT = jax.lax.dot_general(
            vhT.astype(jnp.bfloat16), p.astype(jnp.bfloat16),
            dimension_numbers=(((1,), (1,)), ((), ())),
            preferred_element_type=jnp.float32)                # (d, S)
        head_outs.append(out_hT)
    attnT = jnp.concatenate(head_outs, axis=0)                 # (Cmid, S) sublane cat
    # TODO(synk): for real-UNet sizes with large S, tile K/V with an online
    # softmax accumulator (flash style) to keep peak VMEM O(S*tile); required
    # on v7x (64 MiB VMEM).  At S=256 the full (S,S) scores fit trivially.

    attnT = jnp.dot(wo, attnT.astype(jnp.bfloat16),
                    preferred_element_type=jnp.float32) + bo   # out-proj
    # TODO(synk): dropout (p=0.1) omitted -> eval-mode (identity) semantics.
    h1T = _layernorm_cols(hT + attnT, g1, bt1)

    # ---- feed-forward block ----
    ffT = jnp.dot(w1, h1T.astype(jnp.bfloat16),
                  preferred_element_type=jnp.float32) + b1
    ffT = jnp.maximum(ffT, 0.0)                                # ReLU
    ffT = jnp.dot(w2, ffT.astype(jnp.bfloat16),
                  preferred_element_type=jnp.float32) + b2
    h2T = _layernorm_cols(h1T + ffT, g2, bt2)

    # ---- proj_out: Conv2d 1x1 + ReLU; lane-dense (Cmid, S) store ----
    outT = jnp.dot(wout, h2T.astype(jnp.bfloat16),
                   preferred_element_type=jnp.float32) + bout
    o_ref[0] = jnp.maximum(outT, 0.0)


def pack_params(params):
    """Pack the 17 small parameter tensors into two slabs (review opt #4):
       wslab: bf16 (288, 64) transposed weights; bslab: f32 (96, 16) columns.
       1/sqrt(head_dim) folded into the q rows of wqkv / bqkv (opt #6)."""
    scale = 1.0 / math.sqrt(HEAD_DIM)
    wqkv_t = params["wqkv"].T.astype(jnp.float32)              # (3*Cmid, Cmid)
    wqkv_t = wqkv_t.at[:MID_CH, :].multiply(scale)
    bqkv = params["bqkv"].reshape(-1).astype(jnp.float32)
    bqkv = bqkv.at[:MID_CH].multiply(scale)

    wslab = jnp.zeros((W_ROWS, W_COLS), jnp.float32)
    for r0, wt in ((R_WIN, params["w_in"].T), (R_WQKV, wqkv_t),
                   (R_WO, params["wo"].T), (R_W1, params["w1"].T),
                   (R_W2, params["w2"].T), (R_WOUT, params["wout"].T)):
        rr, cc = wt.shape
        wslab = wslab.at[r0:r0 + rr, 0:cc].set(wt.astype(jnp.float32))
    wslab = wslab.astype(jnp.bfloat16)

    bslab = jnp.zeros((B_ROWS, B_COLS), jnp.float32)
    for col, vec in ((BC_BIN, params["b_in"]), (BC_BQKV, bqkv),
                     (BC_BO, params["bo"]), (BC_G1, params["g1"]),
                     (BC_BT1, params["bt1"]), (BC_B1, params["b1"]),
                     (BC_B2, params["b2"]), (BC_G2, params["g2"]),
                     (BC_BT2, params["bt2"]), (BC_BOUT, params["bout"])):
        v = jnp.asarray(vec).reshape(-1).astype(jnp.float32)
        bslab = bslab.at[0:v.shape[0], col].set(v)
    return wslab, bslab


@jax.jit
def transformer_bottleneck(x_nchw, params):
    B, C, H, W = x_nchw.shape
    assert C == IN_CH
    S = H * W
    # NCHW -> (B, Cin, S): pure reshape, no HBM transpose (opt #1); bf16 halves
    # the per-step input DMA (opt #5).
    x_tok = x_nchw.reshape(B, C, S).astype(jnp.bfloat16)
    wslab, bslab = pack_params(params)

    out_tok = pl.pallas_call(
        transformer_bottleneck_kernel,
        out_shape=jax.ShapeDtypeStruct((B, MID_CH, S), jnp.float32),
        grid=(B,),
        in_specs=[
            pl.BlockSpec((1, IN_CH, S), lambda b: (b, 0, 0)),
            pl.BlockSpec((W_ROWS, W_COLS), lambda b: (0, 0)),   # whole slab
            pl.BlockSpec((B_ROWS, B_COLS), lambda b: (0, 0)),   # whole slab
        ],
        out_specs=pl.BlockSpec((1, MID_CH, S), lambda b: (b, 0, 0)),
        compiler_params=pltpu.CompilerParams(
            dimension_semantics=("parallel",)),                 # 2 blocks -> both v7x TCs
    )(x_tok, wslab, bslab)
    # (B, Cmid, S) -> NCHW: pure reshape, no transpose.
    return out_tok.reshape(B, MID_CH, H, W)


def init_params(key):
    ks = jax.random.split(key, 8)
    scale = 0.05
    return {
        "w_in": scale * jax.random.normal(ks[0], (IN_CH, MID_CH), jnp.float32),
        "b_in": scale * jax.random.normal(ks[1], (1, MID_CH), jnp.float32),
        "wqkv": scale * jax.random.normal(ks[2], (MID_CH, 3 * MID_CH), jnp.float32),
        "bqkv": jnp.zeros((1, 3 * MID_CH), jnp.float32),
        "wo": scale * jax.random.normal(ks[3], (MID_CH, MID_CH), jnp.float32),
        "bo": jnp.zeros((1, MID_CH), jnp.float32),
        "g1": jnp.ones((1, MID_CH), jnp.float32),
        "bt1": jnp.zeros((1, MID_CH), jnp.float32),
        "w1": scale * jax.random.normal(ks[4], (MID_CH, FF), jnp.float32),
        "b1": scale * jax.random.normal(ks[5], (1, FF), jnp.float32),
        "w2": scale * jax.random.normal(ks[6], (FF, MID_CH), jnp.float32),
        "b2": jnp.zeros((1, MID_CH), jnp.float32),
        "g2": jnp.ones((1, MID_CH), jnp.float32),
        "bt2": jnp.zeros((1, MID_CH), jnp.float32),
        "wout": scale * jax.random.normal(ks[7], (MID_CH, MID_CH), jnp.float32),
        "bout": jnp.zeros((1, MID_CH), jnp.float32),
    }


def reference(x_nchw, p):
    """Pure-JAX reference mirroring the PyTorch forward (eval mode)."""
    B, C, H, W = x_nchw.shape
    S = H * W
    x = x_nchw.reshape(B, C, S).transpose(0, 2, 1).astype(jnp.float32)
    h = x @ p["w_in"] + p["b_in"]
    qkv = h @ p["wqkv"] + p["bqkv"]
    q, k, v = jnp.split(qkv, 3, axis=-1)

    def split_heads(t):
        return t.reshape(B, S, N_HEADS, HEAD_DIM).transpose(0, 2, 1, 3)

    qh, kh, vh = map(split_heads, (q, k, v))
    s = jnp.einsum("bhqd,bhkd->bhqk", qh, kh) / math.sqrt(HEAD_DIM)
    pattn = jax.nn.softmax(s, axis=-1)
    a = jnp.einsum("bhqk,bhkd->bhqd", pattn, vh)
    a = a.transpose(0, 2, 1, 3).reshape(B, S, MID_CH)
    a = a @ p["wo"] + p["bo"]

    def ln(t, g, b):
        m = t.mean(-1, keepdims=True)
        var = ((t - m) ** 2).mean(-1, keepdims=True)
        return (t - m) / jnp.sqrt(var + LN_EPS) * g + b

    h1 = ln(h + a, p["g1"], p["bt1"])
    ff = jnp.maximum(h1 @ p["w1"] + p["b1"], 0.0) @ p["w2"] + p["b2"]
    h2 = ln(h1 + ff, p["g2"], p["bt2"])
    out = jnp.maximum(h2 @ p["wout"] + p["bout"], 0.0)
    return out.transpose(0, 2, 1).reshape(B, MID_CH, H, W)


if __name__ == "__main__":
    key = jax.random.PRNGKey(0)
    k_x, k_p = jax.random.split(key)
    B, H, W = 2, 16, 16                       # S = 256 tokens -> lane-dense
    x = jax.random.normal(k_x, (B, IN_CH, H, W), jnp.float32)   # NCHW input
    params = init_params(k_p)

    out = jax.block_until_ready(transformer_bottleneck(x, params))
    ref = jax.block_until_ready(reference(x, params))

    assert out.shape == (B, MID_CH, H, W), out.shape
    err = float(jnp.max(jnp.abs(out - ref)))
    # bf16 MXU operands + approx reciprocal -> slightly relaxed tolerance.
    assert jnp.allclose(out, ref, rtol=3e-2, atol=3e-2), err
    print("KERNEL_OK")
</pallas_src>

<mosaic_0001>
module attributes {stable_mosaic.version = 11 : i64} {
  func.func @transformer_bottleneck_kernel(%arg0: i32, %arg1: memref<1x8x256xbf16, #tpu.memory_space<vmem>>, %arg2: memref<288x64xbf16, #tpu.memory_space<vmem>>, %arg3: memref<96x16xf32, #tpu.memory_space<vmem>>, %arg4: memref<1x32x256xf32, #tpu.memory_space<vmem>>) attributes {dimension_semantics = [#tpu.dimension_semantics<parallel>], iteration_bounds = array<i64: 2>, scalar_prefetch = 0 : i64, scratch_operands = 0 : i64, tpu.core_type = #tpu.core_type<tc>, window_params = [{transform_indices = @transform_0, window_bounds = array<i64: 1, 8, 256>}, {pipeline_mode = #tpu.pipeline_mode<synchronous>, transform_indices = @transform_1, window_bounds = array<i64: 288, 64>}, {pipeline_mode = #tpu.pipeline_mode<synchronous>, transform_indices = @transform_2, window_bounds = array<i64: 96, 16>}, {transform_indices = @transform_3, window_bounds = array<i64: 1, 32, 256>}]} {
    %c0 = arith.constant 0 : index
    %c0_0 = arith.constant 0 : index
    %c0_1 = arith.constant 0 : index
    %0 = vector.load %arg1[%c0, %c0_0, %c0_1] : memref<1x8x256xbf16, #tpu.memory_space<vmem>>, vector<1x8x256xbf16>
    %1 = vector.shape_cast %0 : vector<1x8x256xbf16> to vector<8x256xbf16>
    %c0_2 = arith.constant 0 : index
    %c0_3 = arith.constant 0 : index
    %2 = vector.load %arg2[%c0_2, %c0_3] : memref<288x64xbf16, #tpu.memory_space<vmem>>, vector<32x8xbf16>
    %c32 = arith.constant 32 : index
    %c0_4 = arith.constant 0 : index
    %3 = vector.load %arg2[%c32, %c0_4] : memref<288x64xbf16, #tpu.memory_space<vmem>>, vector<96x32xbf16>
    %c128 = arith.constant 128 : index
    %c0_5 = arith.constant 0 : index
    %4 = vector.load %arg2[%c128, %c0_5] : memref<288x64xbf16, #tpu.memory_space<vmem>>, vector<32x32xbf16>
    %c160 = arith.constant 160 : index
    %c0_6 = arith.constant 0 : index
    %5 = vector.load %arg2[%c160, %c0_6] : memref<288x64xbf16, #tpu.memory_space<vmem>>, vector<64x32xbf16>
    %c224 = arith.constant 224 : index
    %c0_7 = arith.constant 0 : index
    %6 = vector.load %arg2[%c224, %c0_7] : memref<288x64xbf16, #tpu.memory_space<vmem>>, vector<32x64xbf16>
    %c256 = arith.constant 256 : index
    %c0_8 = arith.constant 0 : index
    %7 = vector.load %arg2[%c256, %c0_8] : memref<288x64xbf16, #tpu.memory_space<vmem>>, vector<32x32xbf16>
    %c0_9 = arith.constant 0 : index
    %c0_10 = arith.constant 0 : index
    %8 = vector.load %arg3[%c0_9, %c0_10] : memref<96x16xf32, #tpu.memory_space<vmem>>, vector<32x1xf32>
    %c0_11 = arith.constant 0 : index
    %c1 = arith.constant 1 : index
    %9 = vector.load %arg3[%c0_11, %c1] : memref<96x16xf32, #tpu.memory_space<vmem>>, vector<96x1xf32>
    %c0_12 = arith.constant 0 : index
    %c2 = arith.constant 2 : index
    %10 = vector.load %arg3[%c0_12, %c2] : memref<96x16xf32, #tpu.memory_space<vmem>>, vector<32x1xf32>
    %c0_13 = arith.constant 0 : index
    %c3 = arith.constant 3 : index
    %11 = vector.load %arg3[%c0_13, %c3] : memref<96x16xf32, #tpu.memory_space<vmem>>, vector<32x1xf32>
    %c0_14 = arith.constant 0 : index
    %c4 = arith.constant 4 : index
    %12 = vector.load %arg3[%c0_14, %c4] : memref<96x16xf32, #tpu.memory_space<vmem>>, vector<32x1xf32>
    %c0_15 = arith.constant 0 : index
    %c5 = arith.constant 5 : index
    %13 = vector.load %arg3[%c0_15, %c5] : memref<96x16xf32, #tpu.memory_space<vmem>>, vector<64x1xf32>
    %c0_16 = arith.constant 0 : index
    %c6 = arith.constant 6 : index
    %14 = vector.load %arg3[%c0_16, %c6] : memref<96x16xf32, #tpu.memory_space<vmem>>, vector<32x1xf32>
    %c0_17 = arith.constant 0 : index
    %c7 = arith.constant 7 : index
    %15 = vector.load %arg3[%c0_17, %c7] : memref<96x16xf32, #tpu.memory_space<vmem>>, vector<32x1xf32>
    %c0_18 = arith.constant 0 : index
    %c8 = arith.constant 8 : index
    %16 = vector.load %arg3[%c0_18, %c8] : memref<96x16xf32, #tpu.memory_space<vmem>>, vector<32x1xf32>
    %c0_19 = arith.constant 0 : index
    %c9 = arith.constant 9 : index
    %17 = vector.load %arg3[%c0_19, %c9] : memref<96x16xf32, #tpu.memory_space<vmem>>, vector<32x1xf32>
    %cst = arith.constant dense<0.000000e+00> : vector<32x256xf32>
    %18 = tpu.matmul %2, %1, %cst {dimension_numbers = #tpu.dot_dimension_numbers<[1], [0], [0], [1], [0, 0, 1, 1], [], []>} : vector<32x8xbf16>, vector<8x256xbf16>, vector<32x256xf32> -> vector<32x256xf32>
    %19 = vector.broadcast %8 : vector<32x1xf32> to vector<32x256xf32>
    %20 = arith.addf %18, %19 : vector<32x256xf32>
    %21 = arith.truncf %20 : vector<32x256xf32> to vector<32x256xbf16>
    %cst_20 = arith.constant dense<0.000000e+00> : vector<96x256xf32>
    %22 = tpu.matmul %3, %21, %cst_20 {dimension_numbers = #tpu.dot_dimension_numbers<[1], [0], [0], [1], [0, 0, 1, 1], [], []>} : vector<96x32xbf16>, vector<32x256xbf16>, vector<96x256xf32> -> vector<96x256xf32>
    %23 = vector.broadcast %9 : vector<96x1xf32> to vector<96x256xf32>
    %24 = arith.addf %22, %23 : vector<96x256xf32>
    %25 = vector.extract_strided_slice %24 {offsets = [0, 0], sizes = [8, 256], strides = [1, 1]} : vector<96x256xf32> to vector<8x256xf32>
    %26 = vector.extract_strided_slice %24 {offsets = [32, 0], sizes = [8, 256], strides = [1, 1]} : vector<96x256xf32> to vector<8x256xf32>
    %27 = vector.extract_strided_slice %24 {offsets = [64, 0], sizes = [8, 256], strides = [1, 1]} : vector<96x256xf32> to vector<8x256xf32>
    %28 = tpu.transpose %25, [1, 0] : vector<8x256xf32> -> vector<256x8xf32>
    %29 = arith.truncf %28 : vector<256x8xf32> to vector<256x8xbf16>
    %30 = arith.truncf %26 : vector<8x256xf32> to vector<8x256xbf16>
    %cst_21 = arith.constant dense<0.000000e+00> : vector<256x256xf32>
    %31 = tpu.matmul %29, %30, %cst_21 {dimension_numbers = #tpu.dot_dimension_numbers<[1], [0], [0], [1], [0, 0, 1, 1], [], []>} : vector<256x8xbf16>, vector<8x256xbf16>, vector<256x256xf32> -> vector<256x256xf32>
    %cst_22 = arith.constant dense<0xFF800000> : vector<256xf32>
    %32 = vector.multi_reduction <maximumf>, %31, %cst_22 [1] : vector<256x256xf32> to vector<256xf32>
    %33 = vector.shape_cast %32 : vector<256xf32> to vector<256x1xf32>
    %34 = vector.broadcast %33 : vector<256x1xf32> to vector<256x256xf32>
    %35 = arith.subf %31, %34 : vector<256x256xf32>
    %36 = math.exp %35 : vector<256x256xf32>
    %cst_23 = arith.constant dense<0.000000e+00> : vector<256xf32>
    %37 = vector.multi_reduction <add>, %36, %cst_23 [1] : vector<256x256xf32> to vector<256xf32>
    %38 = vector.shape_cast %37 : vector<256xf32> to vector<256x1xf32>
    %39 = tpu.reciprocal %38 {approx = true} : vector<256x1xf32> -> vector<256x1xf32>
    %40 = vector.broadcast %39 : vector<256x1xf32> to vector<256x256xf32>
    %41 = arith.mulf %36, %40 : vector<256x256xf32>
    %42 = arith.truncf %27 : vector<8x256xf32> to vector<8x256xbf16>
    %43 = arith.truncf %41 : vector<256x256xf32> to vector<256x256xbf16>
    %cst_24 = arith.constant dense<0.000000e+00> : vector<8x256xf32>
    %44 = tpu.matmul %42, %43, %cst_24 {dimension_numbers = #tpu.dot_dimension_numbers<[1], [1], [0], [0], [0, 0, 1, 0], [], []>} : vector<8x256xbf16>, vector<256x256xbf16>, vector<8x256xf32> -> vector<8x256xf32>
    %45 = vector.extract_strided_slice %24 {offsets = [8, 0], sizes = [8, 256], strides = [1, 1]} : vector<96x256xf32> to vector<8x256xf32>
    %46 = vector.extract_strided_slice %24 {offsets = [40, 0], sizes = [8, 256], strides = [1, 1]} : vector<96x256xf32> to vector<8x256xf32>
    %47 = vector.extract_strided_slice %24 {offsets = [72, 0], sizes = [8, 256], strides = [1, 1]} : vector<96x256xf32> to vector<8x256xf32>
    %48 = tpu.transpose %45, [1, 0] : vector<8x256xf32> -> vector<256x8xf32>
    %49 = arith.truncf %48 : vector<256x8xf32> to vector<256x8xbf16>
    %50 = arith.truncf %46 : vector<8x256xf32> to vector<8x256xbf16>
    %cst_25 = arith.constant dense<0.000000e+00> : vector<256x256xf32>
    %51 = tpu.matmul %49, %50, %cst_25 {dimension_numbers = #tpu.dot_dimension_numbers<[1], [0], [0], [1], [0, 0, 1, 1], [], []>} : vector<256x8xbf16>, vector<8x256xbf16>, vector<256x256xf32> -> vector<256x256xf32>
    %cst_26 = arith.constant dense<0xFF800000> : vector<256xf32>
    %52 = vector.multi_reduction <maximumf>, %51, %cst_26 [1] : vector<256x256xf32> to vector<256xf32>
    %53 = vector.shape_cast %52 : vector<256xf32> to vector<256x1xf32>
    %54 = vector.broadcast %53 : vector<256x1xf32> to vector<256x256xf32>
    %55 = arith.subf %51, %54 : vector<256x256xf32>
    %56 = math.exp %55 : vector<256x256xf32>
    %cst_27 = arith.constant dense<0.000000e+00> : vector<256xf32>
    %57 = vector.multi_reduction <add>, %56, %cst_27 [1] : vector<256x256xf32> to vector<256xf32>
    %58 = vector.shape_cast %57 : vector<256xf32> to vector<256x1xf32>
    %59 = tpu.reciprocal %58 {approx = true} : vector<256x1xf32> -> vector<256x1xf32>
    %60 = vector.broadcast %59 : vector<256x1xf32> to vector<256x256xf32>
    %61 = arith.mulf %56, %60 : vector<256x256xf32>
    %62 = arith.truncf %47 : vector<8x256xf32> to vector<8x256xbf16>
    %63 = arith.truncf %61 : vector<256x256xf32> to vector<256x256xbf16>
    %cst_28 = arith.constant dense<0.000000e+00> : vector<8x256xf32>
    %64 = tpu.matmul %62, %63, %cst_28 {dimension_numbers = #tpu.dot_dimension_numbers<[1], [1], [0], [0], [0, 0, 1, 0], [], []>} : vector<8x256xbf16>, vector<256x256xbf16>, vector<8x256xf32> -> vector<8x256xf32>
    %65 = vector.extract_strided_slice %24 {offsets = [16, 0], sizes = [8, 256], strides = [1, 1]} : vector<96x256xf32> to vector<8x256xf32>
    %66 = vector.extract_strided_slice %24 {offsets = [48, 0], sizes = [8, 256], strides = [1, 1]} : vector<96x256xf32> to vector<8x256xf32>
    %67 = vector.extract_strided_slice %24 {offsets = [80, 0], sizes = [8, 256], strides = [1, 1]} : vector<96x256xf32> to vector<8x256xf32>
    %68 = tpu.transpose %65, [1, 0] : vector<8x256xf32> -> vector<256x8xf32>
    %69 = arith.truncf %68 : vector<256x8xf32> to vector<256x8xbf16>
    %70 = arith.truncf %66 : vector<8x256xf32> to vector<8x256xbf16>
    %cst_29 = arith.constant dense<0.000000e+00> : vector<256x256xf32>
    %71 = tpu.matmul %69, %70, %cst_29 {dimension_numbers = #tpu.dot_dimension_numbers<[1], [0], [0], [1], [0, 0, 1, 1], [], []>} : vector<256x8xbf16>, vector<8x256xbf16>, vector<256x256xf32> -> vector<256x256xf32>
    %cst_30 = arith.constant dense<0xFF800000> : vector<256xf32>
    %72 = vector.multi_reduction <maximumf>, %71, %cst_30 [1] : vector<256x256xf32> to vector<256xf32>
    %73 = vector.shape_cast %72 : vector<256xf32> to vector<256x1xf32>
    %74 = vector.broadcast %73 : vector<256x1xf32> to vector<256x256xf32>
    %75 = arith.subf %71, %74 : vector<256x256xf32>
    %76 = math.exp %75 : vector<256x256xf32>
    %cst_31 = arith.constant dense<0.000000e+00> : vector<256xf32>
    %77 = vector.multi_reduction <add>, %76, %cst_31 [1] : vector<256x256xf32> to vector<256xf32>
    %78 = vector.shape_cast %77 : vector<256xf32> to vector<256x1xf32>
    %79 = tpu.reciprocal %78 {approx = true} : vector<256x1xf32> -> vector<256x1xf32>
    %80 = vector.broadcast %79 : vector<256x1xf32> to vector<256x256xf32>
    %81 = arith.mulf %76, %80 : vector<256x256xf32>
    %82 = arith.truncf %67 : vector<8x256xf32> to vector<8x256xbf16>
    %83 = arith.truncf %81 : vector<256x256xf32> to vector<256x256xbf16>
    %cst_32 = arith.constant dense<0.000000e+00> : vector<8x256xf32>
    %84 = tpu.matmul %82, %83, %cst_32 {dimension_numbers = #tpu.dot_dimension_numbers<[1], [1], [0], [0], [0, 0, 1, 0], [], []>} : vector<8x256xbf16>, vector<256x256xbf16>, vector<8x256xf32> -> vector<8x256xf32>
    %85 = vector.extract_strided_slice %24 {offsets = [24, 0], sizes = [8, 256], strides = [1, 1]} : vector<96x256xf32> to vector<8x256xf32>
    %86 = vector.extract_strided_slice %24 {offsets = [56, 0], sizes = [8, 256], strides = [1, 1]} : vector<96x256xf32> to vector<8x256xf32>
    %87 = vector.extract_strided_slice %24 {offsets = [88, 0], sizes = [8, 256], strides = [1, 1]} : vector<96x256xf32> to vector<8x256xf32>
    %88 = tpu.transpose %85, [1, 0] : vector<8x256xf32> -> vector<256x8xf32>
    %89 = arith.truncf %88 : vector<256x8xf32> to vector<256x8xbf16>
    %90 = arith.truncf %86 : vector<8x256xf32> to vector<8x256xbf16>
    %cst_33 = arith.constant dense<0.000000e+00> : vector<256x256xf32>
    %91 = tpu.matmul %89, %90, %cst_33 {dimension_numbers = #tpu.dot_dimension_numbers<[1], [0], [0], [1], [0, 0, 1, 1], [], []>} : vector<256x8xbf16>, vector<8x256xbf16>, vector<256x256xf32> -> vector<256x256xf32>
    %cst_34 = arith.constant dense<0xFF800000> : vector<256xf32>
    %92 = vector.multi_reduction <maximumf>, %91, %cst_34 [1] : vector<256x256xf32> to vector<256xf32>
    %93 = vector.shape_cast %92 : vector<256xf32> to vector<256x1xf32>
    %94 = vector.broadcast %93 : vector<256x1xf32> to vector<256x256xf32>
    %95 = arith.subf %91, %94 : vector<256x256xf32>
    %96 = math.exp %95 : vector<256x256xf32>
    %cst_35 = arith.constant dense<0.000000e+00> : vector<256xf32>
    %97 = vector.multi_reduction <add>, %96, %cst_35 [1] : vector<256x256xf32> to vector<256xf32>
    %98 = vector.shape_cast %97 : vector<256xf32> to vector<256x1xf32>
    %99 = tpu.reciprocal %98 {approx = true} : vector<256x1xf32> -> vector<256x1xf32>
    %100 = vector.broadcast %99 : vector<256x1xf32> to vector<256x256xf32>
    %101 = arith.mulf %96, %100 : vector<256x256xf32>
    %102 = arith.truncf %87 : vector<8x256xf32> to vector<8x256xbf16>
    %103 = arith.truncf %101 : vector<256x256xf32> to vector<256x256xbf16>
    %cst_36 = arith.constant dense<0.000000e+00> : vector<8x256xf32>
    %104 = tpu.matmul %102, %103, %cst_36 {dimension_numbers = #tpu.dot_dimension_numbers<[1], [1], [0], [0], [0, 0, 1, 0], [], []>} : vector<8x256xbf16>, vector<256x256xbf16>, vector<8x256xf32> -> vector<8x256xf32>
    %105 = tpu.concatenate %44, %64, %84, %104 in 0 : vector<8x256xf32>, vector<8x256xf32>, vector<8x256xf32>, vector<8x256xf32> -> vector<32x256xf32>
    %106 = arith.truncf %105 : vector<32x256xf32> to vector<32x256xbf16>
    %cst_37 = arith.constant dense<0.000000e+00> : vector<32x256xf32>
    %107 = tpu.matmul %4, %106, %cst_37 {dimension_numbers = #tpu.dot_dimension_numbers<[1], [0], [0], [1], [0, 0, 1, 1], [], []>} : vector<32x32xbf16>, vector<32x256xbf16>, vector<32x256xf32> -> vector<32x256xf32>
    %108 = vector.broadcast %10 : vector<32x1xf32> to vector<32x256xf32>
    %109 = arith.addf %107, %108 : vector<32x256xf32>
    %110 = arith.addf %20, %109 : vector<32x256xf32>
    %cst_38 = arith.constant dense<0.000000e+00> : vector<256xf32>
    %111 = vector.multi_reduction <add>, %110, %cst_38 [0] : vector<32x256xf32> to vector<256xf32>
    %112 = vector.shape_cast %111 : vector<256xf32> to vector<1x256xf32>
    %cst_39 = arith.constant 3.200000e+01 : f32
    %113 = vector.broadcast %cst_39 : f32 to vector<1x256xf32>
    %114 = arith.divf %112, %113 : vector<1x256xf32>
    %115 = vector.broadcast %114 : vector<1x256xf32> to vector<32x256xf32>
    %116 = arith.subf %110, %115 : vector<32x256xf32>
    %117 = arith.mulf %116, %116 : vector<32x256xf32>
    %cst_40 = arith.constant dense<0.000000e+00> : vector<256xf32>
    %118 = vector.multi_reduction <add>, %117, %cst_40 [0] : vector<32x256xf32> to vector<256xf32>
    %119 = vector.shape_cast %118 : vector<256xf32> to vector<1x256xf32>
    %cst_41 = arith.constant 3.200000e+01 : f32
    %120 = vector.broadcast %cst_41 : f32 to vector<1x256xf32>
    %121 = arith.divf %119, %120 : vector<1x256xf32>
    %cst_42 = arith.constant 9.99999974E-6 : f32
    %122 = vector.broadcast %cst_42 : f32 to vector<1x256xf32>
    %123 = arith.addf %121, %122 : vector<1x256xf32>
    %124 = math.rsqrt %123 : vector<1x256xf32>
    %125 = vector.broadcast %124 : vector<1x256xf32> to vector<32x256xf32>
    %126 = arith.mulf %116, %125 : vector<32x256xf32>
    %127 = vector.broadcast %11 : vector<32x1xf32> to vector<32x256xf32>
    %128 = arith.mulf %126, %127 : vector<32x256xf32>
    %129 = vector.broadcast %12 : vector<32x1xf32> to vector<32x256xf32>
    %130 = arith.addf %128, %129 : vector<32x256xf32>
    %131 = arith.truncf %130 : vector<32x256xf32> to vector<32x256xbf16>
    %cst_43 = arith.constant dense<0.000000e+00> : vector<64x256xf32>
    %132 = tpu.matmul %5, %131, %cst_43 {dimension_numbers = #tpu.dot_dimension_numbers<[1], [0], [0], [1], [0, 0, 1, 1], [], []>} : vector<64x32xbf16>, vector<32x256xbf16>, vector<64x256xf32> -> vector<64x256xf32>
    %133 = vector.broadcast %13 : vector<64x1xf32> to vector<64x256xf32>
    %134 = arith.addf %132, %133 : vector<64x256xf32>
    %cst_44 = arith.constant 0.000000e+00 : f32
    %135 = vector.broadcast %cst_44 : f32 to vector<64x256xf32>
    %136 = arith.maximumf %134, %135 : vector<64x256xf32>
    %137 = arith.truncf %136 : vector<64x256xf32> to vector<64x256xbf16>
    %cst_45 = arith.constant dense<0.000000e+00> : vector<32x256xf32>
    %138 = tpu.matmul %6, %137, %cst_45 {dimension_numbers = #tpu.dot_dimension_numbers<[1], [0], [0], [1], [0, 0, 1, 1], [], []>} : vector<32x64xbf16>, vector<64x256xbf16>, vector<32x256xf32> -> vector<32x256xf32>
    %139 = vector.broadcast %14 : vector<32x1xf32> to vector<32x256xf32>
    %140 = arith.addf %138, %139 : vector<32x256xf32>
    %141 = arith.addf %130, %140 : vector<32x256xf32>
    %cst_46 = arith.constant dense<0.000000e+00> : vector<256xf32>
    %142 = vector.multi_reduction <add>, %141, %cst_46 [0] : vector<32x256xf32> to vector<256xf32>
    %143 = vector.shape_cast %142 : vector<256xf32> to vector<1x256xf32>
    %cst_47 = arith.constant 3.200000e+01 : f32
    %144 = vector.broadcast %cst_47 : f32 to vector<1x256xf32>
    %145 = arith.divf %143, %144 : vector<1x256xf32>
    %146 = vector.broadcast %145 : vector<1x256xf32> to vector<32x256xf32>
    %147 = arith.subf %141, %146 : vector<32x256xf32>
    %148 = arith.mulf %147, %147 : vector<32x256xf32>
    %cst_48 = arith.constant dense<0.000000e+00> : vector<256xf32>
    %149 = vector.multi_reduction <add>, %148, %cst_48 [0] : vector<32x256xf32> to vector<256xf32>
    %150 = vector.shape_cast %149 : vector<256xf32> to vector<1x256xf32>
    %cst_49 = arith.constant 3.200000e+01 : f32
    %151 = vector.broadcast %cst_49 : f32 to vector<1x256xf32>
    %152 = arith.divf %150, %151 : vector<1x256xf32>
    %cst_50 = arith.constant 9.99999974E-6 : f32
    %153 = vector.broadcast %cst_50 : f32 to vector<1x256xf32>
    %154 = arith.addf %152, %153 : vector<1x256xf32>
    %155 = math.rsqrt %154 : vector<1x256xf32>
    %156 = vector.broadcast %155 : vector<1x256xf32> to vector<32x256xf32>
    %157 = arith.mulf %147, %156 : vector<32x256xf32>
    %158 = vector.broadcast %15 : vector<32x1xf32> to vector<32x256xf32>
    %159 = arith.mulf %157, %158 : vector<32x256xf32>
    %160 = vector.broadcast %16 : vector<32x1xf32> to vector<32x256xf32>
    %161 = arith.addf %159, %160 : vector<32x256xf32>
    %162 = arith.truncf %161 : vector<32x256xf32> to vector<32x256xbf16>
    %cst_51 = arith.constant dense<0.000000e+00> : vector<32x256xf32>
    %163 = tpu.matmul %7, %162, %cst_51 {dimension_numbers = #tpu.dot_dimension_numbers<[1], [0], [0], [1], [0, 0, 1, 1], [], []>} : vector<32x32xbf16>, vector<32x256xbf16>, vector<32x256xf32> -> vector<32x256xf32>
    %164 = vector.broadcast %17 : vector<32x1xf32> to vector<32x256xf32>
    %165 = arith.addf %163, %164 : vector<32x256xf32>
    %cst_52 = arith.constant 0.000000e+00 : f32
    %166 = vector.broadcast %cst_52 : f32 to vector<32x256xf32>
    %167 = arith.maximumf %165, %166 : vector<32x256xf32>
    %c0_53 = arith.constant 0 : index
    %c0_54 = arith.constant 0 : index
    %c0_55 = arith.constant 0 : index
    %168 = vector.load %arg4[%c0_53, %c0_54, %c0_55] : memref<1x32x256xf32, #tpu.memory_space<vmem>>, vector<1x32x256xf32>
    %169 = vector.shape_cast %168 : vector<1x32x256xf32> to vector<32x256xf32>
    %170 = vector.shape_cast %167 : vector<32x256xf32> to vector<1x32x256xf32>
    tpu.vector_store %arg4[%c0_53, %c0_54, %c0_55], %170 {strides = array<i32>} : memref<1x32x256xf32, #tpu.memory_space<vmem>>, vector<1x32x256xf32>,
    return
  }
  func.func @transform_0(%arg0: i32) -> (i32, i32, i32) {
    %c0_i32 = arith.constant 0 : i32
    %c0_i32_0 = arith.constant 0 : i32
    %c0_i32_1 = arith.constant 0 : i32
    return %arg0, %c0_i32, %c0_i32_0 : i32, i32, i32
  }
  func.func @transform_1(%arg0: i32) -> (i32, i32) {
    %c0_i32 = arith.constant 0 : i32
    %c0_i32_0 = arith.constant 0 : i32
    %c0_i32_1 = arith.constant 0 : i32
    return %c0_i32, %c0_i32_0 : i32, i32
  }
  func.func @transform_2(%arg0: i32) -> (i32, i32) {
    %c0_i32 = arith.constant 0 : i32
    %c0_i32_0 = arith.constant 0 : i32
    %c0_i32_1 = arith.constant 0 : i32
    return %c0_i32, %c0_i32_0 : i32, i32
  }
  func.func @transform_3(%arg0: i32) -> (i32, i32, i32) {
    %c0_i32 = arith.constant 0 : i32
    %c0_i32_0 = arith.constant 0 : i32
    %c0_i32_1 = arith.constant 0 : i32
    return %arg0, %c0_i32, %c0_i32_0 : i32, i32, i32
  }
}

</mosaic_0001>

<bundles_post_ra>
// kernel: transformer_bottleneck.1
= control target key start
LH: loop header
LB: loop body
LE: loop exit
PB: predicated region body
PF: predicated region fallthrough
CT: control target
= control target key end

     0   :  { %s5817_s12 = smov 0   ;;  %s8474_s0 = inlined_call_operand.vmem [shape: bf16[2,8,256], index: 0, kind: input, shape index: {}]   ;;  %s8475_s1 = inlined_call_operand.vmem [shape: bf16[288,64], index: 1, kind: input, shape index: {}]   ;;  %s8476_s2 = inlined_call_operand.vmem [shape: f32[96,16], index: 2, kind: input, shape index: {}]   ;;  %s8477_s3 = inlined_call_operand.vmem [shape: f32[2,32,256], index: 3, kind: output, shape index: {}]  }
   0x1 LB: > { %s4810_s13 = sadd.s32 4294967295, %s5785_s12   ;;  %p4814_p0 = scmp.ge.s32.totalorder %s5785_s12, 1  ;;  %s5785_s12 = sphi %s5817_s12, %s13_s12  }
   0x2   : > { %p137_p1 = scmp.lt.s32.totalorder %s5785_s12, 3 }
   0x4   : > { %p138_p2 = pnand %p4814_p0, %p137_p1 }
   0x6   : > { %141 = sbr.rel (%p138_p2) target bundleno = 5064 (0x13c8), region = 32 }
   0xd   : > { %p161_p3 = scmp.lt.s32.totalorder %s4810_s13, 1  ;;  %v8478_v0 = vmov 0   ;;  %v209_v1 = vld [vmem:[%s8476_s2] sm:$0xff]  ;;  %v210_v2 = vld [vmem:[%s8476_s2 + $0x8] sm:$0xff]  ;;  %v211_v3 = vld [vmem:[%s8476_s2 + $0x10] sm:$0xff]  ;;  %vm263_vm0 = vcmask 1043456  }
   0xe   : > { %302 = vmatprep.mubr.bf16.mxu0 %v8478_v0  ;;  %4949 = vset.pattern.permute.xlu0 %v8478_v0  ;;  %v212_v4 = vld [vmem:[%s8476_s2 + $0x18] sm:$0xff]  ;;  %v4974_v8 = vld [vmem:[%s8475_s1] sm:$0xff]   ;;  %vm256_vm1 = vcmask 64512   ;;  %v4975_v10 = vld [vmem:[%s8475_s1 + $0x8] sm:$0xff]   ;;  %v5788_v11 = vmov 1   ;;  %vm413_vm2 = vcmask 261120  }
   0xf   : > { %s8925_s13 = smov (!%p161_p3, %s4810_s13), 1  ;;  %4950 = vset.pattern.permute.xlu1 %v8478_v0  ;;  %464 = vmatprep.mubr.bf16.mxu1 %v8478_v0  ;;  %v213_v12 = vld [vmem:[%s8476_s2 + $0x20] sm:$0xff]  ;;  %v4976_v37 = vld [vmem:[%s8475_s1 + $0x10] sm:$0xff]   ;;  %v4977_v38 = vld [vmem:[%s8475_s1 + $0x18] sm:$0xff]   ;;  %vm4466_vm3 = vcmask 523264  }
  0x10   : > { %223 = vperm.xlu0 %4949, %v209_v1   ;;  %s4928_s20 = sshll.u32 %s8925_s13, 3  ;;  %233 = vperm.xlu1 %4950, %v211_v3   ;;  %v4978_v39 = vld [vmem:[%s8475_s1 + $0x20] sm:$0xff]  }
  0x11   : > { %s165_s25 = scalar_lea.vmem %s8474_s0, %s4928_s20 }
  0x12   : > { %v172_v5 = vld [vmem:[%s165_s25] sm:$0xff]  ;;  %s4929_s25 = sshll.u32 %s8925_s13, 6 }
  0x13   : > { %v4822_v6 = vcombine.high %v172_v5, %v172_v5  ;;  %v4821_v7 = vcombine.low %v172_v5, %v172_v5  ;;  %s8461_s28 = scalar_lea.vmem %s8477_s3, %s4929_s25 }
  0x14   : > { %228 = vperm.xlu0 %4949, %v210_v2   ;;  %238 = vperm.xlu1 %4950, %v212_v4  }
  0x15   : > { %4823 = vmatprep.subr.msk.bf16.mxu0 %vm263_vm0, %v4822_v6  ;;  %v265_v9 = vsel %vm263_vm0, %v4821_v7, 0 }
  0x16   : > { %271 = vmatpush1.bf16.msra.mxu0 %v265_v9 }
  0x18   : > { %4951 = vset.pattern.permute.xlu0 %v5788_v11  ;;  %4952 = vset.pattern.permute.xlu1 %v5788_v11 }
  0x19   : > { %4824 = vmatmul.mubr.msk.bf16.vlgmr.msra.gmra.mrb[0].mxu0 %vm256_vm1, %v4974_v8  ;;  %328 = vperm.xlu0 %4951, %v209_v1  }
  0x1a   : > { %312 = vmatprep.mubr.bf16.mxu0 %v8478_v0  ;;  %345 = vperm.xlu1 %4952, %v213_v12  }
  0x21   : > { %4825 = vmatmul.mubr.msk.bf16.gmra.mrb[4].mxu0 %vm256_vm1, %v4975_v10 }
  0x22   : > { %693 = vmatprep.mubr.bf16.mxu0 %v8478_v0 }
  0x8f   : > { %v224_v13 = vpop.permute.xlu0 %223  ;;  %v234_v21 = vpop.permute.xlu1 %233 }
  0x93   : > { %v229_v15 = vpop.permute.xlu0 %228  ;;  %v239_v28 = vpop.permute.xlu1 %238 }
  0x98   : > { %v329_v40 = vpop.permute.xlu0 %328 }
  0x99   : > { %v346_v51 = vpop.permute.xlu1 %345 }
  0xec   : > { %v304_v14 = vpop.f32.mrb[0].mxu0 }
  0xed   : > { %v306_v16 = vpop.f32.mrb[1].mxu0  ;;  %v5868_v23 = vadd.f32 %v304_v14, %v224_v13 }
  0xee   : > { %v308_v17 = vpop.f32.mrb[2].mxu0  ;;  %v5864_v20 = vadd.f32 %v306_v16, %v224_v13 }
  0xef   : > { %v5862_v18 = vadd.f32 %v308_v17, %v229_v15  ;;  %v310_v19 = vpop.f32.mrb[3].mxu0  ;;  %8607 = vst [vmem:[#allocation5_spill] sm:$0xff] %v5868_v23 }
  0xf0   : > { %8605 = vst [vmem:[#allocation3_spill] sm:$0xff] %v5864_v20  ;;  %v5866_v22 = vadd.f32 %v310_v19, %v229_v15 }
  0xf1   : > { %8604 = vst [vmem:[#allocation2_spill] sm:$0xff] %v5862_v18  ;;  %v323_v25 = vpack.c.bf16 %v5862_v18, %v5868_v23  ;;  %v4979_v23 = vld [vmem:[%s8475_s1 + $0x28] sm:$0xff]  }
  0xf2   : > { %8606 = vst [vmem:[#allocation4_spill] sm:$0xff] %v5866_v22  ;;  %v324_v24 = vpack.c.bf16 %v5866_v22, %v5864_v20 }
  0xf4   : > { %v314_v26 = vpop.f32.mrb[4].mxu0  ;;  %432 = vmatprep.subr.bf16.mxu1 %v324_v24 }
  0xf5   : > { %v316_v27 = vpop.f32.mrb[5].mxu0  ;;  %433 = vmatpush1.bf16.msra.mxu1 %v323_v25  ;;  %v5880_v34 = vadd.f32 %v314_v26, %v234_v21 }
  0xf6   : > { %v318_v29 = vpop.f32.mrb[6].mxu0  ;;  %v5876_v32 = vadd.f32 %v316_v27, %v234_v21 }
  0xf7   : > { %v5874_v30 = vadd.f32 %v318_v29, %v239_v28  ;;  %v320_v31 = vpop.f32.mrb[7].mxu0  ;;  %8611 = vst [vmem:[#allocation9_spill] sm:$0xff] %v5880_v34 }
  0xf8   : > { %8609 = vst [vmem:[#allocation7_spill] sm:$0xff] %v5876_v32  ;;  %v5878_v33 = vadd.f32 %v320_v31, %v239_v28 }
  0xf9   : > { %8608 = vst [vmem:[#allocation6_spill] sm:$0xff] %v5874_v30  ;;  %v325_v36 = vpack.c.bf16 %v5874_v30, %v5880_v34 }
  0xfa   : > { %8610 = vst [vmem:[#allocation8_spill] sm:$0xff] %v5878_v33  ;;  %v326_v35 = vpack.c.bf16 %v5878_v33, %v5876_v32 }
  0xfc   : > { %434 = vmatprep.subr.bf16.mxu1 %v326_v35 }
  0xfd   : > { %435 = vmatpush1.bf16.msra.mxu1 %v325_v36 }
 0x100   : > { %4832 = vmatmul.mubr.msk.bf16.vlgmr.msra.gmra.mrb[0].mxu1 %vm413_vm2, %v4976_v37 }
 0x101   : > { %474 = vmatprep.mubr.bf16.mxu1 %v8478_v0 }
 0x108   : > { %4833 = vmatmul.mubr.msk.bf16.gmra.mrb[4].mxu1 %vm413_vm2, %v4977_v38 }
 0x109   : > { %484 = vmatprep.mubr.bf16.mxu1 %v8478_v0 }
 0x110   : > { %4834 = vmatmul.mubr.msk.bf16.gmra.mrb[8].mxu1 %vm413_vm2, %v4978_v39 }
 0x111   : > { %494 = vmatprep.mubr.bf16.mxu1 %v8478_v0 }
 0x118   : > { %4835 = vmatmul.mubr.msk.bf16.gmra.mrb[12].mxu1 %vm413_vm2, %v4979_v23 }
 0x1d3   : > { %v466_v41 = vpop.f32.mrb[0].mxu1 }
 0x1d4   : > { %v467_v42 = vadd.f32 %v466_v41, %v329_v40  ;;  %v468_v43 = vpop.f32.mrb[1].mxu1 }
 0x1d5   : > { %v469_v44 = vadd.f32 %v468_v43, %v329_v40  ;;  %v5901_v45 = vpop.f32.mrb[2].mxu1 }
 0x1d6   : > { %8612 = vst [vmem:[#allocation10_spill] sm:$0xff] %v5901_v45  ;;  %v5903_v46 = vpop.f32.mrb[3].mxu1  ;;  %525 = vxpose.xlu1.b32.start.end [1/1] (short) %v467_v42, 128  ;;  %v8633_v45 = vmov 0  }
 0x1d7   : > { %8613 = vst [vmem:[#allocation11_spill] sm:$0xff] %v5903_v46  ;;  %557 = vxpose.xlu0.b32.start.end [1/1] (short) %v469_v44, 128  ;;  %504 = vmatprep.mubr.bf16.mxu1 %v8633_v45 }
 0x1db   : > { %v5905_v47 = vpop.f32.mrb[4].mxu1 }
 0x1dc   : > { %8614 = vst [vmem:[#allocation12_spill] sm:$0xff] %v5905_v47  ;;  %v5907_v48 = vpop.f32.mrb[5].mxu1 }
 0x1dd   : > { %8615 = vst [vmem:[#allocation13_spill] sm:$0xff] %v5907_v48  ;;  %v5909_v49 = vpop.f32.mrb[6].mxu1 }
 0x1de   : > { %8616 = vst [vmem:[#allocation14_spill] sm:$0xff] %v5909_v49  ;;  %v5911_v50 = vpop.f32.mrb[7].mxu1 }
 0x1df   : > { %8617 = vst [vmem:[#allocation15_spill] sm:$0xff] %v5911_v50 }
 0x1e3   : > { %v486_v52 = vpop.f32.mrb[8].mxu1 }
 0x1e4   : > { %v487_v53 = vadd.f32 %v486_v52, %v346_v51  ;;  %v488_v54 = vpop.f32.mrb[9].mxu1 }
 0x1e5   : > { %v489_v55 = vadd.f32 %v488_v54, %v346_v51  ;;  %v5913_v56 = vpop.f32.mrb[10].mxu1 }
 0x1e6   : > { %8618 = vst [vmem:[#allocation16_spill] sm:$0xff] %v5913_v56  ;;  %v605_v57 = vpack.c.bf16 %v487_v53, %v487_v53  ;;  %v5915_v58 = vpop.f32.mrb[11].mxu1 }
 0x1e7   : > { %8619 = vst [vmem:[#allocation17_spill] sm:$0xff] %v5915_v58  ;;  %v606_v59 = vpack.c.bf16 %v489_v55, %v489_v55 }
 0x1e8   : > { %v656_v60 = vsel %vm263_vm0, %v605_v57, 0 }
 0x1e9   : > { %4838 = vmatprep.subr.msk.bf16.mxu0 %vm263_vm0, %v606_v59 }
 0x1ea   : > { %662 = vmatpush1.bf16.msra.mxu0 %v656_v60 }
 0x256   : > { %v541_v61 = vpop.trf.xlu1 }
 0x257   : > { %v573_v11 = vpop.trf.xlu0 }
 0x25a   : > { %v542_v62 = vpop.trf.xlu1 }
 0x25b   : > { %v589_v63 = vpack.c.bf16 %v542_v62, %v541_v61  ;;  %v574_v15 = vpop.trf.xlu0 }
 0x25c   : > { %v597_v36 = vpack.c.bf16 %v574_v15, %v573_v11 }
 0x25d   : > { %4839 = vmatmul.mubr.msk.bf16.vlgmr.msra.gmra.mrb[8].mxu0 %vm256_vm1, %v589_v63 }
 0x25e   : > { %v543_v1 = vpop.trf.xlu1  ;;  %703 = vmatprep.mubr.bf16.mxu0 %v8478_v0 }
 0x25f   : > { %v575_v19 = vpop.trf.xlu0 }
 0x262   : > { %v544_v2 = vpop.trf.xlu1 }
 0x263   : > { %v590_v3 = vpack.c.bf16 %v544_v2, %v543_v1  ;;  %v576_v25 = vpop.trf.xlu0 }
 0x264   : > { %v598_v38 = vpack.c.bf16 %v576_v25, %v575_v19 }
 0x265   : > { %4840 = vmatmul.mubr.msk.bf16.gmra.mrb[12].mxu0 %vm256_vm1, %v590_v3 }
 0x266   : > { %v545_v4 = vpop.trf.xlu1  ;;  %713 = vmatprep.mubr.bf16.mxu0 %v8478_v0 }
 0x267   : > { %v577_v28 = vpop.trf.xlu0 }
 0x26a   : > { %v546_v5 = vpop.trf.xlu1 }
 0x26b   : > { %v591_v6 = vpack.c.bf16 %v546_v5, %v545_v4  ;;  %v578_v35 = vpop.trf.xlu0 }
 0x26c   : > { %v599_v41 = vpack.c.bf16 %v578_v35, %v577_v28 }
 0x26d   : > { %4841 = vmatmul.mubr.msk.bf16.gmra.mrb[16].mxu0 %vm256_vm1, %v591_v6 }
 0x26e   : > { %v547_v7 = vpop.trf.xlu1  ;;  %723 = vmatprep.mubr.bf16.mxu0 %v8478_v0 }
 0x26f   : > { %v579_v37 = vpop.trf.xlu0 }
 0x272   : > { %v548_v8 = vpop.trf.xlu1 }
 0x273   : > { %v592_v9 = vpack.c.bf16 %v548_v8, %v547_v7  ;;  %v580_v39 = vpop.trf.xlu0 }
 0x274   : > { %v600_v43 = vpack.c.bf16 %v580_v39, %v579_v37 }
 0x275   : > { %4842 = vmatmul.mubr.msk.bf16.gmra.mrb[20].mxu0 %vm256_vm1, %v592_v9 }
 0x276   : > { %v549_v10 = vpop.trf.xlu1  ;;  %733 = vmatprep.mubr.bf16.mxu0 %v8478_v0 }
 0x277   : > { %v581_v40 = vpop.trf.xlu0 }
 0x27a   : > { %v550_v12 = vpop.trf.xlu1 }
 0x27b   : > { %v593_v13 = vpack.c.bf16 %v550_v12, %v549_v10  ;;  %v582_v42 = vpop.trf.xlu0 }
 0x27c   : > { %v601_v52 = vpack.c.bf16 %v582_v42, %v581_v40 }
 0x27d   : > { %4843 = vmatmul.mubr.msk.bf16.gmra.mrb[24].mxu0 %vm256_vm1, %v593_v13 }
 0x27e   : > { %v551_v14 = vpop.trf.xlu1  ;;  %743 = vmatprep.mubr.bf16.mxu0 %v8478_v0 }
 0x27f   : > { %v583_v44 = vpop.trf.xlu0 }
 0x282   : > { %v552_v16 = vpop.trf.xlu1 }
 0x283   : > { %v594_v17 = vpack.c.bf16 %v552_v16, %v551_v14  ;;  %v584_v51 = vpop.trf.xlu0 }
 0x284   : > { %v602_v54 = vpack.c.bf16 %v584_v51, %v583_v44 }
 0x285   : > { %4844 = vmatmul.mubr.msk.bf16.gmra.mrb[28].mxu0 %vm256_vm1, %v594_v17 }
 0x286   : > { %v553_v21 = vpop.trf.xlu1  ;;  %753 = vmatprep.mubr.bf16.mxu0 %v8478_v0 }
 0x287   : > { %v585_v53 = vpop.trf.xlu0 }
 0x28a   : > { %v554_v24 = vpop.trf.xlu1 }
 0x28b   : > { %v595_v26 = vpack.c.bf16 %v554_v24, %v553_v21  ;;  %v586_v55 = vpop.trf.xlu0 }
 0x28c   : > { %v603_v59 = vpack.c.bf16 %v586_v55, %v585_v53 }
 0x28d   : > { %4845 = vmatmul.mubr.msk.bf16.gmra.mrb[32].mxu0 %vm256_vm1, %v595_v26 }
 0x28e   : > { %v555_v27 = vpop.trf.xlu1  ;;  %763 = vmatprep.mubr.bf16.mxu0 %v8478_v0 }
 0x28f   : > { %v587_v57 = vpop.trf.xlu0 }
 0x292   : > { %v556_v29 = vpop.trf.xlu1 }
 0x293   : > { %v596_v31 = vpack.c.bf16 %v556_v29, %v555_v27  ;;  %v588_v60 = vpop.trf.xlu0 }
 0x294   : > { %v604_v61 = vpack.c.bf16 %v588_v60, %v587_v57 }
 0x295   : > { %4846 = vmatmul.mubr.msk.bf16.gmra.mrb[36].mxu0 %vm256_vm1, %v596_v31 }
 0x296   : > { %773 = vmatprep.mubr.bf16.mxu0 %v8478_v0 }
 0x29d   : > { %4847 = vmatmul.mubr.msk.bf16.gmra.mrb[40].mxu0 %vm256_vm1, %v597_v36 }
 0x29e   : > { %783 = vmatprep.mubr.bf16.mxu0 %v8478_v0 }
 0x2a5   : > { %4848 = vmatmul.mubr.msk.bf16.gmra.mrb[44].mxu0 %vm256_vm1, %v598_v38 }
 0x2a6   : > { %793 = vmatprep.mubr.bf16.mxu0 %v8478_v0 }
 0x2ad   : > { %4849 = vmatmul.mubr.msk.bf16.gmra.mrb[48].mxu0 %vm256_vm1, %v599_v41 }
 0x2ae   : > { %803 = vmatprep.mubr.bf16.mxu0 %v8478_v0 }
 0x2b5   : > { %4850 = vmatmul.mubr.msk.bf16.gmra.mrb[52].mxu0 %vm256_vm1, %v600_v43 }
 0x2b6   : > { %813 = vmatprep.mubr.bf16.mxu0 %v8478_v0 }
 0x2bd   : > { %4851 = vmatmul.mubr.msk.bf16.gmra.mrb[56].mxu0 %vm256_vm1, %v601_v52 }
 0x2be   : > { %823 = vmatprep.mubr.bf16.mxu0 %v8478_v0 }
 0x2c5   : > { %4852 = vmatmul.mubr.msk.bf16.gmra.mrb[60].mxu0 %vm256_vm1, %v602_v54 }
 0x2c6   : > { %833 = vmatprep.mubr.bf16.mxu0 %v8478_v0 }
 0x2cd   : > { %4853 = vmatmul.mubr.msk.bf16.gmra.mrb[64].mxu0 %vm256_vm1, %v603_v59 }
 0x2ce   : > { %843 = vmatprep.mubr.bf16.mxu0 %v8478_v0 }
 0x2d5   : > { %4854 = vmatmul.mubr.msk.bf16.gmra.mrb[68].mxu0 %vm256_vm1, %v604_v61 }
 0x330   : > { %v5950_v62 = vpop.f32.mrb[8].mxu0 }
 0x331   : > { %v5952_v63 = vpop.f32.mrb[9].mxu0 }
 0x332   : > { %v5954_v1 = vpop.f32.mrb[10].mxu0  ;;  %v854_v2 = vmax.f32 %v5950_v62, %v5952_v63 }
 0x333   : > { %v5958_v3 = vpop.f32.mrb[11].mxu0 }
 0x334   : > { %855 = vmax.xlane.f32.xlu0 %v854_v2  ;;  %v857_v4 = vmax.f32 %v5954_v1, %v5958_v3 }
 0x336   : > { %858 = vmax.xlane.f32.xlu1 %v857_v4 }
 0x338   : > { %v5962_v5 = vpop.f32.mrb[12].mxu0 }
 0x339   : > { %v5964_v6 = vpop.f32.mrb[13].mxu0 }
 0x33a   : > { %v5966_v7 = vpop.f32.mrb[14].mxu0  ;;  %v860_v8 = vmax.f32 %v5962_v5, %v5964_v6 }
 0x33b   : > { %v5970_v9 = vpop.f32.mrb[15].mxu0 }
 0x33c   : > { %861 = vmax.xlane.f32.xlu0 %v860_v8  ;;  %v863_v10 = vmax.f32 %v5966_v7, %v5970_v9 }
 0x33e   : > { %864 = vmax.xlane.f32.xlu1 %v863_v10 }
 0x340   : > { %v5974_v11 = vpop.f32.mrb[16].mxu0 }
 0x341   : > { %v5976_v12 = vpop.f32.mrb[17].mxu0 }
 0x342   : > { %v5978_v13 = vpop.f32.mrb[18].mxu0  ;;  %v866_v14 = vmax.f32 %v5974_v11, %v5976_v12 }
 0x343   : > { %v5982_v15 = vpop.f32.mrb[19].mxu0 }
 0x344   : > { %867 = vmax.xlane.f32.xlu0 %v866_v14  ;;  %v869_v16 = vmax.f32 %v5978_v13, %v5982_v15 }
 0x346   : > { %870 = vmax.xlane.f32.xlu1 %v869_v16 }
 0x348   : > { %v5986_v17 = vpop.f32.mrb[20].mxu0 }
 0x349   : > { %v5988_v19 = vpop.f32.mrb[21].mxu0 }
 0x34a   : > { %v5990_v21 = vpop.f32.mrb[22].mxu0  ;;  %v872_v24 = vmax.f32 %v5986_v17, %v5988_v19 }
 0x34b   : > { %v5994_v25 = vpop.f32.mrb[23].mxu0 }
 0x34c   : > { %873 = vmax.xlane.f32.xlu0 %v872_v24  ;;  %v875_v26 = vmax.f32 %v5990_v21, %v5994_v25 }
 0x34e   : > { %876 = vmax.xlane.f32.xlu1 %v875_v26 }
 0x350   : > { %v5998_v27 = vpop.f32.mrb[24].mxu0 }
 0x351   : > { %v6000_v28 = vpop.f32.mrb[25].mxu0 }
 0x352   : > { %v6002_v29 = vpop.f32.mrb[26].mxu0  ;;  %v878_v31 = vmax.f32 %v5998_v27, %v6000_v28 }
 0x353   : > { %v6006_v35 = vpop.f32.mrb[27].mxu0 }
 0x354   : > { %879 = vmax.xlane.f32.xlu0 %v878_v31  ;;  %v881_v36 = vmax.f32 %v6002_v29, %v6006_v35 }
 0x356   : > { %882 = vmax.xlane.f32.xlu1 %v881_v36 }
 0x358   : > { %v6010_v37 = vpop.f32.mrb[28].mxu0 }
 0x359   : > { %v6012_v38 = vpop.f32.mrb[29].mxu0 }
 0x35a   : > { %v6014_v39 = vpop.f32.mrb[30].mxu0  ;;  %v884_v40 = vmax.f32 %v6010_v37, %v6012_v38 }
 0x35b   : > { %v6018_v41 = vpop.f32.mrb[31].mxu0 }
 0x35c   : > { %885 = vmax.xlane.f32.xlu0 %v884_v40  ;;  %v887_v42 = vmax.f32 %v6014_v39, %v6018_v41 }
 0x35e   : > { %888 = vmax.xlane.f32.xlu1 %v887_v42 }
 0x360   : > { %v6022_v43 = vpop.f32.mrb[32].mxu0 }
 0x361   : > { %v6024_v44 = vpop.f32.mrb[33].mxu0 }
 0x362   : > { %v6026_v51 = vpop.f32.mrb[34].mxu0  ;;  %v890_v52 = vmax.f32 %v6022_v43, %v6024_v44 }
 0x363   : > { %v6030_v53 = vpop.f32.mrb[35].mxu0 }
 0x364   : > { %891 = vmax.xlane.f32.xlu0 %v890_v52  ;;  %v893_v54 = vmax.f32 %v6026_v51, %v6030_v53 }
 0x366   : > { %894 = vmax.xlane.f32.xlu1 %v893_v54 }
 0x368   : > { %v6034_v55 = vpop.f32.mrb[36].mxu0 }
 0x369   : > { %v6036_v57 = vpop.f32.mrb[37].mxu0 }
 0x36a   : > { %v6038_v59 = vpop.f32.mrb[38].mxu0  ;;  %v896_v60 = vmax.f32 %v6034_v55, %v6036_v57 }
 0x36b   : > { %v6042_v61 = vpop.f32.mrb[39].mxu0 }
 0x36c   : > { %897 = vmax.xlane.f32.xlu0 %v896_v60  ;;  %v899_v2 = vmax.f32 %v6038_v59, %v6042_v61 }
 0x36e   : > { %900 = vmax.xlane.f32.xlu1 %v899_v2 }
 0x370   : > { %v6046_v4 = vpop.f32.mrb[40].mxu0 }
 0x371   : > { %v6048_v8 = vpop.f32.mrb[41].mxu0 }
 0x372   : > { %v6050_v10 = vpop.f32.mrb[42].mxu0  ;;  %v902_v14 = vmax.f32 %v6046_v4, %v6048_v8 }
 0x373   : > { %v6054_v16 = vpop.f32.mrb[43].mxu0 }
 0x374   : > { %8620 = vst [vmem:[#allocation18_spill] sm:$0xff] %v6054_v16  ;;  %903 = vmax.xlane.f32.xlu0 %v902_v14  ;;  %v905_v24 = vmax.f32 %v6050_v10, %v6054_v16 }
 0x376   : > { %906 = vmax.xlane.f32.xlu1 %v905_v24 }
 0x378   : > { %v6058_v26 = vpop.f32.mrb[44].mxu0 }
 0x379   : > { %8621 = vst [vmem:[#allocation19_spill] sm:$0xff] %v6058_v26  ;;  %v6060_v31 = vpop.f32.mrb[45].mxu0 }
 0x37a   : > { %8622 = vst [vmem:[#allocation20_spill] sm:$0xff] %v6060_v31  ;;  %v6062_v36 = vpop.f32.mrb[46].mxu0  ;;  %v908_v40 = vmax.f32 %v6058_v26, %v6060_v31 }
 0x37b   : > { %8623 = vst [vmem:[#allocation21_spill] sm:$0xff] %v6062_v36  ;;  %v6066_v42 = vpop.f32.mrb[47].mxu0 }
 0x37c   : > { %8624 = vst [vmem:[#allocation22_spill] sm:$0xff] %v6066_v42  ;;  %909 = vmax.xlane.f32.xlu0 %v908_v40  ;;  %v911_v52 = vmax.f32 %v6062_v36, %v6066_v42 }
 0x37e   : > { %912 = vmax.xlane.f32.xlu1 %v911_v52 }
 0x380   : > { %v6070_v54 = vpop.f32.mrb[48].mxu0 }
 0x381   : > { %8625 = vst [vmem:[#allocation23_spill] sm:$0xff] %v6070_v54  ;;  %v6072_v60 = vpop.f32.mrb[49].mxu0 }
 0x382   : > { %8626 = vst [vmem:[#allocation24_spill] sm:$0xff] %v6072_v60  ;;  %v6074_v2 = vpop.f32.mrb[50].mxu0  ;;  %v914_v14 = vmax.f32 %v6070_v54, %v6072_v60 }
 0x383   : > { %8627 = vst [vmem:[#allocation25_spill] sm:$0xff] %v6074_v2  ;;  %v6078_v24 = vpop.f32.mrb[51].mxu0 }
 0x384   : > { %8628 = vst [vmem:[#allocation26_spill] sm:$0xff] %v6078_v24  ;;  %915 = vmax.xlane.f32.xlu0 %v914_v14  ;;  %v917_v0 = vmax.f32 %v6074_v2, %v6078_v24  ;;  %v4980_v24 = vld [vmem:[%s8475_s1 + $0x30] sm:$0xff]  }
 0x385   : > { %4836 = vmatmul.mubr.msk.bf16.gmra.mrb[16].mxu1 %vm413_vm2, %v4980_v24 }
 0x386   : > { %918 = vmax.xlane.f32.xlu1 %v917_v0  ;;  %514 = vmatprep.mubr.bf16.mxu1 %v8633_v45 }
 0x388   : > { %v6082_v40 = vpop.f32.mrb[52].mxu0 }
 0x389   : > { %8629 = vst [vmem:[#allocation27_spill] sm:$0xff] %v6082_v40  ;;  %v6084_v33 = vpop.f32.mrb[53].mxu0 }
 0x38a   : > { %8630 = vst [vmem:[#allocation28_spill] sm:$0xff] %v6084_v33  ;;  %v6086_v52 = vpop.f32.mrb[54].mxu0  ;;  %v920_v30 = vmax.f32 %v6082_v40, %v6084_v33 }
 0x38b   : > { %8631 = vst [vmem:[#allocation29_spill] sm:$0xff] %v6086_v52  ;;  %v6090_v32 = vpop.f32.mrb[55].mxu0 }
 0x38c   : > { %8632 = vst [vmem:[#allocation30_spill] sm:$0xff] %v6090_v32  ;;  %921 = vmax.xlane.f32.xlu0 %v920_v30  ;;  %v923_v34 = vmax.f32 %v6086_v52, %v6090_v32 }
 0x38e   : > { %924 = vmax.xlane.f32.xlu1 %v923_v34 }
 0x390   : > { %v6094_v14 = vpop.f32.mrb[56].mxu0 }
 0x391   : > { %v6096_v22 = vpop.f32.mrb[57].mxu0 }
 0x392   : > { %v6098_v0 = vpop.f32.mrb[58].mxu0 }
 0x393   : > { %v6102_v18 = vpop.f32.mrb[59].mxu0 }
 0x398   : > { %v6106_v50 = vpop.f32.mrb[60].mxu0 }
 0x399   : > { %v6108_v30 = vpop.f32.mrb[61].mxu0 }
 0x39a   : > { %v6110_v49 = vpop.f32.mrb[62].mxu0 }
 0x39b   : > { %v6114_v48 = vpop.f32.mrb[63].mxu0 }
 0x3a0   : > { %v6118_v20 = vpop.f32.mrb[64].mxu0 }
 0x3a1   : > { %v6120_v56 = vpop.f32.mrb[65].mxu0 }
 0x3a2   : > { %v6122_v58 = vpop.f32.mrb[66].mxu0 }
 0x3a3   : > { %v6126_v46 = vpop.f32.mrb[67].mxu0 }
 0x3a8   : > { %v6130_v34 = vpop.f32.mrb[68].mxu0 }
 0x3a9   : > { %v6132_v32 = vpop.f32.mrb[69].mxu0 }
 0x3aa   : > { %v6134_v52 = vpop.f32.mrb[70].mxu0 }
 0x3ab   : > { %v6138_v33 = vpop.f32.mrb[71].mxu0 }
 0x3c1   : > { %v856_v47 = vpop.xlane.xlu0 %855 }
 0x3c2   : > { %v950_v2 = vsub.f32 %v5950_v62, %v856_v47  ;;  %v951_v40 = vsub.f32 %v5952_v63, %v856_v47 }
 0x3c3   : > { %v859_v60 = vpop.xlane.xlu1 %858 }
 0x3c4   : > { %v1014_v54 = vmul.f32 1.442695, %v950_v2  ;;  %v1016_v42 = vmul.f32 1.442695, %v951_v40  ;;  %v952_v23 = vsub.f32 %v5954_v1, %v859_v60  ;;  %v953_v36 = vsub.f32 %v5958_v3, %v859_v60 }
 0x3c6   : > { %4992 = vpow2.f32 %v1014_v54  ;;  %v1018_v31 = vmul.f32 1.442695, %v952_v23  ;;  %v1020_v26 = vmul.f32 1.442695, %v953_v36 }
 0x3c7   : > { %4994 = vpow2.f32 %v1016_v42 }
 0x3c8   : > { %4996 = vpow2.f32 %v1018_v31 }
 0x3c9   : > { %4998 = vpow2.f32 %v1020_v26  ;;  %v862_v24 = vpop.xlane.xlu0 %861 }
 0x3ca   : > { %v954_v45 = vsub.f32 %v5962_v5, %v862_v24  ;;  %v955_v62 = vsub.f32 %v5964_v6, %v862_v24 }
 0x3cb   : > { %v865_v16 = vpop.xlane.xlu1 %864 }
 0x3cc   : > { %v1022_v47 = vmul.f32 1.442695, %v954_v45  ;;  %v1024_v63 = vmul.f32 1.442695, %v955_v62  ;;  %v956_v2 = vsub.f32 %v5966_v7, %v865_v16  ;;  %v957_v1 = vsub.f32 %v5970_v9, %v865_v16 }
 0x3ce   : > { %5000 = vpow2.f32 %v1022_v47  ;;  %v1026_v3 = vmul.f32 1.442695, %v956_v2  ;;  %v1028_v54 = vmul.f32 1.442695, %v957_v1  ;;  %v8634_v47 = vmax.f32 %v6094_v14, %v6096_v22 }
 0x3cf   : > { %5002 = vpow2.f32 %v1024_v63 }
 0x3d0   : > { %v6160_v36 = vpop.eup %4992  ;;  %5004 = vpow2.f32 %v1026_v3 }
 0x3d1   : > { %v6162_v26 = vpop.eup %4994  ;;  %5006 = vpow2.f32 %v1028_v54  ;;  %v868_v5 = vpop.xlane.xlu0 %867 }
 0x3d2   : > { %v6164_v31 = vpop.eup %4996  ;;  %v958_v45 = vsub.f32 %v5974_v11, %v868_v5  ;;  %v959_v6 = vsub.f32 %v5976_v12, %v868_v5  ;;  %v1142_v7 = vadd.f32 %v6162_v26, %v6160_v36  ;;  %v8635_v5 = vmax.f32 %v6098_v0, %v6102_v18 }
 0x3d3   : > { %v6170_v9 = vpop.eup %4998  ;;  %v871_v16 = vpop.xlane.xlu1 %870 }
 0x3d4   : > { %v1030_v42 = vmul.f32 1.442695, %v958_v45  ;;  %v1032_v60 = vmul.f32 1.442695, %v959_v6  ;;  %1143 = vadd.xlane.f32.xlu0 %v1142_v7  ;;  %v960_v40 = vsub.f32 %v5978_v13, %v871_v16  ;;  %v961_v23 = vsub.f32 %v5982_v15, %v871_v16 }
 0x3d5   : > { %v1145_v24 = vadd.f32 %v6170_v9, %v6164_v31 }
 0x3d6   : > { %5008 = vpow2.f32 %v1030_v42  ;;  %v1034_v11 = vmul.f32 1.442695, %v960_v40  ;;  %v1036_v62 = vmul.f32 1.442695, %v961_v23  ;;  %v8636_v23 = vmax.f32 %v6106_v50, %v6108_v30 }
 0x3d7   : > { %5010 = vpow2.f32 %v1032_v60  ;;  %1146 = vadd.xlane.f32.xlu1 %v1145_v24 }
 0x3d8   : > { %v6176_v12 = vpop.eup %5000  ;;  %5012 = vpow2.f32 %v1034_v11  ;;  %927 = vmax.xlane.f32.xlu0 %v8634_v47 }
 0x3d9   : > { %v6181_v63 = vpop.eup %5002  ;;  %5014 = vpow2.f32 %v1036_v62  ;;  %v874_v13 = vpop.xlane.xlu0 %873 }
 0x3da   : > { %v6183_v15 = vpop.eup %5004  ;;  %v962_v2 = vsub.f32 %v5986_v17, %v874_v13  ;;  %v963_v1 = vsub.f32 %v5988_v19, %v874_v13  ;;  %v1148_v3 = vadd.f32 %v6181_v63, %v6176_v12 }
 0x3db   : > { %v6189_v54 = vpop.eup %5006  ;;  %930 = vmax.xlane.f32.xlu1 %v8635_v5  ;;  %v877_v45 = vpop.xlane.xlu1 %876 }
 0x3dc   : > { %v1038_v6 = vmul.f32 1.442695, %v962_v2  ;;  %v1040_v7 = vmul.f32 1.442695, %v963_v1  ;;  %1149 = vadd.xlane.f32.xlu0 %v1148_v3  ;;  %v964_v16 = vsub.f32 %v5990_v21, %v877_v45  ;;  %v965_v42 = vsub.f32 %v5994_v25, %v877_v45 }
 0x3dd   : > { %v1151_v17 = vadd.f32 %v6189_v54, %v6183_v15  ;;  %v8637_v2 = vmax.f32 %v6110_v49, %v6114_v48 }
 0x3de   : > { %5016 = vpow2.f32 %v1038_v6  ;;  %v1042_v19 = vmul.f32 1.442695, %v964_v16  ;;  %v1044_v60 = vmul.f32 1.442695, %v965_v42  ;;  %v8638_v42 = vmax.f32 %v6118_v20, %v6120_v56 }
 0x3df   : > { %5018 = vpow2.f32 %v1040_v7  ;;  %1152 = vadd.xlane.f32.xlu1 %v1151_v17 }
 0x3e0   : > { %v6198_v40 = vpop.eup %5008  ;;  %5020 = vpow2.f32 %v1042_v19  ;;  %933 = vmax.xlane.f32.xlu0 %v8636_v23 }
 0x3e1   : > { %v6203_v24 = vpop.eup %5010  ;;  %5022 = vpow2.f32 %v1044_v60  ;;  %v880_v21 = vpop.xlane.xlu0 %879 }
 0x3e2   : > { %v6205_v25 = vpop.eup %5012  ;;  %v966_v11 = vsub.f32 %v5998_v27, %v880_v21  ;;  %v967_v62 = vsub.f32 %v6000_v28, %v880_v21  ;;  %v1154_v47 = vadd.f32 %v6203_v24, %v6198_v40 }
 0x3e3   : > { %v6211_v13 = vpop.eup %5014  ;;  %936 = vmax.xlane.f32.xlu1 %v8637_v2  ;;  %v883_v1 = vpop.xlane.xlu1 %882 }
 0x3e4   : > { %v1046_v3 = vmul.f32 1.442695, %v966_v11  ;;  %v1048_v5 = vmul.f32 1.442695, %v967_v62  ;;  %1155 = vadd.xlane.f32.xlu0 %v1154_v47  ;;  %v968_v45 = vsub.f32 %v6002_v29, %v883_v1  ;;  %v969_v6 = vsub.f32 %v6006_v35, %v883_v1 }
 0x3e5   : > { %v1157_v27 = vadd.f32 %v6211_v13, %v6205_v25  ;;  %v8639_v11 = vmax.f32 %v6122_v58, %v6126_v46 }
 0x3e6   : > { %5024 = vpow2.f32 %v1046_v3  ;;  %v1050_v28 = vmul.f32 1.442695, %v968_v45  ;;  %v1052_v7 = vmul.f32 1.442695, %v969_v6  ;;  %v8640_v6 = vmax.f32 %v6130_v34, %v6132_v32 }
 0x3e7   : > { %5026 = vpow2.f32 %v1048_v5  ;;  %1158 = vadd.xlane.f32.xlu1 %v1157_v27 }
 0x3e8   : > { %v6220_v16 = vpop.eup %5016  ;;  %5028 = vpow2.f32 %v1050_v28  ;;  %939 = vmax.xlane.f32.xlu0 %v8638_v42 }
 0x3e9   : > { %v6225_v17 = vpop.eup %5018  ;;  %5030 = vpow2.f32 %v1052_v7  ;;  %v886_v29 = vpop.xlane.xlu0 %885 }
 0x3ea   : > { %v6227_v35 = vpop.eup %5020  ;;  %v970_v19 = vsub.f32 %v6010_v37, %v886_v29  ;;  %v971_v60 = vsub.f32 %v6012_v38, %v886_v29  ;;  %v1160_v23 = vadd.f32 %v6225_v17, %v6220_v16 }
 0x3eb   : > { %v6233_v21 = vpop.eup %5022  ;;  %942 = vmax.xlane.f32.xlu1 %v8639_v11  ;;  %v889_v62 = vpop.xlane.xlu1 %888 }
 0x3ec   : > { %v1054_v47 = vmul.f32 1.442695, %v970_v19  ;;  %v1056_v2 = vmul.f32 1.442695, %v971_v60  ;;  %1161 = vadd.xlane.f32.xlu0 %v1160_v23  ;;  %v972_v1 = vsub.f32 %v6014_v39, %v889_v62  ;;  %v973_v3 = vsub.f32 %v6018_v41, %v889_v62 }
 0x3ed   : > { %v1163_v37 = vadd.f32 %v6233_v21, %v6227_v35  ;;  %v8641_v19 = vmax.f32 %v6134_v52, %v6138_v33 }
 0x3ee   : > { %5032 = vpow2.f32 %v1054_v47  ;;  %v1058_v38 = vmul.f32 1.442695, %v972_v1  ;;  %v1060_v5 = vmul.f32 1.442695, %v973_v3 }
 0x3ef   : > { %5034 = vpow2.f32 %v1056_v2  ;;  %1164 = vadd.xlane.f32.xlu1 %v1163_v37 }
 0x3f0   : > { %v6242_v45 = vpop.eup %5024  ;;  %5036 = vpow2.f32 %v1058_v38  ;;  %945 = vmax.xlane.f32.xlu0 %v8640_v6 }
 0x3f1   : > { %v6247_v27 = vpop.eup %5026  ;;  %5038 = vpow2.f32 %v1060_v5  ;;  %v892_v39 = vpop.xlane.xlu0 %891 }
 0x3f2   : > { %v6249_v41 = vpop.eup %5028  ;;  %v974_v28 = vsub.f32 %v6022_v43, %v892_v39  ;;  %v975_v7 = vsub.f32 %v6024_v44, %v892_v39  ;;  %v1166_v42 = vadd.f32 %v6247_v27, %v6242_v45 }
 0x3f3   : > { %v6255_v29 = vpop.eup %5030  ;;  %948 = vmax.xlane.f32.xlu1 %v8641_v19  ;;  %v895_v60 = vpop.xlane.xlu1 %894 }
 0x3f4   : > { %v1062_v23 = vmul.f32 1.442695, %v974_v28  ;;  %v1064_v11 = vmul.f32 1.442695, %v975_v7  ;;  %1167 = vadd.xlane.f32.xlu0 %v1166_v42  ;;  %v976_v62 = vsub.f32 %v6026_v51, %v895_v60  ;;  %v977_v47 = vsub.f32 %v6030_v53, %v895_v60 }
 0x3f5   : > { %v1169_v43 = vadd.f32 %v6255_v29, %v6249_v41 }
 0x3f6   : > { %5040 = vpow2.f32 %v1062_v23  ;;  %v1066_v44 = vmul.f32 1.442695, %v976_v62  ;;  %v1068_v2 = vmul.f32 1.442695, %v977_v47 }
 0x3f7   : > { %5042 = vpow2.f32 %v1064_v11  ;;  %1170 = vadd.xlane.f32.xlu1 %v1169_v43 }
 0x3f8   : > { %v6264_v1 = vpop.eup %5032  ;;  %5044 = vpow2.f32 %v1066_v44 }
 0x3f9   : > { %v6266_v3 = vpop.eup %5034  ;;  %5046 = vpow2.f32 %v1068_v2  ;;  %v898_v37 = vpop.xlane.xlu0 %897 }
 0x3fa   : > { %v6268_v38 = vpop.eup %5036  ;;  %v978_v51 = vsub.f32 %v6034_v55, %v898_v37  ;;  %v979_v53 = vsub.f32 %v6036_v57, %v898_v37  ;;  %v1172_v5 = vadd.f32 %v6266_v3, %v6264_v1 }
 0x3fb   : > { %v6274_v6 = vpop.eup %5038  ;;  %v901_v39 = vpop.xlane.xlu1 %900 }
 0x3fc   : > { %v1070_v28 = vmul.f32 1.442695, %v978_v51  ;;  %v1072_v7 = vmul.f32 1.442695, %v979_v53  ;;  %1173 = vadd.xlane.f32.xlu0 %v1172_v5  ;;  %v980_v42 = vsub.f32 %v6038_v59, %v901_v39  ;;  %v981_v19 = vsub.f32 %v6042_v61, %v901_v39  ;;  %v8642_v5 = vld [vmem:[#allocation18_spill] sm:$0xff] }
 0x3fd   : > { %v1175_v60 = vadd.f32 %v6274_v6, %v6268_v38 }
 0x3fe   : > { %5048 = vpow2.f32 %v1070_v28  ;;  %v1074_v55 = vmul.f32 1.442695, %v980_v42  ;;  %v1076_v23 = vmul.f32 1.442695, %v981_v19 }
 0x3ff   : > { %5050 = vpow2.f32 %v1072_v7  ;;  %1176 = vadd.xlane.f32.xlu1 %v1175_v60 }
 0x400   : > { %v6280_v57 = vpop.eup %5040  ;;  %5052 = vpow2.f32 %v1074_v55 }
 0x401   : > { %v6282_v11 = vpop.eup %5042  ;;  %5054 = vpow2.f32 %v1076_v23  ;;  %v904_v62 = vpop.xlane.xlu0 %903  ;;  %v8646_v23 = vld [vmem:[#allocation20_spill] sm:$0xff] }
 0x402   : > { %v6284_v47 = vpop.eup %5044  ;;  %v982_v59 = vsub.f32 %v6046_v4, %v904_v62  ;;  %v983_v61 = vsub.f32 %v6048_v8, %v904_v62  ;;  %v1178_v43 = vadd.f32 %v6282_v11, %v6280_v57 }
 0x403   : > { %v6290_v44 = vpop.eup %5046  ;;  %v907_v2 = vpop.xlane.xlu1 %906 }
 0x404   : > { %v1078_v37 = vmul.f32 1.442695, %v982_v59  ;;  %v1080_v51 = vmul.f32 1.442695, %v983_v61  ;;  %1179 = vadd.xlane.f32.xlu0 %v1178_v43  ;;  %v984_v53 = vsub.f32 %v6050_v10, %v907_v2  ;;  %v985_v39 = vsub.f32 %v8642_v5, %v907_v2  ;;  %v8645_v10 = vld [vmem:[#allocation19_spill] sm:$0xff]  ;;  %v8649_v5 = vld [vmem:[#allocation22_spill] sm:$0xff] }
 0x405   : > { %v1181_v28 = vadd.f32 %v6290_v44, %v6284_v47 }
 0x406   : > { %5056 = vpow2.f32 %v1078_v37  ;;  %v1082_v4 = vmul.f32 1.442695, %v984_v53  ;;  %v1084_v7 = vmul.f32 1.442695, %v985_v39 }
 0x407   : > { %5058 = vpow2.f32 %v1080_v51  ;;  %1182 = vadd.xlane.f32.xlu1 %v1181_v28  ;;  %v8648_v51 = vld [vmem:[#allocation21_spill] sm:$0xff] }
 0x408   : > { %v6296_v8 = vpop.eup %5048  ;;  %5060 = vpow2.f32 %v1082_v4 }
 0x409   : > { %8643 = vst [vmem:[#allocation18_spill] sm:$0xff] %v6296_v8  ;;  %v6298_v42 = vpop.eup %5050  ;;  %5062 = vpow2.f32 %v1084_v7  ;;  %v910_v19 = vpop.xlane.xlu0 %909 }
 0x40a   : > { %v6300_v60 = vpop.eup %5052  ;;  %v986_v55 = vsub.f32 %v8645_v10, %v910_v19  ;;  %v987_v62 = vsub.f32 %v8646_v23, %v910_v19  ;;  %v1184_v59 = vadd.f32 %v6298_v42, %v6296_v8  ;;  %v8657_v8 = vld [vmem:[#allocation26_spill] sm:$0xff] }
 0x40b   : > { %8644 = vst [vmem:[#allocation31_spill] sm:$0xff] %v6300_v60  ;;  %v6306_v61 = vpop.eup %5054  ;;  %v913_v43 = vpop.xlane.xlu1 %912 }
 0x40c   : > { %8647 = vst [vmem:[#allocation19_spill] sm:$0xff] %v6306_v61  ;;  %v1086_v2 = vmul.f32 1.442695, %v986_v55  ;;  %v1088_v37 = vmul.f32 1.442695, %v987_v62  ;;  %1185 = vadd.xlane.f32.xlu0 %v1184_v59  ;;  %v988_v53 = vsub.f32 %v8648_v51, %v913_v43  ;;  %v989_v39 = vsub.f32 %v8649_v5, %v913_v43  ;;  %v8653_v62 = vld [vmem:[#allocation23_spill] sm:$0xff] }
 0x40d   : > { %v1187_v28 = vadd.f32 %v6306_v61, %v6300_v60  ;;  %v8654_v43 = vld [vmem:[#allocation24_spill] sm:$0xff] }
 0x40e   : > { %5064 = vpow2.f32 %v1086_v2  ;;  %v1090_v4 = vmul.f32 1.442695, %v988_v53  ;;  %v1092_v7 = vmul.f32 1.442695, %v989_v39 }
 0x40f   : > { %5066 = vpow2.f32 %v1088_v37  ;;  %1188 = vadd.xlane.f32.xlu1 %v1187_v28  ;;  %v8656_v28 = vld [vmem:[#allocation25_spill] sm:$0xff] }
 0x410   : > { %v6312_v19 = vpop.eup %5056  ;;  %5068 = vpow2.f32 %v1090_v4 }
 0x411   : > { %8650 = vst [vmem:[#allocation20_spill] sm:$0xff] %v6312_v19  ;;  %v6314_v10 = vpop.eup %5058  ;;  %5070 = vpow2.f32 %v1092_v7  ;;  %v916_v55 = vpop.xlane.xlu0 %915 }
 0x412   : > { %8651 = vst [vmem:[#allocation21_spill] sm:$0xff] %v6314_v10  ;;  %v6316_v23 = vpop.eup %5060  ;;  %v990_v59 = vsub.f32 %v8653_v62, %v916_v55  ;;  %v991_v51 = vsub.f32 %v8654_v43, %v916_v55  ;;  %v1190_v2 = vadd.f32 %v6314_v10, %v6312_v19 }
 0x413   : > { %8652 = vst [vmem:[#allocation22_spill] sm:$0xff] %v6316_v23  ;;  %v6322_v53 = vpop.eup %5062  ;;  %v919_v37 = vpop.xlane.xlu1 %918 }
 0x414   : > { %8655 = vst [vmem:[#allocation23_spill] sm:$0xff] %v6322_v53  ;;  %v1094_v5 = vmul.f32 1.442695, %v990_v59  ;;  %v1096_v39 = vmul.f32 1.442695, %v991_v51  ;;  %1191 = vadd.xlane.f32.xlu0 %v1190_v2  ;;  %v992_v4 = vsub.f32 %v8656_v28, %v919_v37  ;;  %v993_v7 = vsub.f32 %v8657_v8, %v919_v37  ;;  %v8658_v2 = vld [vmem:[#allocation27_spill] sm:$0xff] }
 0x415   : > { %v1193_v60 = vadd.f32 %v6322_v53, %v6316_v23  ;;  %v8659_v8 = vld [vmem:[#allocation28_spill] sm:$0xff]  ;;  %v8661_v23 = vld [vmem:[#allocation30_spill] sm:$0xff] }
 0x416   : > { %5072 = vpow2.f32 %v1094_v5  ;;  %v1098_v62 = vmul.f32 1.442695, %v992_v4  ;;  %v1100_v61 = vmul.f32 1.442695, %v993_v7 }
 0x417   : > { %5074 = vpow2.f32 %v1096_v39  ;;  %1194 = vadd.xlane.f32.xlu1 %v1193_v60 }
 0x418   : > { %v6328_v55 = vpop.eup %5064  ;;  %5076 = vpow2.f32 %v1098_v62  ;;  %v8660_v62 = vld [vmem:[#allocation29_spill] sm:$0xff] }
 0x419   : > { %v6330_v43 = vpop.eup %5066  ;;  %5078 = vpow2.f32 %v1100_v61  ;;  %v922_v59 = vpop.xlane.xlu0 %921 }
 0x41a   : > { %v6332_v51 = vpop.eup %5068  ;;  %v994_v28 = vsub.f32 %v8658_v2, %v922_v59  ;;  %v995_v37 = vsub.f32 %v8659_v8, %v922_v59  ;;  %v1196_v5 = vadd.f32 %v6330_v43, %v6328_v55 }
 0x41b   : > { %v6338_v4 = vpop.eup %5070  ;;  %v925_v39 = vpop.xlane.xlu1 %924 }
 0x41c   : > { %v1102_v60 = vmul.f32 1.442695, %v994_v28  ;;  %v1104_v7 = vmul.f32 1.442695, %v995_v37  ;;  %1197 = vadd.xlane.f32.xlu0 %v1196_v5  ;;  %v996_v19 = vsub.f32 %v8660_v62, %v925_v39  ;;  %v997_v61 = vsub.f32 %v8661_v23, %v925_v39 }
 0x41d   : > { %v1199_v53 = vadd.f32 %v6338_v4, %v6332_v51 }
 0x41e   : > { %5080 = vpow2.f32 %v1102_v60  ;;  %v1106_v2 = vmul.f32 1.442695, %v996_v19  ;;  %v1108_v10 = vmul.f32 1.442695, %v997_v61 }
 0x41f   : > { %5082 = vpow2.f32 %v1104_v7  ;;  %1200 = vadd.xlane.f32.xlu1 %v1199_v53 }
 0x420   : > { %v6344_v59 = vpop.eup %5072  ;;  %5084 = vpow2.f32 %v1106_v2 }
 0x421   : > { %8662 = vst [vmem:[#allocation24_spill] sm:$0xff] %v6344_v59  ;;  %v6346_v8 = vpop.eup %5074  ;;  %5086 = vpow2.f32 %v1108_v10 }
 0x422   : > { %v6348_v28 = vpop.eup %5076  ;;  %v1202_v37 = vadd.f32 %v6346_v8, %v6344_v59 }
 0x423   : > { %8663 = vst [vmem:[#allocation25_spill] sm:$0xff] %v6348_v28  ;;  %v6352_v23 = vpop.eup %5078 }
 0x424   : > { %8664 = vst [vmem:[#allocation26_spill] sm:$0xff] %v6352_v23  ;;  %1203 = vadd.xlane.f32.xlu0 %v1202_v37  ;;  %v1205_v19 = vadd.f32 %v6352_v23, %v6348_v28 }
 0x426   : > { %1206 = vadd.xlane.f32.xlu1 %v1205_v19 }
 0x428   : > { %v6356_v5 = vpop.eup %5080 }
 0x429   : > { %8665 = vst [vmem:[#allocation27_spill] sm:$0xff] %v6356_v5  ;;  %v6358_v53 = vpop.eup %5082 }
 0x42a   : > { %8666 = vst [vmem:[#allocation28_spill] sm:$0xff] %v6358_v53  ;;  %v6360_v39 = vpop.eup %5084  ;;  %v1208_v10 = vadd.f32 %v6358_v53, %v6356_v5 }
 0x42b   : > { %8667 = vst [vmem:[#allocation29_spill] sm:$0xff] %v6360_v39  ;;  %v6364_v60 = vpop.eup %5086 }
 0x42c   : > { %8668 = vst [vmem:[#allocation30_spill] sm:$0xff] %v6364_v60  ;;  %1209 = vadd.xlane.f32.xlu0 %v1208_v10  ;;  %v1211_v7 = vadd.f32 %v6364_v60, %v6360_v39 }
 0x42e   : > { %1212 = vadd.xlane.f32.xlu1 %v1211_v7 }
 0x461   : > { %v1144_v62 = vpop.xlane.xlu0 %1143 }
 0x462   : > { %5088 = vrcp.f32 %v1144_v62 }
 0x464   : > { %v1147_v61 = vpop.xlane.xlu1 %1146 }
 0x465   : > { %5090 = vrcp.f32 %v1147_v61  ;;  %v928_v2 = vpop.xlane.xlu0 %927 }
 0x466   : > { %v998_v37 = vsub.f32 %v6094_v14, %v928_v2  ;;  %v999_v19 = vsub.f32 %v6096_v22, %v928_v2 }
 0x468   : > { %v1110_v59 = vmul.f32 1.442695, %v998_v37  ;;  %v1112_v28 = vmul.f32 1.442695, %v999_v19  ;;  %v931_v23 = vpop.xlane.xlu1 %930 }
 0x469   : > { %v1000_v5 = vsub.f32 %v6098_v0, %v931_v23  ;;  %v1001_v10 = vsub.f32 %v6102_v18, %v931_v23  ;;  %v1150_v53 = vpop.xlane.xlu0 %1149 }
 0x46a   : > { %5092 = vpow2.f32 %v1110_v59 }
 0x46b   : > { %5094 = vpow2.f32 %v1112_v28  ;;  %v1114_v7 = vmul.f32 1.442695, %v1000_v5  ;;  %v1116_v39 = vmul.f32 1.442695, %v1001_v10 }
 0x46c   : > { %v5089_v62 = vpop.eup %5088  ;;  %5096 = vrcp.f32 %v1150_v53  ;;  %v1153_v61 = vpop.xlane.xlu1 %1152 }
 0x46d   : > { %5098 = vpow2.f32 %v1114_v7  ;;  %v934_v60 = vpop.xlane.xlu0 %933  ;;  %v1271_v0 = vmul.f32 %v5089_v62, %v6162_v26  ;;  %v1270_v18 = vmul.f32 %v5089_v62, %v6160_v36 }
 0x46e   : > { %5100 = vpow2.f32 %v1116_v39  ;;  %v1002_v22 = vsub.f32 %v6106_v50, %v934_v60  ;;  %v1003_v14 = vsub.f32 %v6108_v30, %v934_v60 }
 0x46f   : > { %v5091_v2 = vpop.eup %5090  ;;  %5102 = vrcp.f32 %v1153_v61 }
 0x470   : > { %v1118_v59 = vmul.f32 1.442695, %v1002_v22  ;;  %v1120_v28 = vmul.f32 1.442695, %v1003_v14  ;;  %v937_v23 = vpop.xlane.xlu1 %936  ;;  %v1273_v5 = vmul.f32 %v5091_v2, %v6170_v9  ;;  %v1272_v53 = vmul.f32 %v5091_v2, %v6164_v31 }
 0x471   : > { %v1004_v37 = vsub.f32 %v6110_v49, %v937_v23  ;;  %v1005_v39 = vsub.f32 %v6114_v48, %v937_v23  ;;  %v1156_v50 = vpop.xlane.xlu0 %1155 }
 0x472   : > { %5104 = vpow2.f32 %v1118_v59  ;;  %v1337_v30 = vpack.c.bf16 %v1273_v5, %v1271_v0  ;;  %v1336_v60 = vpack.c.bf16 %v1272_v53, %v1270_v18 }
 0x473   : > { %5106 = vpow2.f32 %v1120_v28  ;;  %v1122_v19 = vmul.f32 1.442695, %v1004_v37  ;;  %v1124_v26 = vmul.f32 1.442695, %v1005_v39 }
 0x474   : > { %v6380_v10 = vpop.eup %5092  ;;  %5108 = vrcp.f32 %v1156_v50  ;;  %1368 = vmatprep.subr.bf16.mxu1 %v1337_v30  ;;  %v1159_v36 = vpop.xlane.xlu1 %1158 }
 0x475   : > { %v6382_v7 = vpop.eup %5094  ;;  %5110 = vpow2.f32 %v1122_v19  ;;  %1369 = vmatpush1.bf16.xpose.msra.mxu1 %v1336_v60  ;;  %v940_v31 = vpop.xlane.xlu0 %939 }
 0x476   : > { %v5097_v49 = vpop.eup %5096  ;;  %5112 = vpow2.f32 %v1124_v26  ;;  %v1006_v48 = vsub.f32 %v6118_v20, %v940_v31  ;;  %v1007_v9 = vsub.f32 %v6120_v56, %v940_v31  ;;  %v1214_v62 = vadd.f32 %v6382_v7, %v6380_v10 }
 0x477   : > { %v6388_v61 = vpop.eup %5098  ;;  %5114 = vrcp.f32 %v1159_v36  ;;  %v1275_v23 = vmul.f32 %v5097_v49, %v6181_v63  ;;  %v1274_v53 = vmul.f32 %v5097_v49, %v6176_v12 }
 0x478   : > { %v6390_v22 = vpop.eup %5100  ;;  %v1126_v14 = vmul.f32 1.442695, %v1006_v48  ;;  %v1128_v2 = vmul.f32 1.442695, %v1007_v9  ;;  %1215 = vadd.xlane.f32.xlu0 %v1214_v62  ;;  %v943_v0 = vpop.xlane.xlu1 %942 }
 0x479   : > { %v5103_v18 = vpop.eup %5102  ;;  %v1008_v59 = vsub.f32 %v6122_v58, %v943_v0  ;;  %v1009_v28 = vsub.f32 %v6126_v46, %v943_v0  ;;  %v1162_v20 = vpop.xlane.xlu0 %1161  ;;  %v1217_v56 = vadd.f32 %v6390_v22, %v6388_v61 }
 0x47a   : > { %5116 = vpow2.f32 %v1126_v14  ;;  %v1277_v5 = vmul.f32 %v5103_v18, %v6189_v54  ;;  %v1276_v37 = vmul.f32 %v5103_v18, %v6183_v15 }
 0x47b   : > { %5118 = vpow2.f32 %v1128_v2  ;;  %v1130_v39 = vmul.f32 1.442695, %v1008_v59  ;;  %v1132_v50 = vmul.f32 1.442695, %v1009_v28  ;;  %1218 = vadd.xlane.f32.xlu1 %v1217_v56 }
 0x47c   : > { %v6400_v58 = vpop.eup %5104  ;;  %5120 = vrcp.f32 %v1162_v20  ;;  %v1339_v46 = vpack.c.bf16 %v1277_v5, %v1275_v23  ;;  %v1165_v30 = vpop.xlane.xlu1 %1164  ;;  %v1338_v60 = vpack.c.bf16 %v1276_v37, %v1274_v53 }
 0x47d   : > { %v6402_v19 = vpop.eup %5106  ;;  %5122 = vpow2.f32 %v1130_v39  ;;  %v946_v63 = vpop.xlane.xlu0 %945 }
 0x47e   : > { %v5109_v26 = vpop.eup %5108  ;;  %5124 = vpow2.f32 %v1132_v50  ;;  %1370 = vmatprep.subr.bf16.mxu1 %v1339_v46  ;;  %v1010_v12 = vsub.f32 %v6130_v34, %v946_v63  ;;  %v1011_v15 = vsub.f32 %v6132_v32, %v946_v63  ;;  %v1220_v54 = vadd.f32 %v6402_v19, %v6400_v58 }
 0x47f   : > { %v6408_v36 = vpop.eup %5110  ;;  %5126 = vrcp.f32 %v1165_v30  ;;  %1371 = vmatpush1.bf16.xpose.msra.mxu1 %v1338_v60  ;;  %v1279_v0 = vmul.f32 %v5109_v26, %v6203_v24  ;;  %v1278_v59 = vmul.f32 %v5109_v26, %v6198_v40 }
 0x480   : > { %v6410_v31 = vpop.eup %5112  ;;  %v1134_v49 = vmul.f32 1.442695, %v1010_v12  ;;  %v1136_v48 = vmul.f32 1.442695, %v1011_v15  ;;  %1221 = vadd.xlane.f32.xlu0 %v1220_v54  ;;  %v949_v9 = vpop.xlane.xlu1 %948 }
 0x481   : > { %v5115_v62 = vpop.eup %5114  ;;  %v1012_v14 = vsub.f32 %v6134_v52, %v949_v9  ;;  %v1013_v34 = vsub.f32 %v6138_v33, %v949_v9  ;;  %v1168_v2 = vpop.xlane.xlu0 %1167  ;;  %v1223_v32 = vadd.f32 %v6410_v31, %v6408_v36 }
 0x482   : > { %5128 = vpow2.f32 %v1134_v49  ;;  %v1281_v18 = vmul.f32 %v5115_v62, %v6211_v13  ;;  %v1280_v28 = vmul.f32 %v5115_v62, %v6205_v25 }
 0x483   : > { %5130 = vpow2.f32 %v1136_v48  ;;  %v1138_v20 = vmul.f32 1.442695, %v1012_v14  ;;  %v1140_v56 = vmul.f32 1.442695, %v1013_v34  ;;  %1224 = vadd.xlane.f32.xlu1 %v1223_v32 }
 0x484   : > { %v6420_v52 = vpop.eup %5116  ;;  %5132 = vrcp.f32 %v1168_v2  ;;  %v1341_v33 = vpack.c.bf16 %v1281_v18, %v1279_v0  ;;  %v1171_v23 = vpop.xlane.xlu1 %1170  ;;  %v1340_v5 = vpack.c.bf16 %v1280_v28, %v1278_v59 }
 0x485   : > { %v6422_v53 = vpop.eup %5118  ;;  %5134 = vpow2.f32 %v1138_v20 }
 0x486   : > { %v5121_v24 = vpop.eup %5120  ;;  %5136 = vpow2.f32 %v1140_v56  ;;  %1372 = vmatprep.subr.bf16.mxu1 %v1341_v33  ;;  %v1226_v40 = vadd.f32 %v6422_v53, %v6420_v52 }
 0x487   : > { %v6426_v25 = vpop.eup %5122  ;;  %5138 = vrcp.f32 %v1171_v23  ;;  %1373 = vmatpush1.bf16.xpose.msra.mxu1 %v1340_v5  ;;  %v1283_v46 = vmul.f32 %v5121_v24, %v6225_v17  ;;  %v1282_v60 = vmul.f32 %v5121_v24, %v6220_v16 }
 0x488   : > { %v6428_v13 = vpop.eup %5124  ;;  %1227 = vadd.xlane.f32.xlu0 %v1226_v40  ;;  %v5768_v40 = vld [vmem:[%s8476_s2 + $0x8] sm:$0xff] }
 0x489   : > { %v5127_v37 = vpop.eup %5126  ;;  %v1174_v39 = vpop.xlane.xlu0 %1173  ;;  %v1229_v50 = vadd.f32 %v6428_v13, %v6426_v25 }
 0x48a   : > { %v1285_v30 = vmul.f32 %v5127_v37, %v6233_v21  ;;  %v1284_v63 = vmul.f32 %v5127_v37, %v6227_v35  ;;  %5140 = vrcp.f32 %v1174_v39  ;;  %v6465_v39 = vpop.f32.mrb[12].mxu1 }
 0x48b   : > { %1230 = vadd.xlane.f32.xlu1 %v1229_v50  ;;  %8669 = vst [vmem:[#allocation32_spill] sm:$0xff] %v6465_v39 }
 0x48c   : > { %v6436_v26 = vpop.eup %5128  ;;  %v1343_v12 = vpack.c.bf16 %v1285_v30, %v1283_v46  ;;  %v1177_v15 = vpop.xlane.xlu1 %1176  ;;  %v1342_v54 = vpack.c.bf16 %v1284_v63, %v1282_v60  ;;  %v217_v63 = vld [vmem:[%s8476_s2 + $0x40] sm:$0xff] }
 0x48d   : > { %v6438_v49 = vpop.eup %5130  ;;  %5142 = vrcp.f32 %v1177_v15  ;;  %v6468_v30 = vpop.f32.mrb[13].mxu1 }
 0x48e   : > { %v5133_v48 = vpop.eup %5132  ;;  %1374 = vmatprep.subr.bf16.mxu1 %v1343_v12  ;;  %v1232_v17 = vadd.f32 %v6438_v49, %v6436_v26  ;;  %8670 = vst [vmem:[#allocation33_spill] sm:$0xff] %v6468_v30 }
 0x48f   : > { %v6442_v21 = vpop.eup %5134  ;;  %1375 = vmatpush1.bf16.xpose.msra.mxu1 %v1342_v54  ;;  %v1287_v62 = vmul.f32 %v5133_v48, %v6247_v27  ;;  %v1286_v2 = vmul.f32 %v5133_v48, %v6242_v45 }
 0x490   : > { %v6444_v16 = vpop.eup %5136  ;;  %1233 = vadd.xlane.f32.xlu1 %v1232_v17 }
 0x491   : > { %v5139_v35 = vpop.eup %5138  ;;  %v1180_v9 = vpop.xlane.xlu0 %1179  ;;  %v1235_v14 = vadd.f32 %v6444_v16, %v6442_v21 }
 0x492   : > { %v1289_v34 = vmul.f32 %v5139_v35, %v6255_v29  ;;  %v1288_v32 = vmul.f32 %v5139_v35, %v6249_v41  ;;  %5144 = vrcp.f32 %v1180_v9  ;;  %v8673_v35 = vld [vmem:[#allocation19_spill] sm:$0xff] }
 0x494   : > { %1236 = vadd.xlane.f32.xlu1 %v1235_v14  ;;  %v1345_v0 = vpack.c.bf16 %v1289_v34, %v1287_v62  ;;  %v1183_v18 = vpop.xlane.xlu1 %1182  ;;  %v1344_v59 = vpack.c.bf16 %v1288_v32, %v1286_v2  ;;  %v5141_v28 = vpop.eup %5140  ;;  %v8674_v62 = vld [vmem:[#allocation31_spill] sm:$0xff]  ;;  %v8675_v2 = vld [vmem:[#allocation18_spill] sm:$0xff] }
 0x495   : > { %5146 = vrcp.f32 %v1183_v18  ;;  %v1291_v27 = vmul.f32 %v5141_v28, %v6266_v3  ;;  %v1290_v45 = vmul.f32 %v5141_v28, %v6264_v1 }
 0x496   : > { %1376 = vmatprep.subr.bf16.mxu1 %v1345_v0  ;;  %v4981_v0 = vld [vmem:[%s8475_s1 + $0x38] sm:$0xff]  }
 0x497   : > { %v5143_v20 = vpop.eup %5142  ;;  %1377 = vmatpush1.bf16.xpose.msra.mxu1 %v1344_v59 }
 0x498   : > { %v1293_v56 = vmul.f32 %v5143_v20, %v6274_v6  ;;  %v1292_v29 = vmul.f32 %v5143_v20, %v6268_v38  ;;  %v214_v38 = vld [vmem:[%s8476_s2 + $0x28] sm:$0xff]  ;;  %4837 = vmatmul.mubr.msk.bf16.gmra.mrb[20].mxu1 %vm413_vm2, %v4981_v0 }
 0x499   : > { %v1186_v33 = vpop.xlane.xlu0 %1185 }
 0x49a   : > { %v1347_v41 = vpack.c.bf16 %v1293_v56, %v1291_v27  ;;  %5148 = vrcp.f32 %v1186_v33  ;;  %v1346_v23 = vpack.c.bf16 %v1292_v29, %v1290_v45  ;;  %v8676_v27 = vld [vmem:[#allocation21_spill] sm:$0xff]  ;;  %v8677_v29 = vld [vmem:[#allocation23_spill] sm:$0xff]  ;;  %v8678_v45 = vld [vmem:[#allocation22_spill] sm:$0xff] }
 0x49c   : > { %1378 = vmatprep.subr.bf16.mxu1 %v1347_v41  ;;  %v1189_v5 = vpop.xlane.xlu1 %1188  ;;  %v5145_v24 = vpop.eup %5144 }
 0x49d   : > { %5150 = vrcp.f32 %v1189_v5  ;;  %v1295_v1 = vmul.f32 %v5145_v24, %v6282_v11  ;;  %v1294_v46 = vmul.f32 %v5145_v24, %v6280_v57  ;;  %v8679_v5 = vld [vmem:[#allocation20_spill] sm:$0xff] }
 0x49e   : > { %332 = vperm.xlu0 %4951, %v5768_v40  }
 0x49f   : > { %v5147_v3 = vpop.eup %5146  ;;  %1379 = vmatpush1.bf16.xpose.msra.mxu1 %v1346_v23 }
 0x4a0   : > { %v1297_v6 = vmul.f32 %v5147_v3, %v6290_v44  ;;  %v1296_v37 = vmul.f32 %v5147_v3, %v6284_v47  ;;  %v6473_v44 = vpop.f32.mrb[14].mxu1 }
 0x4a1   : > { %v1192_v50 = vpop.xlane.xlu0 %1191  ;;  %8671 = vst [vmem:[#allocation34_spill] sm:$0xff] %v6473_v44  ;;  %v6475_v15 = vpop.f32.mrb[15].mxu1 }
 0x4a2   : > { %350 = vperm.xlu0 %4951, %v214_v38   ;;  %v1349_v60 = vpack.c.bf16 %v1297_v6, %v1295_v1  ;;  %5152 = vrcp.f32 %v1192_v50  ;;  %v1348_v12 = vpack.c.bf16 %v1296_v37, %v1294_v46  ;;  %8672 = vst [vmem:[#allocation35_spill] sm:$0xff] %v6475_v15  ;;  %v6477_v57 = vpop.f32.mrb[16].mxu1 }
 0x4a3   : > { %v6479_v48 = vpop.f32.mrb[17].mxu1 }
 0x4a4   : > { %1380 = vmatprep.subr.bf16.mxu1 %v1349_v60  ;;  %v1195_v11 = vpop.xlane.xlu1 %1194  ;;  %v5149_v47 = vpop.eup %5148 }
 0x4a5   : > { %5154 = vrcp.f32 %v1195_v11  ;;  %365 = vperm.xlu1 %4952, %v217_v63   ;;  %v1299_v17 = vmul.f32 %v5149_v47, %v6298_v42  ;;  %v1298_v32 = vmul.f32 %v5149_v47, %v8675_v2  ;;  %v6497_v11 = vpop.f32.mrb[18].mxu1 }
 0x4a6   : > { %8680 = vst [vmem:[#allocation19_spill] sm:$0xff] %v6497_v11 }
 0x4a7   : > { %v5151_v54 = vpop.eup %5150  ;;  %1381 = vmatpush1.bf16.xpose.msra.mxu1 %v1348_v12 }
 0x4a8   : > { %v1301_v9 = vmul.f32 %v5151_v54, %v8673_v35  ;;  %v1300_v14 = vmul.f32 %v5151_v54, %v8674_v62  ;;  %v8683_v62 = vld [vmem:[#allocation25_spill] sm:$0xff] }
 0x4a9   : > { %v1198_v34 = vpop.xlane.xlu0 %1197 }
 0x4aa   : > { %v1351_v18 = vpack.c.bf16 %v1301_v9, %v1299_v17  ;;  %5156 = vrcp.f32 %v1198_v34  ;;  %v1350_v59 = vpack.c.bf16 %v1300_v14, %v1298_v32  ;;  %v6499_v17 = vpop.f32.mrb[19].mxu1  ;;  %v8684_v34 = vld [vmem:[#allocation24_spill] sm:$0xff] }
 0x4ab   : > { %8681 = vst [vmem:[#allocation31_spill] sm:$0xff] %v6499_v17 }
 0x4ac   : > { %1382 = vmatprep.subr.bf16.mxu1 %v1351_v18  ;;  %v1201_v28 = vpop.xlane.xlu1 %1200  ;;  %v5153_v20 = vpop.eup %5152 }
 0x4ad   : > { %5158 = vrcp.f32 %v1201_v28  ;;  %v1303_v56 = vmul.f32 %v5153_v20, %v8676_v27  ;;  %v1302_v24 = vmul.f32 %v5153_v20, %v8679_v5  ;;  %v8686_v20 = vld [vmem:[#allocation30_spill] sm:$0xff]  ;;  %v8687_v27 = vld [vmem:[#allocation29_spill] sm:$0xff] }
 0x4af   : > { %v5155_v42 = vpop.eup %5154  ;;  %1383 = vmatpush1.bf16.xpose.msra.mxu1 %v1350_v59  ;;  %v8685_v59 = vld [vmem:[#allocation28_spill] sm:$0xff] }
 0x4b0   : > { %v1305_v33 = vmul.f32 %v5155_v42, %v8677_v29  ;;  %v1304_v41 = vmul.f32 %v5155_v42, %v8678_v45 }
 0x4b1   : > { %v1204_v23 = vpop.xlane.xlu0 %1203 }
 0x4b2   : > { %5160 = vrcp.f32 %v1204_v23  ;;  %v1353_v40 = vpack.c.bf16 %v1305_v33, %v1303_v56  ;;  %v1352_v38 = vpack.c.bf16 %v1304_v41, %v1302_v24 }
 0x4b3   : > { %v1207_v3 = vpop.xlane.xlu1 %1206 }
 0x4b4   : > { %1384 = vmatprep.subr.bf16.mxu1 %v1353_v40  ;;  %5162 = vrcp.f32 %v1207_v3  ;;  %v5157_v1 = vpop.eup %5156 }
 0x4b5   : > { %v1307_v37 = vmul.f32 %v5157_v1, %v6330_v43  ;;  %v1306_v63 = vmul.f32 %v5157_v1, %v6328_v55 }
 0x4b7   : > { %v5159_v6 = vpop.eup %5158  ;;  %1385 = vmatpush1.bf16.xpose.msra.mxu1 %v1352_v38 }
 0x4b8   : > { %v1309_v50 = vmul.f32 %v5159_v6, %v6338_v4  ;;  %v1308_v46 = vmul.f32 %v5159_v6, %v6332_v51  ;;  %v8682_v4 = vld [vmem:[#allocation26_spill] sm:$0xff] }
 0x4b9   : > { %v1210_v60 = vpop.xlane.xlu0 %1209 }
 0x4ba   : > { %5164 = vrcp.f32 %v1210_v60  ;;  %v1355_v12 = vpack.c.bf16 %v1309_v50, %v1307_v37  ;;  %v1354_v54 = vpack.c.bf16 %v1308_v46, %v1306_v63 }
 0x4bb   : > { %v1213_v47 = vpop.xlane.xlu1 %1212 }
 0x4bc   : > { %v5161_v35 = vpop.eup %5160  ;;  %1386 = vmatprep.subr.bf16.mxu1 %v1355_v12  ;;  %5166 = vrcp.f32 %v1213_v47 }
 0x4bd   : > { %v1311_v43 = vmul.f32 %v5161_v35, %v6346_v8  ;;  %v1310_v2 = vmul.f32 %v5161_v35, %v8684_v34  ;;  %v8688_v8 = vld [vmem:[#allocation27_spill] sm:$0xff] }
 0x4be   : > { %v5163_v9 = vpop.eup %5162 }
 0x4bf   : > { %1387 = vmatpush1.bf16.xpose.msra.mxu1 %v1354_v54  ;;  %v1313_v51 = vmul.f32 %v5163_v9, %v8682_v4  ;;  %v1312_v14 = vmul.f32 %v5163_v9, %v8683_v62  ;;  %v8689_v9 = vld [vmem:[#allocation10_spill] sm:$0xff]  ;;  %v8690_v4 = vld [vmem:[#allocation11_spill] sm:$0xff] }
 0x4c1   : > { %v1357_v55 = vpack.c.bf16 %v1313_v51, %v1311_v43  ;;  %v1356_v32 = vpack.c.bf16 %v1312_v14, %v1310_v2 }
 0x4c3   : > { %1388 = vmatprep.subr.bf16.mxu1 %v1357_v55 }
 0x4c4   : > { %v5165_v0 = vpop.eup %5164 }
 0x4c5   : > { %v1315_v28 = vmul.f32 %v5165_v0, %v8685_v59  ;;  %v1314_v33 = vmul.f32 %v5165_v0, %v8688_v8 }
 0x4c6   : > { %v5167_v18 = vpop.eup %5166 }
 0x4c7   : > { %1389 = vmatpush1.bf16.xpose.msra.mxu1 %v1356_v32  ;;  %v1317_v42 = vmul.f32 %v5167_v18, %v8686_v20  ;;  %v1316_v56 = vmul.f32 %v5167_v18, %v8687_v27 }
 0x4c9   : > { %v1359_v29 = vpack.c.bf16 %v1317_v42, %v1315_v28  ;;  %v1358_v45 = vpack.c.bf16 %v1316_v56, %v1314_v33  ;;  %v8691_v56 = vld [vmem:[#allocation17_spill] sm:$0xff]  ;;  %v8692_v33 = vld [vmem:[#allocation16_spill] sm:$0xff] }
 0x4cb   : > { %1390 = vmatprep.subr.bf16.mxu1 %v1359_v29 }
 0x4cf   : > { %1391 = vmatpush1.bf16.xpose.msra.mxu1 %v1358_v45 }
 0x505   : > { %v1216_v41 = vpop.xlane.xlu0 %1215 }
 0x506   : > { %5168 = vrcp.f32 %v1216_v41 }
 0x508   : > { %v1219_v23 = vpop.xlane.xlu1 %1218 }
 0x509   : > { %5170 = vrcp.f32 %v1219_v23 }
 0x50d   : > { %v1222_v5 = vpop.xlane.xlu0 %1221 }
 0x50e   : > { %5172 = vrcp.f32 %v1222_v5 }
 0x510   : > { %v1225_v24 = vpop.xlane.xlu1 %1224  ;;  %v5169_v40 = vpop.eup %5168 }
 0x511   : > { %5174 = vrcp.f32 %v1225_v24  ;;  %v1319_v38 = vmul.f32 %v5169_v40, %v6382_v7  ;;  %v1318_v6 = vmul.f32 %v5169_v40, %v6380_v10 }
 0x513   : > { %v5171_v3 = vpop.eup %5170 }
 0x514   : > { %v1321_v1 = vmul.f32 %v5171_v3, %v6390_v22  ;;  %v1320_v37 = vmul.f32 %v5171_v3, %v6388_v61 }
 0x515   : > { %v1228_v50 = vpop.xlane.xlu0 %1227 }
 0x516   : > { %v1361_v46 = vpack.c.bf16 %v1321_v1, %v1319_v38  ;;  %v1360_v60 = vpack.c.bf16 %v1320_v37, %v1318_v6  ;;  %5176 = vrcp.f32 %v1228_v50 }
 0x518   : > { %1392 = vmatprep.subr.bf16.mxu1 %v1361_v46  ;;  %v1231_v63 = vpop.xlane.xlu1 %1230  ;;  %v5173_v12 = vpop.eup %5172 }
 0x519   : > { %5178 = vrcp.f32 %v1231_v63  ;;  %1393 = vmatpush1.bf16.xpose.msra.mxu1 %v1360_v60  ;;  %v1323_v54 = vmul.f32 %v5173_v12, %v6402_v19  ;;  %v1322_v61 = vmul.f32 %v5173_v12, %v6400_v58 }
 0x51b   : > { %v5175_v47 = vpop.eup %5174 }
 0x51c   : > { %v1325_v7 = vmul.f32 %v5175_v47, %v6410_v31  ;;  %v1324_v22 = vmul.f32 %v5175_v47, %v6408_v36 }
 0x51d   : > { %v333_v35 = vpop.permute.xlu0 %332  ;;  %v1234_v10 = vpop.xlane.xlu1 %1233 }
 0x51e   : > { %v471_v43 = vadd.f32 %v8689_v9, %v333_v35  ;;  %v473_v51 = vadd.f32 %v8690_v4, %v333_v35  ;;  %v1363_v62 = vpack.c.bf16 %v1325_v7, %v1323_v54  ;;  %v1362_v14 = vpack.c.bf16 %v1324_v22, %v1322_v61 }
 0x51f   : > { %5180 = vrcp.f32 %v1234_v10 }
 0x520   : > { %1394 = vmatprep.subr.bf16.mxu1 %v1363_v62  ;;  %1409 = vxpose.xlu0.b32.start.end [1/1] (short) %v471_v43, 128  ;;  %v5177_v55 = vpop.eup %5176 }
 0x521   : > { %1441 = vxpose.xlu1.b32.start.end [1/1] (short) %v473_v51, 128  ;;  %1395 = vmatpush1.bf16.xpose.msra.mxu1 %v1362_v14  ;;  %v1237_v19 = vpop.xlane.xlu1 %1236  ;;  %v1327_v36 = vmul.f32 %v5177_v55, %v6422_v53  ;;  %v1326_v58 = vmul.f32 %v5177_v55, %v6420_v52  ;;  %v351_v20 = vpop.permute.xlu0 %350 }
 0x522   : > { %5182 = vrcp.f32 %v1237_v19  ;;  %v493_v53 = vadd.f32 %v8691_v56, %v351_v20  ;;  %v491_v45 = vadd.f32 %v8692_v33, %v351_v20 }
 0x523   : > { %v5179_v31 = vpop.eup %5178 }
 0x524   : > { %v1329_v34 = vmul.f32 %v5179_v31, %v6428_v13  ;;  %v1328_v2 = vmul.f32 %v5179_v31, %v6426_v25  ;;  %v1490_v41 = vpack.c.bf16 %v493_v53, %v493_v53  ;;  %v1489_v5 = vpack.c.bf16 %v491_v45, %v491_v45 }
 0x525   : > { %v366_v32 = vpop.permute.xlu1 %365 }
 0x526   : > { %v509_v0 = vadd.f32 %v6479_v48, %v366_v32  ;;  %v1365_v18 = vpack.c.bf16 %v1329_v34, %v1327_v36  ;;  %v1364_v59 = vpack.c.bf16 %v1328_v2, %v1326_v58  ;;  %v507_v23 = vadd.f32 %v6477_v57, %v366_v32 }
 0x528   : > { %v1335_v28 = vpack.c.bf16 %v509_v0, %v509_v0  ;;  %1396 = vmatprep.subr.bf16.mxu1 %v1365_v18  ;;  %v1334_v24 = vpack.c.bf16 %v507_v23, %v507_v23 }
 0x529   : > { %1397 = vmatpush1.bf16.xpose.msra.mxu1 %v1364_v59  ;;  %v5181_v42 = vpop.eup %5180 }
 0x52a   : > { %1400 = vmatprep.mubr.bf16.mxu1 %v1335_v28  ;;  %v1331_v13 = vmul.f32 %v5181_v42, %v6438_v49  ;;  %v1330_v25 = vmul.f32 %v5181_v42, %v6436_v26  ;;  %v1540_v49 = vsel %vm263_vm0, %v1489_v5, 0  ;;  %v8693_v26 = vmov 0  }
 0x52c   : > { %v5183_v27 = vpop.eup %5182 }
 0x52d   : > { %v1333_v52 = vmul.f32 %v5183_v27, %v6444_v16  ;;  %v1332_v29 = vmul.f32 %v5183_v27, %v6442_v21 }
 0x52f   : > { %v1367_v48 = vpack.c.bf16 %v1333_v52, %v1331_v13  ;;  %v1366_v8 = vpack.c.bf16 %v1332_v29, %v1330_v25 }
 0x531   : > { %1398 = vmatprep.subr.bf16.mxu1 %v1367_v48 }
 0x532   : > { %1399 = vmatpush1.bf16.xpose.msra.mxu1 %v1366_v8 }
 0x533   : > { %4855 = vmatprep.subr.msk.bf16.mxu1 %vm263_vm0, %v1490_v41 }
 0x539   : > { %1401 = vmatmul.mubr.bf16.vlgmr.msra.gmra.mrb[24].mxu1 %v1334_v24 }
 0x53a   : > { %1546 = vmatpush1.bf16.msra.mxu1 %v1540_v49  ;;  %1577 = vmatprep.mubr.bf16.mxu1 %v8693_v26 }
 0x56b   : > { %v6534_v21 = vpop.f32.mrb[20].mxu1 }
 0x56c   : > { %8694 = vst [vmem:[#allocation18_spill] sm:$0xff] %v6534_v21  ;;  %v6536_v16 = vpop.f32.mrb[21].mxu1 }
 0x56d   : > { %8695 = vst [vmem:[#allocation21_spill] sm:$0xff] %v6536_v16  ;;  %v6538_v40 = vpop.f32.mrb[22].mxu1 }
 0x56e   : > { %8696 = vst [vmem:[#allocation23_spill] sm:$0xff] %v6538_v40  ;;  %v6540_v3 = vpop.f32.mrb[23].mxu1 }
 0x56f   : > { %8697 = vst [vmem:[#allocation22_spill] sm:$0xff] %v6540_v3 }
 0x5a0   : > { %v1425_v38 = vpop.trf.xlu0 }
 0x5a1   : > { %v1457_v22 = vpop.trf.xlu1 }
 0x5a4   : > { %v1426_v57 = vpop.trf.xlu0 }
 0x5a5   : > { %v1473_v1 = vpack.c.bf16 %v1426_v57, %v1425_v38  ;;  %v1458_v61 = vpop.trf.xlu1 }
 0x5a6   : > { %v1481_v0 = vpack.c.bf16 %v1458_v61, %v1457_v22 }
 0x5a7   : > { %4856 = vmatmul.mubr.msk.bf16.vlgmr.msra.gmra.mrb[28].mxu1 %vm256_vm1, %v1473_v1 }
 0x5a8   : > { %v1427_v6 = vpop.trf.xlu0  ;;  %1587 = vmatprep.mubr.bf16.mxu1 %v8693_v26 }
 0x5a9   : > { %v1459_v4 = vpop.trf.xlu1 }
 0x5ac   : > { %v1428_v37 = vpop.trf.xlu0 }
 0x5ad   : > { %v1474_v50 = vpack.c.bf16 %v1428_v37, %v1427_v6  ;;  %v1460_v14 = vpop.trf.xlu1 }
 0x5ae   : > { %v1482_v59 = vpack.c.bf16 %v1460_v14, %v1459_v4 }
 0x5af   : > { %4857 = vmatmul.mubr.msk.bf16.gmra.mrb[32].mxu1 %vm256_vm1, %v1474_v50 }
 0x5b0   : > { %v1429_v46 = vpop.trf.xlu0  ;;  %1597 = vmatprep.mubr.bf16.mxu1 %v8693_v26 }
 0x5b1   : > { %v1461_v36 = vpop.trf.xlu1 }
 0x5b4   : > { %v1430_v60 = vpop.trf.xlu0 }
 0x5b5   : > { %v1475_v63 = vpack.c.bf16 %v1430_v60, %v1429_v46  ;;  %v1462_v2 = vpop.trf.xlu1 }
 0x5b6   : > { %v1483_v20 = vpack.c.bf16 %v1462_v2, %v1461_v36 }
 0x5b7   : > { %4858 = vmatmul.mubr.msk.bf16.gmra.mrb[36].mxu1 %vm256_vm1, %v1475_v63 }
 0x5b8   : > { %v1431_v12 = vpop.trf.xlu0  ;;  %1607 = vmatprep.mubr.bf16.mxu1 %v8693_v26 }
 0x5b9   : > { %v1463_v32 = vpop.trf.xlu1 }
 0x5bc   : > { %v1432_v47 = vpop.trf.xlu0 }
 0x5bd   : > { %v1476_v54 = vpack.c.bf16 %v1432_v47, %v1431_v12  ;;  %v1464_v18 = vpop.trf.xlu1 }
 0x5be   : > { %v1484_v56 = vpack.c.bf16 %v1464_v18, %v1463_v32 }
 0x5bf   : > { %4859 = vmatmul.mubr.msk.bf16.gmra.mrb[40].mxu1 %vm256_vm1, %v1476_v54 }
 0x5c0   : > { %v1433_v7 = vpop.trf.xlu0  ;;  %1617 = vmatprep.mubr.bf16.mxu1 %v8693_v26 }
 0x5c1   : > { %v1465_v28 = vpop.trf.xlu1 }
 0x5c4   : > { %v1434_v35 = vpop.trf.xlu0 }
 0x5c5   : > { %v1477_v10 = vpack.c.bf16 %v1434_v35, %v1433_v7  ;;  %v1466_v42 = vpop.trf.xlu1 }
 0x5c6   : > { %v1485_v13 = vpack.c.bf16 %v1466_v42, %v1465_v28 }
 0x5c7   : > { %4860 = vmatmul.mubr.msk.bf16.gmra.mrb[44].mxu1 %vm256_vm1, %v1477_v10 }
 0x5c8   : > { %v1435_v9 = vpop.trf.xlu0  ;;  %1627 = vmatprep.mubr.bf16.mxu1 %v8693_v26 }
 0x5c9   : > { %v1467_v27 = vpop.trf.xlu1 }
 0x5cc   : > { %v1436_v43 = vpop.trf.xlu0 }
 0x5cd   : > { %v1478_v51 = vpack.c.bf16 %v1436_v43, %v1435_v9  ;;  %v1468_v53 = vpop.trf.xlu1 }
 0x5ce   : > { %v1486_v25 = vpack.c.bf16 %v1468_v53, %v1467_v27 }
 0x5cf   : > { %4861 = vmatmul.mubr.msk.bf16.gmra.mrb[48].mxu1 %vm256_vm1, %v1478_v51 }
 0x5d0   : > { %v1437_v62 = vpop.trf.xlu0  ;;  %1637 = vmatprep.mubr.bf16.mxu1 %v8693_v26 }
 0x5d1   : > { %v1469_v52 = vpop.trf.xlu1 }
 0x5d4   : > { %v1438_v55 = vpop.trf.xlu0 }
 0x5d5   : > { %v1479_v19 = vpack.c.bf16 %v1438_v55, %v1437_v62  ;;  %v1470_v48 = vpop.trf.xlu1 }
 0x5d6   : > { %v1487_v23 = vpack.c.bf16 %v1470_v48, %v1469_v52 }
 0x5d7   : > { %4862 = vmatmul.mubr.msk.bf16.gmra.mrb[52].mxu1 %vm256_vm1, %v1479_v19 }
 0x5d8   : > { %v1439_v31 = vpop.trf.xlu0  ;;  %1647 = vmatprep.mubr.bf16.mxu1 %v8693_v26 }
 0x5d9   : > { %v1471_v41 = vpop.trf.xlu1 }
 0x5dc   : > { %v1440_v34 = vpop.trf.xlu0 }
 0x5dd   : > { %v1480_v58 = vpack.c.bf16 %v1440_v34, %v1439_v31  ;;  %v1472_v5 = vpop.trf.xlu1 }
 0x5de   : > { %v1488_v24 = vpack.c.bf16 %v1472_v5, %v1471_v41 }
 0x5df   : > { %4863 = vmatmul.mubr.msk.bf16.gmra.mrb[56].mxu1 %vm256_vm1, %v1480_v58 }
 0x5e0   : > { %1657 = vmatprep.mubr.bf16.mxu1 %v8693_v26 }
 0x5e7   : > { %4864 = vmatmul.mubr.msk.bf16.gmra.mrb[60].mxu1 %vm256_vm1, %v1481_v0 }
 0x5e8   : > { %1667 = vmatprep.mubr.bf16.mxu1 %v8693_v26 }
 0x5ef   : > { %4865 = vmatmul.mubr.msk.bf16.gmra.mrb[64].mxu1 %vm256_vm1, %v1482_v59 }
 0x5f0   : > { %1677 = vmatprep.mubr.bf16.mxu1 %v8693_v26 }
 0x5f7   : > { %4866 = vmatmul.mubr.msk.bf16.gmra.mrb[68].mxu1 %vm256_vm1, %v1483_v20 }
 0x5f8   : > { %1687 = vmatprep.mubr.bf16.mxu1 %v8693_v26 }
 0x5ff   : > { %4867 = vmatmul.mubr.msk.bf16.gmra.mrb[72].mxu1 %vm256_vm1, %v1484_v56 }
 0x600   : > { %1697 = vmatprep.mubr.bf16.mxu1 %v8693_v26 }
 0x607   : > { %4868 = vmatmul.mubr.msk.bf16.gmra.mrb[76].mxu1 %vm256_vm1, %v1485_v13 }
 0x608   : > { %1707 = vmatprep.mubr.bf16.mxu1 %v8693_v26 }
 0x60c   : > { %v6568_v29 = vpop.f32.mrb[24].mxu1 }
 0x60d   : > { %8698 = vst [vmem:[#allocation20_spill] sm:$0xff] %v6568_v29  ;;  %v6570_v8 = vpop.f32.mrb[25].mxu1 }
 0x60e   : > { %8699 = vst [vmem:[#allocation26_spill] sm:$0xff] %v6570_v8  ;;  %v1406_v33 = vpop.f32.mrb[26].mxu1 }
 0x60f   : > { %v1407_v45 = vpop.f32.mrb[27].mxu1  ;;  %4869 = vmatmul.mubr.msk.bf16.gmra.mrb[80].mxu1 %vm256_vm1, %v1486_v25 }
 0x610   : > { %1717 = vmatprep.mubr.bf16.mxu1 %v8693_v26 }
 0x617   : > { %4870 = vmatmul.mubr.msk.bf16.gmra.mrb[84].mxu1 %vm256_vm1, %v1487_v23 }
 0x618   : > { %1727 = vmatprep.mubr.bf16.mxu1 %v8693_v26 }
 0x61f   : > { %4871 = vmatmul.mubr.msk.bf16.gmra.mrb[88].mxu1 %vm256_vm1, %v1488_v24 }
 0x67a   : > { %v6577_v49 = vpop.f32.mrb[28].mxu1 }
 0x67b   : > { %v6579_v38 = vpop.f32.mrb[29].mxu1 }
 0x67c   : > { %v1738_v57 = vmax.f32 %v6577_v49, %v6579_v38  ;;  %v6583_v1 = vpop.f32.mrb[30].mxu1 }
 0x67d   : > { %v6585_v6 = vpop.f32.mrb[31].mxu1 }
 0x67e   : > { %v1741_v37 = vmax.f32 %v6583_v1, %v6585_v6  ;;  %1739 = vmax.xlane.f32.xlu0 %v1738_v57 }
 0x680   : > { %1742 = vmax.xlane.f32.xlu1 %v1741_v37 }
 0x682   : > { %v6589_v50 = vpop.f32.mrb[32].mxu1 }
 0x683   : > { %v6591_v46 = vpop.f32.mrb[33].mxu1 }
 0x684   : > { %v1744_v60 = vmax.f32 %v6589_v50, %v6591_v46  ;;  %v6595_v63 = vpop.f32.mrb[34].mxu1 }
 0x685   : > { %v6597_v12 = vpop.f32.mrb[35].mxu1 }
 0x686   : > { %v1747_v47 = vmax.f32 %v6595_v63, %v6597_v12  ;;  %1745 = vmax.xlane.f32.xlu0 %v1744_v60 }
 0x68a   : > { %1748 = vmax.xlane.f32.xlu0 %v1747_v47  ;;  %v6601_v54 = vpop.f32.mrb[36].mxu1 }
 0x68b   : > { %v6603_v7 = vpop.f32.mrb[37].mxu1 }
 0x68c   : > { %v1750_v22 = vmax.f32 %v6601_v54, %v6603_v7  ;;  %v6607_v35 = vpop.f32.mrb[38].mxu1 }
 0x68d   : > { %v6609_v10 = vpop.f32.mrb[39].mxu1 }
 0x68e   : > { %v1753_v61 = vmax.f32 %v6607_v35, %v6609_v10  ;;  %1751 = vmax.xlane.f32.xlu1 %v1750_v22 }
 0x690   : > { %1754 = vmax.xlane.f32.xlu0 %v1753_v61 }
 0x692   : > { %v6613_v9 = vpop.f32.mrb[40].mxu1 }
 0x693   : > { %v6615_v43 = vpop.f32.mrb[41].mxu1 }
 0x694   : > { %v1756_v4 = vmax.f32 %v6613_v9, %v6615_v43  ;;  %v6619_v51 = vpop.f32.mrb[42].mxu1 }
 0x695   : > { %v6621_v62 = vpop.f32.mrb[43].mxu1 }
 0x696   : > { %v1759_v14 = vmax.f32 %v6619_v51, %v6621_v62  ;;  %1757 = vmax.xlane.f32.xlu1 %v1756_v4 }
 0x698   : > { %1760 = vmax.xlane.f32.xlu0 %v1759_v14 }
 0x69a   : > { %v6625_v55 = vpop.f32.mrb[44].mxu1 }
 0x69b   : > { %v6627_v19 = vpop.f32.mrb[45].mxu1 }
 0x69c   : > { %v1762_v31 = vmax.f32 %v6625_v55, %v6627_v19  ;;  %v6631_v36 = vpop.f32.mrb[46].mxu1 }
 0x69d   : > { %v6633_v34 = vpop.f32.mrb[47].mxu1 }
 0x69e   : > { %v1765_v58 = vmax.f32 %v6631_v36, %v6633_v34  ;;  %1763 = vmax.xlane.f32.xlu1 %v1762_v31 }
 0x6a0   : > { %1766 = vmax.xlane.f32.xlu0 %v1765_v58 }
 0x6a2   : > { %v6637_v2 = vpop.f32.mrb[48].mxu1 }
 0x6a3   : > { %v6639_v32 = vpop.f32.mrb[49].mxu1 }
 0x6a4   : > { %v1768_v0 = vmax.f32 %v6637_v2, %v6639_v32  ;;  %v6643_v18 = vpop.f32.mrb[50].mxu1 }
 0x6a5   : > { %v6645_v59 = vpop.f32.mrb[51].mxu1 }
 0x6a6   : > { %v1771_v28 = vmax.f32 %v6643_v18, %v6645_v59  ;;  %1769 = vmax.xlane.f32.xlu1 %v1768_v0 }
 0x6a8   : > { %1772 = vmax.xlane.f32.xlu0 %v1771_v28 }
 0x6aa   : > { %v6649_v20 = vpop.f32.mrb[52].mxu1 }
 0x6ab   : > { %v6651_v42 = vpop.f32.mrb[53].mxu1 }
 0x6ac   : > { %v1774_v27 = vmax.f32 %v6649_v20, %v6651_v42  ;;  %v6655_v56 = vpop.f32.mrb[54].mxu1 }
 0x6ad   : > { %v6657_v53 = vpop.f32.mrb[55].mxu1 }
 0x6ae   : > { %v1777_v13 = vmax.f32 %v6655_v56, %v6657_v53  ;;  %1775 = vmax.xlane.f32.xlu1 %v1774_v27 }
 0x6b0   : > { %1778 = vmax.xlane.f32.xlu0 %v1777_v13 }
 0x6b2   : > { %v6661_v52 = vpop.f32.mrb[56].mxu1 }
 0x6b3   : > { %v6663_v25 = vpop.f32.mrb[57].mxu1 }
 0x6b4   : > { %v1780_v48 = vmax.f32 %v6661_v52, %v6663_v25  ;;  %v6667_v33 = vpop.f32.mrb[58].mxu1 }
 0x6b5   : > { %v6669_v45 = vpop.f32.mrb[59].mxu1 }
 0x6b6   : > { %v1783_v41 = vmax.f32 %v6667_v33, %v6669_v45  ;;  %1781 = vmax.xlane.f32.xlu1 %v1780_v48 }
 0x6b8   : > { %1784 = vmax.xlane.f32.xlu0 %v1783_v41 }
 0x6ba   : > { %v6673_v23 = vpop.f32.mrb[60].mxu1 }
 0x6bb   : > { %v6675_v5 = vpop.f32.mrb[61].mxu1 }
 0x6bc   : > { %v1786_v24 = vmax.f32 %v6673_v23, %v6675_v5  ;;  %v6679_v57 = vpop.f32.mrb[62].mxu1 }
 0x6bd   : > { %v6681_v37 = vpop.f32.mrb[63].mxu1 }
 0x6be   : > { %v1789_v60 = vmax.f32 %v6679_v57, %v6681_v37  ;;  %1787 = vmax.xlane.f32.xlu1 %v1786_v24 }
 0x6c0   : > { %1790 = vmax.xlane.f32.xlu0 %v1789_v60 }
 0x6c2   : > { %v6685_v47 = vpop.f32.mrb[64].mxu1 }
 0x6c3   : > { %v6687_v22 = vpop.f32.mrb[65].mxu1 }
 0x6c4   : > { %8700 = vst [vmem:[#allocation25_spill] sm:$0xff] %v6687_v22  ;;  %v1792_v61 = vmax.f32 %v6685_v47, %v6687_v22  ;;  %v6691_v4 = vpop.f32.mrb[66].mxu1 }
 0x6c5   : > { %8701 = vst [vmem:[#allocation24_spill] sm:$0xff] %v6691_v4  ;;  %v6693_v14 = vpop.f32.mrb[67].mxu1 }
 0x6c6   : > { %8702 = vst [vmem:[#allocation28_spill] sm:$0xff] %v6693_v14  ;;  %v1795_v31 = vmax.f32 %v6691_v4, %v6693_v14  ;;  %1793 = vmax.xlane.f32.xlu1 %v1792_v61 }
 0x6c8   : > { %1796 = vmax.xlane.f32.xlu0 %v1795_v31 }
 0x6ca   : > { %v6697_v58 = vpop.f32.mrb[68].mxu1 }
 0x6cb   : > { %8703 = vst [vmem:[#allocation30_spill] sm:$0xff] %v6697_v58  ;;  %v6699_v0 = vpop.f32.mrb[69].mxu1 }
 0x6cc   : > { %8704 = vst [vmem:[#allocation29_spill] sm:$0xff] %v6699_v0  ;;  %v1798_v28 = vmax.f32 %v6697_v58, %v6699_v0  ;;  %v6703_v27 = vpop.f32.mrb[70].mxu1 }
 0x6cd   : > { %8705 = vst [vmem:[#allocation27_spill] sm:$0xff] %v6703_v27  ;;  %v6705_v13 = vpop.f32.mrb[71].mxu1 }
 0x6ce   : > { %8706 = vst [vmem:[#allocation10_spill] sm:$0xff] %v6705_v13  ;;  %v1801_v48 = vmax.f32 %v6703_v27, %v6705_v13  ;;  %1799 = vmax.xlane.f32.xlu1 %v1798_v28 }
 0x6d0   : > { %1802 = vmax.xlane.f32.xlu0 %v1801_v48 }
 0x6d2   : > { %v6709_v41 = vpop.f32.mrb[72].mxu1 }
 0x6d3   : > { %8707 = vst [vmem:[#allocation11_spill] sm:$0xff] %v6709_v41  ;;  %v6711_v24 = vpop.f32.mrb[73].mxu1 }
 0x6d4   : > { %8708 = vst [vmem:[#allocation17_spill] sm:$0xff] %v6711_v24  ;;  %v1804_v60 = vmax.f32 %v6709_v41, %v6711_v24  ;;  %v6715_v61 = vpop.f32.mrb[74].mxu1 }
 0x6d5   : > { %8709 = vst [vmem:[#allocation16_spill] sm:$0xff] %v6715_v61  ;;  %v6717_v31 = vpop.f32.mrb[75].mxu1 }
 0x6d6   : > { %8710 = vst [vmem:[#allocation36_spill] sm:$0xff] %v6717_v31  ;;  %v1807_v40 = vmax.f32 %v6715_v61, %v6717_v31  ;;  %1805 = vmax.xlane.f32.xlu1 %v1804_v60 }
 0x6d8   : > { %1808 = vmax.xlane.f32.xlu0 %v1807_v40 }
 0x6da   : > { %v6721_v3 = vpop.f32.mrb[76].mxu1 }
 0x6db   : > { %8711 = vst [vmem:[#allocation37_spill] sm:$0xff] %v6721_v3  ;;  %v6723_v28 = vpop.f32.mrb[77].mxu1 }
 0x6dc   : > { %8712 = vst [vmem:[#allocation38_spill] sm:$0xff] %v6723_v28  ;;  %v1810_v48 = vmax.f32 %v6721_v3, %v6723_v28  ;;  %v6727_v21 = vpop.f32.mrb[78].mxu1 }
 0x6dd   : > { %v6729_v44 = vpop.f32.mrb[79].mxu1 }
 0x6de   : > { %1811 = vmax.xlane.f32.xlu1 %v1810_v48 }
 0x6e2   : > { %v6733_v16 = vpop.f32.mrb[80].mxu1 }
 0x6e3   : > { %v6735_v8 = vpop.f32.mrb[81].mxu1 }
 0x6e4   : > { %v6739_v60 = vpop.f32.mrb[82].mxu1 }
 0x6e5   : > { %v6741_v29 = vpop.f32.mrb[83].mxu1 }
 0x6ea   : > { %v6745_v11 = vpop.f32.mrb[84].mxu1 }
 0x6eb   : > { %v6747_v39 = vpop.f32.mrb[85].mxu1 }
 0x6ec   : > { %v6751_v15 = vpop.f32.mrb[86].mxu1 }
 0x6ed   : > { %v6753_v30 = vpop.f32.mrb[87].mxu1 }
 0x6f2   : > { %v6757_v17 = vpop.f32.mrb[88].mxu1 }
 0x6f3   : > { %v6759_v28 = vpop.f32.mrb[89].mxu1 }
 0x6f4   : > { %v6763_v3 = vpop.f32.mrb[90].mxu1 }
 0x6f5   : > { %v6765_v31 = vpop.f32.mrb[91].mxu1 }
 0x70b   : > { %v1740_v61 = vpop.xlane.xlu0 %1739 }
 0x70c   : > { %v1834_v24 = vsub.f32 %v6577_v49, %v1740_v61  ;;  %v1835_v41 = vsub.f32 %v6579_v38, %v1740_v61 }
 0x70d   : > { %v1743_v40 = vpop.xlane.xlu1 %1742 }
 0x70e   : > { %v1898_v13 = vmul.f32 1.442695, %v1834_v24  ;;  %v1900_v27 = vmul.f32 1.442695, %v1835_v41  ;;  %v1836_v0 = vsub.f32 %v6583_v1, %v1743_v40  ;;  %v1837_v58 = vsub.f32 %v6585_v6, %v1743_v40 }
 0x710   : > { %5184 = vpow2.f32 %v1898_v13  ;;  %v1902_v26 = vmul.f32 1.442695, %v1836_v0  ;;  %v1904_v14 = vmul.f32 1.442695, %v1837_v58 }
 0x711   : > { %5186 = vpow2.f32 %v1900_v27 }
 0x712   : > { %5188 = vpow2.f32 %v1902_v26 }
 0x713   : > { %5190 = vpow2.f32 %v1904_v14  ;;  %v1746_v4 = vpop.xlane.xlu0 %1745 }
 0x714   : > { %v1838_v48 = vsub.f32 %v6589_v50, %v1746_v4  ;;  %v1839_v49 = vsub.f32 %v6591_v46, %v1746_v4 }
 0x716   : > { %v1906_v22 = vmul.f32 1.442695, %v1838_v48  ;;  %v1908_v38 = vmul.f32 1.442695, %v1839_v49 }
 0x717   : > { %v1749_v61 = vpop.xlane.xlu0 %1748 }
 0x718   : > { %5192 = vpow2.f32 %v1906_v22  ;;  %v1840_v41 = vsub.f32 %v6595_v63, %v1749_v61  ;;  %v1841_v1 = vsub.f32 %v6597_v12, %v1749_v61 }
 0x719   : > { %5194 = vpow2.f32 %v1908_v38  ;;  %v8713_v38 = vmax.f32 %v6733_v16, %v6735_v8 }
 0x71a   : > { %v6777_v6 = vpop.eup %5184  ;;  %v1910_v58 = vmul.f32 1.442695, %v1840_v41  ;;  %v1912_v0 = vmul.f32 1.442695, %v1841_v1 }
 0x71b   : > { %v6779_v26 = vpop.eup %5186  ;;  %v1752_v14 = vpop.xlane.xlu1 %1751 }
 0x71c   : > { %v6781_v27 = vpop.eup %5188  ;;  %5196 = vpow2.f32 %v1910_v58  ;;  %v1842_v50 = vsub.f32 %v6601_v54, %v1752_v14  ;;  %v1843_v46 = vsub.f32 %v6603_v7, %v1752_v14  ;;  %v2026_v63 = vadd.f32 %v6779_v26, %v6777_v6 }
 0x71d   : > { %v6787_v22 = vpop.eup %5190  ;;  %5198 = vpow2.f32 %v1912_v0  ;;  %v1755_v12 = vpop.xlane.xlu0 %1754  ;;  %v8714_v58 = vmax.f32 %v6727_v21, %v6729_v44 }
 0x71e   : > { %v1914_v4 = vmul.f32 1.442695, %v1842_v50  ;;  %v1916_v13 = vmul.f32 1.442695, %v1843_v46  ;;  %v1844_v24 = vsub.f32 %v6607_v35, %v1755_v12  ;;  %v1845_v40 = vsub.f32 %v6609_v10, %v1755_v12  ;;  %2027 = vadd.xlane.f32.xlu1 %v2026_v63 }
 0x71f   : > { %v2029_v48 = vadd.f32 %v6787_v22, %v6781_v27 }
 0x720   : > { %5200 = vpow2.f32 %v1914_v4  ;;  %v1918_v54 = vmul.f32 1.442695, %v1844_v24  ;;  %v1920_v7 = vmul.f32 1.442695, %v1845_v40  ;;  %v8715_v40 = vmax.f32 %v6745_v11, %v6747_v39 }
 0x721   : > { %5202 = vpow2.f32 %v1916_v13  ;;  %2030 = vadd.xlane.f32.xlu0 %v2029_v48 }
 0x722   : > { %v6793_v49 = vpop.eup %5192  ;;  %5204 = vpow2.f32 %v1918_v54  ;;  %1817 = vmax.xlane.f32.xlu1 %v8713_v38 }
 0x723   : > { %v6798_v61 = vpop.eup %5194  ;;  %5206 = vpow2.f32 %v1920_v7  ;;  %v1758_v35 = vpop.xlane.xlu1 %1757 }
 0x724   : > { %v1846_v10 = vsub.f32 %v6613_v9, %v1758_v35  ;;  %v1847_v41 = vsub.f32 %v6615_v43, %v1758_v35  ;;  %v2032_v1 = vadd.f32 %v6798_v61, %v6793_v49 }
 0x725   : > { %1814 = vmax.xlane.f32.xlu0 %v8714_v58  ;;  %v1761_v0 = vpop.xlane.xlu0 %1760 }
 0x726   : > { %v6807_v14 = vpop.eup %5196  ;;  %v1922_v50 = vmul.f32 1.442695, %v1846_v10  ;;  %v1924_v46 = vmul.f32 1.442695, %v1847_v41  ;;  %v1848_v63 = vsub.f32 %v6619_v51, %v1761_v0  ;;  %v1849_v12 = vsub.f32 %v6621_v62, %v1761_v0  ;;  %2033 = vadd.xlane.f32.xlu1 %v2032_v1 }
 0x727   : > { %v6811_v9 = vpop.eup %5198 }
 0x728   : > { %5208 = vpow2.f32 %v1922_v50  ;;  %v1926_v43 = vmul.f32 1.442695, %v1848_v63  ;;  %v1928_v4 = vmul.f32 1.442695, %v1849_v12  ;;  %v2035_v13 = vadd.f32 %v6811_v9, %v6807_v14 }
 0x729   : > { %5210 = vpow2.f32 %v1924_v46  ;;  %v8716_v50 = vmax.f32 %v6739_v60, %v6741_v29 }
 0x72a   : > { %v6815_v24 = vpop.eup %5200  ;;  %5212 = vpow2.f32 %v1926_v43  ;;  %1823 = vmax.xlane.f32.xlu1 %v8715_v40  ;;  %2036 = vadd.xlane.f32.xlu0 %v2035_v13 }
 0x72b   : > { %v6820_v51 = vpop.eup %5202  ;;  %5214 = vpow2.f32 %v1928_v4  ;;  %v1764_v62 = vpop.xlane.xlu1 %1763 }
 0x72c   : > { %v6822_v48 = vpop.eup %5204  ;;  %v1850_v54 = vsub.f32 %v6625_v55, %v1764_v62  ;;  %v1851_v7 = vsub.f32 %v6627_v19, %v1764_v62  ;;  %v2038_v38 = vadd.f32 %v6820_v51, %v6815_v24 }
 0x72d   : > { %v6828_v35 = vpop.eup %5206  ;;  %v1767_v10 = vpop.xlane.xlu0 %1766 }
 0x72e   : > { %v1930_v41 = vmul.f32 1.442695, %v1850_v54  ;;  %v1932_v1 = vmul.f32 1.442695, %v1851_v7  ;;  %v1852_v58 = vsub.f32 %v6631_v36, %v1767_v10  ;;  %v1853_v0 = vsub.f32 %v6633_v34, %v1767_v10  ;;  %1820 = vmax.xlane.f32.xlu0 %v8716_v50  ;;  %2039 = vadd.xlane.f32.xlu1 %v2038_v38 }
 0x72f   : > { %v2041_v46 = vadd.f32 %v6828_v35, %v6822_v48  ;;  %v8717_v36 = vmax.f32 %v6757_v17, %v6759_v28 }
 0x730   : > { %5216 = vpow2.f32 %v1930_v41  ;;  %v1934_v55 = vmul.f32 1.442695, %v1852_v58  ;;  %v1936_v19 = vmul.f32 1.442695, %v1853_v0 }
 0x731   : > { %5218 = vpow2.f32 %v1932_v1  ;;  %v8718_v1 = vmax.f32 %v6751_v15, %v6753_v30 }
 0x732   : > { %v6837_v63 = vpop.eup %5208  ;;  %5220 = vpow2.f32 %v1934_v55  ;;  %2042 = vadd.xlane.f32.xlu0 %v2041_v46  ;;  %1829 = vmax.xlane.f32.xlu1 %v8717_v36 }
 0x733   : > { %v6842_v34 = vpop.eup %5210  ;;  %5222 = vpow2.f32 %v1936_v19  ;;  %v1770_v12 = vpop.xlane.xlu1 %1769 }
 0x734   : > { %v6844_v43 = vpop.eup %5212  ;;  %v1854_v4 = vsub.f32 %v6637_v2, %v1770_v12  ;;  %v1855_v13 = vsub.f32 %v6639_v32, %v1770_v12  ;;  %v2044_v40 = vadd.f32 %v6842_v34, %v6837_v63 }
 0x735   : > { %v6850_v62 = vpop.eup %5214  ;;  %v1773_v54 = vpop.xlane.xlu0 %1772 }
 0x736   : > { %v1938_v7 = vmul.f32 1.442695, %v1854_v4  ;;  %v1940_v38 = vmul.f32 1.442695, %v1855_v13  ;;  %v1856_v10 = vsub.f32 %v6643_v18, %v1773_v54  ;;  %v1857_v41 = vsub.f32 %v6645_v59, %v1773_v54  ;;  %1826 = vmax.xlane.f32.xlu0 %v8718_v1  ;;  %2045 = vadd.xlane.f32.xlu1 %v2044_v40 }
 0x737   : > { %v2047_v58 = vadd.f32 %v6850_v62, %v6844_v43 }
 0x738   : > { %5224 = vpow2.f32 %v1938_v7  ;;  %v1942_v2 = vmul.f32 1.442695, %v1856_v10  ;;  %v1944_v32 = vmul.f32 1.442695, %v1857_v41  ;;  %v8719_v7 = vmax.f32 %v6763_v3, %v6765_v31 }
 0x739   : > { %5226 = vpow2.f32 %v1940_v38 }
 0x73a   : > { %v6859_v0 = vpop.eup %5216  ;;  %5228 = vpow2.f32 %v1942_v2  ;;  %2048 = vadd.xlane.f32.xlu0 %v2047_v58 }
 0x73b   : > { %v6861_v50 = vpop.eup %5218  ;;  %5230 = vpow2.f32 %v1944_v32  ;;  %v1776_v18 = vpop.xlane.xlu1 %1775 }
 0x73c   : > { %v6863_v59 = vpop.eup %5220  ;;  %v1858_v55 = vsub.f32 %v6649_v20, %v1776_v18  ;;  %v1859_v19 = vsub.f32 %v6651_v42, %v1776_v18  ;;  %v2050_v46 = vadd.f32 %v6861_v50, %v6859_v0 }
 0x73d   : > { %v6869_v36 = vpop.eup %5222  ;;  %v1779_v12 = vpop.xlane.xlu0 %1778 }
 0x73e   : > { %v1946_v4 = vmul.f32 1.442695, %v1858_v55  ;;  %v1948_v13 = vmul.f32 1.442695, %v1859_v19  ;;  %v1860_v40 = vsub.f32 %v6655_v56, %v1779_v12  ;;  %v1861_v54 = vsub.f32 %v6657_v53, %v1779_v12  ;;  %1832 = vmax.xlane.f32.xlu0 %v8719_v7  ;;  %2051 = vadd.xlane.f32.xlu1 %v2050_v46 }
 0x73f   : > { %v2053_v38 = vadd.f32 %v6869_v36, %v6863_v59 }
 0x740   : > { %5232 = vpow2.f32 %v1946_v4  ;;  %v1950_v20 = vmul.f32 1.442695, %v1860_v40  ;;  %v1952_v42 = vmul.f32 1.442695, %v1861_v54 }
 0x741   : > { %5234 = vpow2.f32 %v1948_v13 }
 0x742   : > { %v6878_v10 = vpop.eup %5224  ;;  %5236 = vpow2.f32 %v1950_v20  ;;  %2054 = vadd.xlane.f32.xlu0 %v2053_v38 }
 0x743   : > { %v6880_v41 = vpop.eup %5226  ;;  %5238 = vpow2.f32 %v1952_v42  ;;  %v1782_v56 = vpop.xlane.xlu1 %1781 }
 0x744   : > { %v6882_v53 = vpop.eup %5228  ;;  %v1862_v1 = vsub.f32 %v6661_v52, %v1782_v56  ;;  %v1863_v2 = vsub.f32 %v6663_v25, %v1782_v56  ;;  %v2056_v32 = vadd.f32 %v6880_v41, %v6878_v10 }
 0x745   : > { %v6888_v58 = vpop.eup %5230  ;;  %v1785_v18 = vpop.xlane.xlu0 %1784 }
 0x746   : > { %v1954_v55 = vmul.f32 1.442695, %v1862_v1  ;;  %v1956_v19 = vmul.f32 1.442695, %v1863_v2  ;;  %v1864_v46 = vsub.f32 %v6667_v33, %v1785_v18  ;;  %v1865_v12 = vsub.f32 %v6669_v45, %v1785_v18  ;;  %2057 = vadd.xlane.f32.xlu1 %v2056_v32 }
 0x747   : > { %v2059_v4 = vadd.f32 %v6888_v58, %v6882_v53 }
 0x748   : > { %5240 = vpow2.f32 %v1954_v55  ;;  %v1958_v52 = vmul.f32 1.442695, %v1864_v46  ;;  %v1960_v13 = vmul.f32 1.442695, %v1865_v12 }
 0x749   : > { %5242 = vpow2.f32 %v1956_v19  ;;  %2060 = vadd.xlane.f32.xlu0 %v2059_v4 }
 0x74a   : > { %v6894_v25 = vpop.eup %5232  ;;  %5244 = vpow2.f32 %v1958_v52 }
 0x74b   : > { %v6896_v40 = vpop.eup %5234  ;;  %5246 = vpow2.f32 %v1960_v13  ;;  %v1788_v54 = vpop.xlane.xlu1 %1787 }
 0x74c   : > { %v6898_v7 = vpop.eup %5236  ;;  %v1866_v33 = vsub.f32 %v6673_v23, %v1788_v54  ;;  %v1867_v45 = vsub.f32 %v6675_v5, %v1788_v54  ;;  %v2062_v20 = vadd.f32 %v6896_v40, %v6894_v25 }
 0x74d   : > { %v6904_v42 = vpop.eup %5238  ;;  %v1791_v38 = vpop.xlane.xlu0 %1790 }
 0x74e   : > { %v1962_v56 = vmul.f32 1.442695, %v1866_v33  ;;  %v1964_v1 = vmul.f32 1.442695, %v1867_v45  ;;  %v1868_v2 = vsub.f32 %v6679_v57, %v1791_v38  ;;  %v1869_v32 = vsub.f32 %v6681_v37, %v1791_v38  ;;  %2063 = vadd.xlane.f32.xlu1 %v2062_v20  ;;  %v8721_v37 = vld [vmem:[#allocation25_spill] sm:$0xff]  ;;  %v8722_v20 = vld [vmem:[#allocation24_spill] sm:$0xff] }
 0x74f   : > { %v2065_v18 = vadd.f32 %v6904_v42, %v6898_v7 }
 0x750   : > { %5248 = vpow2.f32 %v1962_v56  ;;  %v1966_v23 = vmul.f32 1.442695, %v1868_v2  ;;  %v1968_v55 = vmul.f32 1.442695, %v1869_v32  ;;  %v8723_v56 = vld [vmem:[#allocation28_spill] sm:$0xff] }
 0x751   : > { %5250 = vpow2.f32 %v1964_v1  ;;  %2066 = vadd.xlane.f32.xlu0 %v2065_v18 }
 0x752   : > { %v6910_v5 = vpop.eup %5240  ;;  %5252 = vpow2.f32 %v1966_v23 }
 0x753   : > { %8720 = vst [vmem:[#allocation39_spill] sm:$0xff] %v6910_v5  ;;  %v6912_v19 = vpop.eup %5242  ;;  %5254 = vpow2.f32 %v1968_v55  ;;  %v1794_v46 = vpop.xlane.xlu1 %1793 }
 0x754   : > { %v6914_v12 = vpop.eup %5244  ;;  %v1870_v57 = vsub.f32 %v6685_v47, %v1794_v46  ;;  %v1871_v4 = vsub.f32 %v8721_v37, %v1794_v46  ;;  %v2068_v52 = vadd.f32 %v6912_v19, %v6910_v5 }
 0x755   : > { %v6920_v13 = vpop.eup %5246  ;;  %v1797_v54 = vpop.xlane.xlu0 %1796 }
 0x756   : > { %v1970_v33 = vmul.f32 1.442695, %v1870_v57  ;;  %v1972_v45 = vmul.f32 1.442695, %v1871_v4  ;;  %v1872_v38 = vsub.f32 %v8722_v20, %v1797_v54  ;;  %v1873_v1 = vsub.f32 %v8723_v56, %v1797_v54  ;;  %2069 = vadd.xlane.f32.xlu1 %v2068_v52  ;;  %v8727_v57 = vld [vmem:[#allocation30_spill] sm:$0xff]  ;;  %v8728_v4 = vld [vmem:[#allocation29_spill] sm:$0xff] }
 0x757   : > { %v2071_v2 = vadd.f32 %v6920_v13, %v6914_v12  ;;  %v8730_v56 = vld [vmem:[#allocation27_spill] sm:$0xff] }
 0x758   : > { %5256 = vpow2.f32 %v1970_v33  ;;  %v1974_v47 = vmul.f32 1.442695, %v1872_v38  ;;  %v1976_v32 = vmul.f32 1.442695, %v1873_v1 }
 0x759   : > { %5258 = vpow2.f32 %v1972_v45  ;;  %2072 = vadd.xlane.f32.xlu0 %v2071_v2  ;;  %v8731_v2 = vld [vmem:[#allocation10_spill] sm:$0xff] }
 0x75a   : > { %v6926_v18 = vpop.eup %5248  ;;  %5260 = vpow2.f32 %v1974_v47 }
 0x75b   : > { %8724 = vst [vmem:[#allocation25_spill] sm:$0xff] %v6926_v18  ;;  %v6928_v23 = vpop.eup %5250  ;;  %5262 = vpow2.f32 %v1976_v32  ;;  %v1800_v55 = vpop.xlane.xlu1 %1799 }
 0x75c   : > { %8725 = vst [vmem:[#allocation24_spill] sm:$0xff] %v6928_v23  ;;  %v6930_v46 = vpop.eup %5252  ;;  %v1874_v37 = vsub.f32 %v8727_v57, %v1800_v55  ;;  %v1875_v52 = vsub.f32 %v8728_v4, %v1800_v55  ;;  %v2074_v54 = vadd.f32 %v6928_v23, %v6926_v18  ;;  %v8734_v18 = vld [vmem:[#allocation16_spill] sm:$0xff] }
 0x75d   : > { %8726 = vst [vmem:[#allocation28_spill] sm:$0xff] %v6930_v46  ;;  %v6936_v33 = vpop.eup %5254  ;;  %v1803_v45 = vpop.xlane.xlu0 %1802 }
 0x75e   : > { %8729 = vst [vmem:[#allocation30_spill] sm:$0xff] %v6936_v33  ;;  %v1978_v20 = vmul.f32 1.442695, %v1874_v37  ;;  %v1980_v38 = vmul.f32 1.442695, %v1875_v52  ;;  %v1876_v1 = vsub.f32 %v8730_v56, %v1803_v45  ;;  %v1877_v47 = vsub.f32 %v8731_v2, %v1803_v45  ;;  %2075 = vadd.xlane.f32.xlu1 %v2074_v54  ;;  %v8732_v56 = vld [vmem:[#allocation11_spill] sm:$0xff] }
 0x75f   : > { %v2077_v32 = vadd.f32 %v6936_v33, %v6930_v46  ;;  %v8733_v54 = vld [vmem:[#allocation17_spill] sm:$0xff]  ;;  %v8735_v46 = vld [vmem:[#allocation36_spill] sm:$0xff] }
 0x760   : > { %5264 = vpow2.f32 %v1978_v20  ;;  %v1982_v57 = vmul.f32 1.442695, %v1876_v1  ;;  %v1984_v5 = vmul.f32 1.442695, %v1877_v47 }
 0x761   : > { %5266 = vpow2.f32 %v1980_v38  ;;  %2078 = vadd.xlane.f32.xlu0 %v2077_v32 }
 0x762   : > { %v6942_v55 = vpop.eup %5256  ;;  %5268 = vpow2.f32 %v1982_v57 }
 0x763   : > { %v6944_v4 = vpop.eup %5258  ;;  %5270 = vpow2.f32 %v1984_v5  ;;  %v1806_v37 = vpop.xlane.xlu1 %1805 }
 0x764   : > { %v6946_v52 = vpop.eup %5260  ;;  %v1878_v45 = vsub.f32 %v8732_v56, %v1806_v37  ;;  %v1879_v2 = vsub.f32 %v8733_v54, %v1806_v37  ;;  %v2080_v20 = vadd.f32 %v6944_v4, %v6942_v55 }
 0x765   : > { %v6952_v1 = vpop.eup %5262  ;;  %v1809_v38 = vpop.xlane.xlu0 %1808 }
 0x766   : > { %v1986_v47 = vmul.f32 1.442695, %v1878_v45  ;;  %v1988_v32 = vmul.f32 1.442695, %v1879_v2  ;;  %v1880_v57 = vsub.f32 %v8734_v18, %v1809_v38  ;;  %v1881_v33 = vsub.f32 %v8735_v46, %v1809_v38  ;;  %2081 = vadd.xlane.f32.xlu1 %v2080_v20  ;;  %v8738_v18 = vld [vmem:[#allocation37_spill] sm:$0xff]  ;;  %v8739_v20 = vld [vmem:[#allocation38_spill] sm:$0xff] }
 0x767   : > { %v2083_v5 = vadd.f32 %v6952_v1, %v6946_v52 }
 0x768   : > { %5272 = vpow2.f32 %v1986_v47  ;;  %v1990_v56 = vmul.f32 1.442695, %v1880_v57  ;;  %v1992_v23 = vmul.f32 1.442695, %v1881_v33 }
 0x769   : > { %5274 = vpow2.f32 %v1988_v32  ;;  %2084 = vadd.xlane.f32.xlu0 %v2083_v5 }
 0x76a   : > { %v6958_v37 = vpop.eup %5264  ;;  %5276 = vpow2.f32 %v1990_v56 }
 0x76b   : > { %8736 = vst [vmem:[#allocation29_spill] sm:$0xff] %v6958_v37  ;;  %v6960_v54 = vpop.eup %5266  ;;  %5278 = vpow2.f32 %v1992_v23  ;;  %v1812_v45 = vpop.xlane.xlu1 %1811 }
 0x76c   : > { %v6962_v2 = vpop.eup %5268  ;;  %v1882_v46 = vsub.f32 %v8738_v18, %v1812_v45  ;;  %v1883_v38 = vsub.f32 %v8739_v20, %v1812_v45  ;;  %v2086_v47 = vadd.f32 %v6960_v54, %v6958_v37 }
 0x76d   : > { %8737 = vst [vmem:[#allocation27_spill] sm:$0xff] %v6962_v2  ;;  %v6968_v57 = vpop.eup %5270 }
 0x76e   : > { %8740 = vst [vmem:[#allocation10_spill] sm:$0xff] %v6968_v57  ;;  %v1994_v33 = vmul.f32 1.442695, %v1882_v46  ;;  %v1996_v32 = vmul.f32 1.442695, %v1883_v38  ;;  %2087 = vadd.xlane.f32.xlu1 %v2086_v47  ;;  %v2089_v5 = vadd.f32 %v6968_v57, %v6962_v2 }
 0x770   : > { %5280 = vpow2.f32 %v1994_v33  ;;  %2090 = vadd.xlane.f32.xlu0 %v2089_v5 }
 0x771   : > { %5282 = vpow2.f32 %v1996_v32  ;;  %v5769_v32 = vld [vmem:[%s8476_s2 + $0x10] sm:$0xff] }
 0x772   : > { %v6972_v23 = vpop.eup %5272 }
 0x773   : > { %8741 = vst [vmem:[#allocation11_spill] sm:$0xff] %v6972_v23  ;;  %v6974_v56 = vpop.eup %5274 }
 0x774   : > { %8742 = vst [vmem:[#allocation17_spill] sm:$0xff] %v6974_v56  ;;  %v6976_v18 = vpop.eup %5276  ;;  %v2092_v45 = vadd.f32 %v6974_v56, %v6972_v23 }
 0x775   : > { %8743 = vst [vmem:[#allocation16_spill] sm:$0xff] %v6976_v18  ;;  %v6980_v20 = vpop.eup %5278 }
 0x776   : > { %8744 = vst [vmem:[#allocation36_spill] sm:$0xff] %v6980_v20  ;;  %2093 = vadd.xlane.f32.xlu1 %v2092_v45  ;;  %v2095_v46 = vadd.f32 %v6980_v20, %v6976_v18 }
 0x778   : > { %2096 = vadd.xlane.f32.xlu0 %v2095_v46 }
 0x77a   : > { %v6984_v38 = vpop.eup %5280 }
 0x77b   : > { %8745 = vst [vmem:[#allocation37_spill] sm:$0xff] %v6984_v38  ;;  %v6986_v47 = vpop.eup %5282 }
 0x77c   : > { %8746 = vst [vmem:[#allocation38_spill] sm:$0xff] %v6986_v47  ;;  %v2098_v33 = vadd.f32 %v6986_v47, %v6984_v38 }
 0x77e   : > { %2099 = vadd.xlane.f32.xlu1 %v2098_v33 }
 0x78f   : > { %336 = vperm.xlu1 %4952, %v5769_v32  }
 0x7ab   : > { %v2028_v5 = vpop.xlane.xlu1 %2027 }
 0x7ac   : > { %5284 = vrcp.f32 %v2028_v5 }
 0x7ae   : > { %v2031_v45 = vpop.xlane.xlu0 %2030 }
 0x7af   : > { %5286 = vrcp.f32 %v2031_v45  ;;  %v1818_v23 = vpop.xlane.xlu1 %1817 }
 0x7b0   : > { %v1886_v46 = vsub.f32 %v6733_v16, %v1818_v23  ;;  %v1887_v18 = vsub.f32 %v6735_v8, %v1818_v23 }
 0x7b2   : > { %v2002_v20 = vmul.f32 1.442695, %v1886_v46  ;;  %v2004_v56 = vmul.f32 1.442695, %v1887_v18  ;;  %v1815_v37 = vpop.xlane.xlu0 %1814 }
 0x7b3   : > { %v1884_v38 = vsub.f32 %v6727_v21, %v1815_v37  ;;  %v1885_v33 = vsub.f32 %v6729_v44, %v1815_v37  ;;  %v2034_v47 = vpop.xlane.xlu1 %2033 }
 0x7b4   : > { %5288 = vpow2.f32 %v2002_v20 }
 0x7b5   : > { %5290 = vpow2.f32 %v2004_v56  ;;  %v1998_v32 = vmul.f32 1.442695, %v1884_v38  ;;  %v2000_v2 = vmul.f32 1.442695, %v1885_v33 }
 0x7b6   : > { %v5285_v5 = vpop.eup %5284  ;;  %5292 = vrcp.f32 %v2034_v47 }
 0x7b7   : > { %5294 = vpow2.f32 %v1998_v32  ;;  %v2037_v45 = vpop.xlane.xlu0 %2036  ;;  %v1824_v57 = vpop.xlane.xlu1 %1823  ;;  %v2155_v21 = vmul.f32 %v5285_v5, %v6779_v26  ;;  %v2154_v47 = vmul.f32 %v5285_v5, %v6777_v6 }
 0x7b8   : > { %5296 = vpow2.f32 %v2000_v2  ;;  %v1890_v16 = vsub.f32 %v6745_v11, %v1824_v57  ;;  %v1891_v8 = vsub.f32 %v6747_v39, %v1824_v57 }
 0x7b9   : > { %v5287_v23 = vpop.eup %5286  ;;  %5298 = vrcp.f32 %v2037_v45 }
 0x7ba   : > { %v2010_v44 = vmul.f32 1.442695, %v1890_v16  ;;  %v2012_v37 = vmul.f32 1.442695, %v1891_v8  ;;  %v2157_v56 = vmul.f32 %v5287_v23, %v6787_v22  ;;  %v2156_v18 = vmul.f32 %v5287_v23, %v6781_v27 }
 0x7bb   : > { %v1821_v20 = vpop.xlane.xlu0 %1820  ;;  %v2040_v38 = vpop.xlane.xlu1 %2039 }
 0x7bc   : > { %5300 = vpow2.f32 %v2010_v44  ;;  %v1888_v2 = vsub.f32 %v6739_v60, %v1821_v20  ;;  %v1889_v11 = vsub.f32 %v6741_v29, %v1821_v20  ;;  %v2221_v39 = vpack.c.bf16 %v2157_v56, %v2155_v21 }
 0x7bd   : > { %5302 = vpow2.f32 %v2012_v37  ;;  %v2220_v57 = vpack.c.bf16 %v2156_v18, %v2154_v47 }
 0x7be   : > { %v7005_v46 = vpop.eup %5288  ;;  %v2006_v26 = vmul.f32 1.442695, %v1888_v2  ;;  %v2008_v33 = vmul.f32 1.442695, %v1889_v11  ;;  %2252 = vmatprep.subr.bf16.mxu0 %v2221_v39  ;;  %5304 = vrcp.f32 %v2040_v38 }
 0x7bf   : > { %v7007_v22 = vpop.eup %5290  ;;  %2253 = vmatpush1.bf16.xpose.msra.mxu0 %v2220_v57  ;;  %v2043_v27 = vpop.xlane.xlu0 %2042 }
 0x7c0   : > { %v1830_v32 = vpop.xlane.xlu1 %1829  ;;  %v5293_v6 = vpop.eup %5292  ;;  %5306 = vpow2.f32 %v2006_v26  ;;  %v2104_v29 = vadd.f32 %v7007_v22, %v7005_v46 }
 0x7c1   : > { %v1894_v60 = vsub.f32 %v6757_v17, %v1830_v32  ;;  %v7012_v5 = vpop.eup %5294  ;;  %5308 = vpow2.f32 %v2008_v33  ;;  %v1895_v23 = vsub.f32 %v6759_v28, %v1830_v32  ;;  %v2159_v18 = vmul.f32 %v5293_v6, %v6798_v61 }
 0x7c2   : > { %v7014_v45 = vpop.eup %5296  ;;  %5310 = vrcp.f32 %v2043_v27  ;;  %2105 = vadd.xlane.f32.xlu1 %v2104_v29  ;;  %v2158_v38 = vmul.f32 %v5293_v6, %v6793_v49 }
 0x7c3   : > { %v2018_v16 = vmul.f32 1.442695, %v1894_v60  ;;  %v5299_v8 = vpop.eup %5298  ;;  %v2101_v21 = vadd.f32 %v7014_v45, %v7012_v5  ;;  %v1827_v44 = vpop.xlane.xlu0 %1826 }
 0x7c4   : > { %v1892_v17 = vsub.f32 %v6751_v15, %v1827_v44  ;;  %v1893_v37 = vsub.f32 %v6753_v30, %v1827_v44  ;;  %v2046_v56 = vpop.xlane.xlu1 %2045  ;;  %v2161_v20 = vmul.f32 %v5299_v8, %v6811_v9  ;;  %v2160_v47 = vmul.f32 %v5299_v8, %v6807_v14 }
 0x7c5   : > { %2102 = vadd.xlane.f32.xlu0 %v2101_v21  ;;  %5312 = vpow2.f32 %v2018_v16  ;;  %v2020_v15 = vmul.f32 1.442695, %v1895_v23 }
 0x7c6   : > { %v7025_v2 = vpop.eup %5300  ;;  %v2014_v28 = vmul.f32 1.442695, %v1892_v17  ;;  %v2016_v11 = vmul.f32 1.442695, %v1893_v37  ;;  %v2223_v39 = vpack.c.bf16 %v2161_v20, %v2159_v18  ;;  %5314 = vrcp.f32 %v2046_v56 }
 0x7c7   : > { %v7027_v57 = vpop.eup %5302  ;;  %v2049_v30 = vpop.xlane.xlu0 %2048  ;;  %v2222_v26 = vpack.c.bf16 %v2160_v47, %v2158_v38 }
 0x7c8   : > { %5316 = vpow2.f32 %v2014_v28  ;;  %2254 = vmatprep.subr.bf16.mxu0 %v2223_v39  ;;  %v2110_v61 = vadd.f32 %v7027_v57, %v7025_v2  ;;  %v5305_v49 = vpop.eup %5304 }
 0x7c9   : > { %5318 = vpow2.f32 %v2016_v11  ;;  %2255 = vmatpush1.bf16.xpose.msra.mxu0 %v2222_v26  ;;  %v2163_v16 = vmul.f32 %v5305_v49, %v6820_v51  ;;  %v2162_v23 = vmul.f32 %v5305_v49, %v6815_v24 }
 0x7ca   : > { %v7031_v14 = vpop.eup %5306  ;;  %5320 = vrcp.f32 %v2049_v30  ;;  %2111 = vadd.xlane.f32.xlu1 %v2110_v61 }
 0x7cb   : > { %v7033_v9 = vpop.eup %5308  ;;  %5322 = vpow2.f32 %v2020_v15  ;;  %v1833_v33 = vpop.xlane.xlu0 %1832 }
 0x7cc   : > { %v5311_v27 = vpop.eup %5310  ;;  %v1896_v32 = vsub.f32 %v6763_v3, %v1833_v33  ;;  %v1897_v6 = vsub.f32 %v6765_v31, %v1833_v33  ;;  %v2052_v60 = vpop.xlane.xlu1 %2051  ;;  %v2107_v29 = vadd.f32 %v7033_v9, %v7031_v14 }
 0x7cd   : > { %v2165_v8 = vmul.f32 %v5311_v27, %v6828_v35  ;;  %v2164_v21 = vmul.f32 %v5311_v27, %v6822_v48  ;;  %5324 = vrcp.f32 %v2052_v60 }
 0x7ce   : > { %v2022_v44 = vmul.f32 1.442695, %v1896_v32  ;;  %v2024_v17 = vmul.f32 1.442695, %v1897_v6  ;;  %2108 = vadd.xlane.f32.xlu0 %v2107_v29 }
 0x7cf   : > { %v2055_v37 = vpop.xlane.xlu0 %2054  ;;  %v2225_v3 = vpack.c.bf16 %v2165_v8, %v2163_v16  ;;  %v2224_v56 = vpack.c.bf16 %v2164_v21, %v2162_v23  ;;  %v7043_v31 = vpop.eup %5312 }
 0x7d0   : > { %5326 = vpow2.f32 %v2022_v44  ;;  %v5315_v18 = vpop.eup %5314 }
 0x7d1   : > { %5328 = vpow2.f32 %v2024_v17  ;;  %2256 = vmatprep.subr.bf16.mxu0 %v2225_v3  ;;  %v2167_v38 = vmul.f32 %v5315_v18, %v6842_v34  ;;  %v2166_v11 = vmul.f32 %v5315_v18, %v6837_v63  ;;  %v215_v34 = vld [vmem:[%s8476_s2 + $0x30] sm:$0xff] }
 0x7d2   : > { %v7045_v51 = vpop.eup %5316  ;;  %5330 = vrcp.f32 %v2055_v37  ;;  %2257 = vmatpush1.bf16.xpose.msra.mxu0 %v2224_v56 }
 0x7d3   : > { %v7047_v24 = vpop.eup %5318  ;;  %v2058_v48 = vpop.xlane.xlu1 %2057 }
 0x7d4   : > { %v5321_v35 = vpop.eup %5320  ;;  %v2113_v20 = vadd.f32 %v7047_v24, %v7045_v51  ;;  %5332 = vrcp.f32 %v2058_v48 }
 0x7d5   : > { %v7052_v47 = vpop.eup %5322  ;;  %v2169_v28 = vmul.f32 %v5321_v35, %v6850_v62  ;;  %v2168_v39 = vmul.f32 %v5321_v35, %v6844_v43 }
 0x7d6   : > { %2114 = vadd.xlane.f32.xlu0 %v2113_v20  ;;  %v2061_v15 = vpop.xlane.xlu0 %2060  ;;  %v2116_v61 = vadd.f32 %v7052_v47, %v7043_v31 }
 0x7d7   : > { %5334 = vrcp.f32 %v2061_v15  ;;  %v2227_v30 = vpack.c.bf16 %v2169_v28, %v2167_v38  ;;  %v2226_v26 = vpack.c.bf16 %v2168_v39, %v2166_v11  ;;  %v5325_v49 = vpop.eup %5324  ;;  %v218_v15 = vld [vmem:[%s8476_s2 + $0x48] sm:$0xff] }
 0x7d8   : > { %v2171_v32 = vmul.f32 %v5325_v49, %v6861_v50  ;;  %v2170_v60 = vmul.f32 %v5325_v49, %v6859_v0 }
 0x7d9   : > { %2258 = vmatprep.subr.bf16.mxu0 %v2227_v30 }
 0x7da   : > { %v7062_v33 = vpop.eup %5326  ;;  %2259 = vmatpush1.bf16.xpose.msra.mxu0 %v2226_v26  ;;  %2117 = vadd.xlane.f32.xlu0 %v2116_v61  ;;  %v8747_v61 = vld [vmem:[#allocation39_spill] sm:$0xff] }
 0x7db   : > { %v7064_v63 = vpop.eup %5328  ;;  %355 = vperm.xlu1 %4952, %v215_v34   ;;  %v2064_v43 = vpop.xlane.xlu1 %2063 }
 0x7dc   : > { %v5331_v62 = vpop.eup %5330  ;;  %v2119_v27 = vadd.f32 %v7064_v63, %v7062_v33  ;;  %5336 = vrcp.f32 %v2064_v43 }
 0x7dd   : > { %v2173_v6 = vmul.f32 %v5331_v62, %v6869_v36  ;;  %v2172_v29 = vmul.f32 %v5331_v62, %v6863_v59 }
 0x7de   : > { %v2067_v16 = vpop.xlane.xlu0 %2066  ;;  %2120 = vadd.xlane.f32.xlu0 %v2119_v27  ;;  %v5333_v8 = vpop.eup %5332  ;;  %v8748_v27 = vld [vmem:[#allocation24_spill] sm:$0xff] }
 0x7df   : > { %5338 = vrcp.f32 %v2067_v16  ;;  %v2229_v23 = vpack.c.bf16 %v2173_v6, %v2171_v32  ;;  %v2228_v21 = vpack.c.bf16 %v2172_v29, %v2170_v60  ;;  %v2175_v17 = vmul.f32 %v5333_v8, %v6880_v41  ;;  %v8750_v29 = vld [vmem:[#allocation28_spill] sm:$0xff] }
 0x7e0   : > { %v2174_v59 = vmul.f32 %v5333_v8, %v6878_v10  ;;  %v8751_v8 = vld [vmem:[#allocation25_spill] sm:$0xff] }
 0x7e1   : > { %v5335_v44 = vpop.eup %5334  ;;  %2260 = vmatprep.subr.bf16.mxu0 %v2229_v23 }
 0x7e2   : > { %2261 = vmatpush1.bf16.xpose.msra.mxu0 %v2228_v21  ;;  %v2177_v50 = vmul.f32 %v5335_v44, %v6888_v58  ;;  %v2176_v36 = vmul.f32 %v5335_v44, %v6882_v53 }
 0x7e3   : > { %v2070_v37 = vpop.xlane.xlu1 %2069 }
 0x7e4   : > { %v2231_v3 = vpack.c.bf16 %v2177_v50, %v2175_v17  ;;  %5340 = vrcp.f32 %v2070_v37  ;;  %v2230_v18 = vpack.c.bf16 %v2176_v36, %v2174_v59 }
 0x7e6   : > { %v2073_v0 = vpop.xlane.xlu0 %2072  ;;  %2262 = vmatprep.subr.bf16.mxu0 %v2231_v3  ;;  %v5337_v56 = vpop.eup %5336 }
 0x7e7   : > { %5342 = vrcp.f32 %v2073_v0  ;;  %v2179_v35 = vmul.f32 %v5337_v56, %v6896_v40  ;;  %v2178_v28 = vmul.f32 %v5337_v56, %v6894_v25 }
 0x7e9   : > { %v5339_v48 = vpop.eup %5338 }
 0x7ea   : > { %2263 = vmatpush1.bf16.xpose.msra.mxu0 %v2230_v18  ;;  %v2181_v41 = vmul.f32 %v5339_v48, %v6904_v42  ;;  %v2180_v38 = vmul.f32 %v5339_v48, %v6898_v7 }
 0x7eb   : > { %v2076_v20 = vpop.xlane.xlu1 %2075 }
 0x7ec   : > { %v2233_v58 = vpack.c.bf16 %v2181_v41, %v2179_v35  ;;  %5344 = vrcp.f32 %v2076_v20  ;;  %v2232_v10 = vpack.c.bf16 %v2180_v38, %v2178_v28  ;;  %v8752_v20 = vld [vmem:[#allocation10_spill] sm:$0xff]  ;;  %v8753_v38 = vld [vmem:[#allocation27_spill] sm:$0xff] }
 0x7ee   : > { %v2079_v53 = vpop.xlane.xlu0 %2078  ;;  %2264 = vmatprep.subr.bf16.mxu0 %v2233_v58  ;;  %v5341_v11 = vpop.eup %5340 }
 0x7ef   : > { %5346 = vrcp.f32 %v2079_v53  ;;  %v2183_v40 = vmul.f32 %v5341_v11, %v6912_v19  ;;  %v2182_v34 = vmul.f32 %v5341_v11, %v8747_v61  ;;  %v8749_v19 = vld [vmem:[#allocation30_spill] sm:$0xff] }
 0x7f1   : > { %v5343_v39 = vpop.eup %5342 }
 0x7f2   : > { %2265 = vmatpush1.bf16.xpose.msra.mxu0 %v2232_v10  ;;  %v2185_v42 = vmul.f32 %v5343_v39, %v6920_v13  ;;  %v2184_v26 = vmul.f32 %v5343_v39, %v6914_v12 }
 0x7f3   : > { %v2082_v30 = vpop.xlane.xlu1 %2081 }
 0x7f4   : > { %370 = vperm.xlu0 %4951, %v218_v15   ;;  %v2235_v7 = vpack.c.bf16 %v2185_v42, %v2183_v40  ;;  %5348 = vrcp.f32 %v2082_v30  ;;  %v2234_v43 = vpack.c.bf16 %v2184_v26, %v2182_v34  ;;  %v8755_v15 = vld [vmem:[#allocation12_spill] sm:$0xff] }
 0x7f5   : > { %v8758_v26 = vld [vmem:[#allocation36_spill] sm:$0xff] }
 0x7f6   : > { %v2085_v25 = vpop.xlane.xlu0 %2084  ;;  %2266 = vmatprep.subr.bf16.mxu0 %v2235_v7  ;;  %v5345_v49 = vpop.eup %5344  ;;  %v8757_v7 = vld [vmem:[#allocation17_spill] sm:$0xff]  ;;  %v8759_v34 = vld [vmem:[#allocation16_spill] sm:$0xff] }
 0x7f7   : > { %5350 = vrcp.f32 %v2085_v25  ;;  %v2187_v32 = vmul.f32 %v5345_v49, %v8748_v27  ;;  %v2186_v23 = vmul.f32 %v5345_v49, %v8751_v8  ;;  %v8762_v8 = vld [vmem:[#allocation37_spill] sm:$0xff] }
 0x7f9   : > { %v5347_v62 = vpop.eup %5346 }
 0x7fa   : > { %2267 = vmatpush1.bf16.xpose.msra.mxu0 %v2234_v43  ;;  %v2189_v6 = vmul.f32 %v5347_v62, %v8749_v19  ;;  %v2188_v16 = vmul.f32 %v5347_v62, %v8750_v29  ;;  %v8760_v43 = vld [vmem:[#allocation11_spill] sm:$0xff]  ;;  %v8761_v29 = vld [vmem:[#allocation38_spill] sm:$0xff] }
 0x7fb   : > { %v2088_v13 = vpop.xlane.xlu1 %2087 }
 0x7fc   : > { %5352 = vrcp.f32 %v2088_v13  ;;  %v2237_v60 = vpack.c.bf16 %v2189_v6, %v2187_v32  ;;  %v2236_v44 = vpack.c.bf16 %v2188_v16, %v2186_v23 }
 0x7fd   : > { %v2091_v12 = vpop.xlane.xlu0 %2090 }
 0x7fe   : > { %5354 = vrcp.f32 %v2091_v12  ;;  %2268 = vmatprep.subr.bf16.mxu0 %v2237_v60  ;;  %v5349_v21 = vpop.eup %5348 }
 0x7ff   : > { %v2191_v50 = vmul.f32 %v5349_v21, %v6944_v4  ;;  %v2190_v18 = vmul.f32 %v5349_v21, %v6942_v55  ;;  %v8756_v55 = vld [vmem:[#allocation13_spill] sm:$0xff] }
 0x801   : > { %v5351_v17 = vpop.eup %5350 }
 0x802   : > { %2269 = vmatpush1.bf16.xpose.msra.mxu0 %v2236_v44  ;;  %v2193_v37 = vmul.f32 %v5351_v17, %v6952_v1  ;;  %v2192_v0 = vmul.f32 %v5351_v17, %v6946_v52  ;;  %v8754_v52 = vld [vmem:[#allocation29_spill] sm:$0xff] }
 0x803   : > { %v2094_v3 = vpop.xlane.xlu1 %2093 }
 0x804   : > { %5356 = vrcp.f32 %v2094_v3  ;;  %v2239_v36 = vpack.c.bf16 %v2193_v37, %v2191_v50  ;;  %v2238_v35 = vpack.c.bf16 %v2192_v0, %v2190_v18 }
 0x805   : > { %v2097_v59 = vpop.xlane.xlu0 %2096 }
 0x806   : > { %v5353_v56 = vpop.eup %5352  ;;  %5358 = vrcp.f32 %v2097_v59  ;;  %2270 = vmatprep.subr.bf16.mxu0 %v2239_v36 }
 0x807   : > { %v2195_v41 = vmul.f32 %v5353_v56, %v6960_v54  ;;  %v2194_v11 = vmul.f32 %v5353_v56, %v8754_v52 }
 0x808   : > { %v5355_v48 = vpop.eup %5354 }
 0x809   : > { %v2197_v58 = vmul.f32 %v5355_v48, %v8752_v20  ;;  %v2196_v53 = vmul.f32 %v5355_v48, %v8753_v38 }
 0x80a   : > { %2271 = vmatpush1.bf16.xpose.msra.mxu0 %v2238_v35 }
 0x80b   : > { %v2100_v4 = vpop.xlane.xlu1 %2099  ;;  %v2241_v1 = vpack.c.bf16 %v2197_v58, %v2195_v41  ;;  %v2240_v30 = vpack.c.bf16 %v2196_v53, %v2194_v11 }
 0x80c   : > { %5360 = vrcp.f32 %v2100_v4 }
 0x80d   : > { %2272 = vmatprep.subr.bf16.mxu0 %v2241_v1 }
 0x80e   : > { %v5357_v28 = vpop.eup %5356 }
 0x80f   : > { %v337_v10 = vpop.permute.xlu1 %336  ;;  %v2199_v54 = vmul.f32 %v5357_v28, %v8757_v7  ;;  %v2198_v62 = vmul.f32 %v5357_v28, %v8760_v43  ;;  %v8763_v28 = vld [vmem:[#allocation31_spill] sm:$0xff] }
 0x810   : > { %v5359_v39 = vpop.eup %5358  ;;  %v477_v40 = vadd.f32 %v8755_v15, %v337_v10  ;;  %v479_v42 = vadd.f32 %v8756_v55, %v337_v10  ;;  %v8764_v10 = vld [vmem:[#allocation33_spill] sm:$0xff] }
 0x811   : > { %v2201_v25 = vmul.f32 %v5359_v39, %v8758_v26  ;;  %v2200_v49 = vmul.f32 %v5359_v39, %v8759_v34 }
 0x812   : > { %2273 = vmatpush1.bf16.xpose.msra.mxu0 %v2240_v30  ;;  %2325 = vxpose.xlu0.b32.start.end [1/1] (short) %v479_v42, 128  ;;  %v8765_v42 = vld [vmem:[#allocation32_spill] sm:$0xff] }
 0x813   : > { %2293 = vxpose.xlu1.b32.start.end [1/1] (short) %v477_v40, 128  ;;  %v2243_v61 = vpack.c.bf16 %v2201_v25, %v2199_v54  ;;  %v2242_v27 = vpack.c.bf16 %v2200_v49, %v2198_v62  ;;  %v8766_v54 = vld [vmem:[#allocation19_spill] sm:$0xff] }
 0x815   : > { %2274 = vmatprep.subr.bf16.mxu0 %v2243_v61 }
 0x816   : > { %v5361_v6 = vpop.eup %5360 }
 0x817   : > { %v2203_v16 = vmul.f32 %v5361_v6, %v8761_v29  ;;  %v2202_v23 = vmul.f32 %v5361_v6, %v8762_v8 }
 0x81a   : > { %2275 = vmatpush1.bf16.xpose.msra.mxu0 %v2242_v27 }
 0x84f   : > { %v2106_v19 = vpop.xlane.xlu1 %2105 }
 0x852   : > { %v2103_v32 = vpop.xlane.xlu0 %2102 }
 0x853   : > { %5362 = vrcp.f32 %v2103_v32 }
 0x854   : > { %5364 = vrcp.f32 %v2106_v19 }
 0x857   : > { %v2112_v44 = vpop.xlane.xlu1 %2111 }
 0x85b   : > { %v2109_v13 = vpop.xlane.xlu0 %2108 }
 0x85c   : > { %5366 = vrcp.f32 %v2109_v13 }
 0x85d   : > { %v5363_v60 = vpop.eup %5362  ;;  %5368 = vrcp.f32 %v2112_v44 }
 0x85e   : > { %v2205_v12 = vmul.f32 %v5363_v60, %v7014_v45  ;;  %v2204_v21 = vmul.f32 %v5363_v60, %v7012_v5  ;;  %v5365_v3 = vpop.eup %5364 }
 0x85f   : > { %v2207_v59 = vmul.f32 %v5365_v3, %v7007_v22  ;;  %v2206_v45 = vmul.f32 %v5365_v3, %v7005_v46 }
 0x860   : > { %v2245_v17 = vpack.c.bf16 %v2205_v12, %v2203_v16  ;;  %v2244_v50 = vpack.c.bf16 %v2204_v21, %v2202_v23 }
 0x862   : > { %2276 = vmatprep.subr.bf16.mxu0 %v2245_v17 }
 0x863   : > { %2277 = vmatpush1.bf16.xpose.msra.mxu0 %v2244_v50  ;;  %v2115_v37 = vpop.xlane.xlu0 %2114 }
 0x864   : > { %5370 = vrcp.f32 %v2115_v37 }
 0x866   : > { %v5367_v36 = vpop.eup %5366 }
 0x867   : > { %v2118_v0 = vpop.xlane.xlu0 %2117  ;;  %v2209_v56 = vmul.f32 %v5367_v36, %v7033_v9  ;;  %v2208_v18 = vmul.f32 %v5367_v36, %v7031_v14  ;;  %v5369_v41 = vpop.eup %5368 }
 0x868   : > { %5372 = vrcp.f32 %v2118_v0  ;;  %v2211_v58 = vmul.f32 %v5369_v41, %v7027_v57  ;;  %v2210_v22 = vmul.f32 %v5369_v41, %v7025_v2  ;;  %v356_v14 = vpop.permute.xlu1 %355 }
 0x869   : > { %v2247_v5 = vpack.c.bf16 %v2209_v56, %v2207_v59  ;;  %v2246_v48 = vpack.c.bf16 %v2208_v18, %v2206_v45  ;;  %v499_v39 = vadd.f32 %v8764_v10, %v356_v14  ;;  %v497_v30 = vadd.f32 %v8765_v42, %v356_v14 }
 0x86b   : > { %v2121_v35 = vpop.xlane.xlu0 %2120  ;;  %2278 = vmatprep.subr.bf16.mxu0 %v2247_v5  ;;  %v2374_v7 = vpack.c.bf16 %v499_v39, %v499_v39  ;;  %v2373_v25 = vpack.c.bf16 %v497_v30, %v497_v30 }
 0x86c   : > { %5374 = vrcp.f32 %v2121_v35  ;;  %2279 = vmatpush1.bf16.xpose.msra.mxu0 %v2246_v48 }
 0x86e   : > { %v5371_v20 = vpop.eup %5370 }
 0x86f   : > { %v2213_v4 = vmul.f32 %v5371_v20, %v7047_v24  ;;  %v2212_v9 = vmul.f32 %v5371_v20, %v7045_v51 }
 0x871   : > { %v2249_v46 = vpack.c.bf16 %v2213_v4, %v2211_v58  ;;  %v2248_v1 = vpack.c.bf16 %v2212_v9, %v2210_v22 }
 0x872   : > { %v5373_v53 = vpop.eup %5372 }
 0x873   : > { %v371_v38 = vpop.permute.xlu0 %370  ;;  %2280 = vmatprep.subr.bf16.mxu0 %v2249_v46  ;;  %v2215_v57 = vmul.f32 %v5373_v53, %v7052_v47  ;;  %v2214_v2 = vmul.f32 %v5373_v53, %v7043_v31  ;;  %v8767_v31 = vmov 0  }
 0x874   : > { %v513_v52 = vadd.f32 %v8763_v28, %v371_v38  ;;  %2281 = vmatpush1.bf16.xpose.msra.mxu0 %v2248_v1  ;;  %v511_v26 = vadd.f32 %v8766_v54, %v371_v38 }
 0x876   : > { %v5375_v11 = vpop.eup %5374  ;;  %v2219_v15 = vpack.c.bf16 %v513_v52, %v513_v52  ;;  %v2218_v47 = vpack.c.bf16 %v511_v26, %v511_v26 }
 0x877   : > { %v2217_v24 = vmul.f32 %v5375_v11, %v7064_v63  ;;  %v2216_v51 = vmul.f32 %v5375_v11, %v7062_v33  ;;  %v2424_v63 = vsel %vm263_vm0, %v2373_v25, 0 }
 0x878   : > { %2284 = vmatprep.mubr.bf16.mxu0 %v2219_v15 }
 0x879   : > { %v2251_v40 = vpack.c.bf16 %v2217_v24, %v2215_v57  ;;  %v2250_v55 = vpack.c.bf16 %v2216_v51, %v2214_v2 }
 0x87b   : > { %2282 = vmatprep.subr.bf16.mxu0 %v2251_v40 }
 0x87c   : > { %2283 = vmatpush1.bf16.xpose.msra.mxu0 %v2250_v55 }
 0x87d   : > { %4872 = vmatprep.subr.msk.bf16.mxu0 %vm263_vm0, %v2374_v7 }
 0x883   : > { %2285 = vmatmul.mubr.bf16.vlgmr.msra.gmra.mrb[72].mxu0 %v2218_v47 }
 0x884   : > { %2430 = vmatpush1.bf16.msra.mxu0 %v2424_v63  ;;  %2461 = vmatprep.mubr.bf16.mxu0 %v8767_v31 }
 0x892   : > { %v2341_v16 = vpop.trf.xlu0 }
 0x893   : > { %v2309_v33 = vpop.trf.xlu1 }
 0x896   : > { %v2342_v21 = vpop.trf.xlu0 }
 0x897   : > { %v2310_v61 = vpop.trf.xlu1  ;;  %v2365_v48 = vpack.c.bf16 %v2342_v21, %v2341_v16 }
 0x898   : > { %v2357_v34 = vpack.c.bf16 %v2310_v61, %v2309_v33 }
 0x89a   : > { %4873 = vmatmul.mubr.msk.bf16.vlgmr.msra.gmra.mrb[76].mxu0 %vm256_vm1, %v2357_v34  ;;  %v2343_v50 = vpop.trf.xlu0 }
 0x89b   : > { %v2311_v49 = vpop.trf.xlu1  ;;  %2471 = vmatprep.mubr.bf16.mxu0 %v8767_v31 }
 0x89e   : > { %v2344_v36 = vpop.trf.xlu0 }
 0x89f   : > { %v2312_v43 = vpop.trf.xlu1  ;;  %v2366_v41 = vpack.c.bf16 %v2344_v36, %v2343_v50 }
 0x8a0   : > { %v2358_v62 = vpack.c.bf16 %v2312_v43, %v2311_v49 }
 0x8a2   : > { %4874 = vmatmul.mubr.msk.bf16.gmra.mrb[80].mxu0 %vm256_vm1, %v2358_v62  ;;  %v2345_v56 = vpop.trf.xlu0 }
 0x8a3   : > { %v2313_v27 = vpop.trf.xlu1  ;;  %2481 = vmatprep.mubr.bf16.mxu0 %v8767_v31 }
 0x8a6   : > { %v2346_v5 = vpop.trf.xlu0 }
 0x8a7   : > { %v2314_v32 = vpop.trf.xlu1  ;;  %v2367_v4 = vpack.c.bf16 %v2346_v5, %v2345_v56 }
 0x8a8   : > { %v2359_v19 = vpack.c.bf16 %v2314_v32, %v2313_v27 }
 0x8aa   : > { %4875 = vmatmul.mubr.msk.bf16.gmra.mrb[84].mxu0 %vm256_vm1, %v2359_v19  ;;  %v2347_v35 = vpop.trf.xlu0 }
 0x8ab   : > { %v2315_v6 = vpop.trf.xlu1  ;;  %2491 = vmatprep.mubr.bf16.mxu0 %v8767_v31 }
 0x8ae   : > { %v2348_v20 = vpop.trf.xlu0 }
 0x8af   : > { %v2316_v13 = vpop.trf.xlu1  ;;  %v2368_v9 = vpack.c.bf16 %v2348_v20, %v2347_v35 }
 0x8b0   : > { %v2360_v60 = vpack.c.bf16 %v2316_v13, %v2315_v6 }
 0x8b2   : > { %4876 = vmatmul.mubr.msk.bf16.gmra.mrb[88].mxu0 %vm256_vm1, %v2360_v60  ;;  %v2349_v58 = vpop.trf.xlu0 }
 0x8b3   : > { %v2317_v29 = vpop.trf.xlu1  ;;  %2501 = vmatprep.mubr.bf16.mxu0 %v8767_v31 }
 0x8b6   : > { %v2350_v22 = vpop.trf.xlu0 }
 0x8b7   : > { %v2318_v12 = vpop.trf.xlu1  ;;  %v2369_v14 = vpack.c.bf16 %v2350_v22, %v2349_v58 }
 0x8b8   : > { %v2361_v8 = vpack.c.bf16 %v2318_v12, %v2317_v29 }
 0x8ba   : > { %4877 = vmatmul.mubr.msk.bf16.gmra.mrb[92].mxu0 %vm256_vm1, %v2361_v8  ;;  %v2351_v46 = vpop.trf.xlu0 }
 0x8bb   : > { %v2319_v23 = vpop.trf.xlu1  ;;  %2511 = vmatprep.mubr.bf16.mxu0 %v8767_v31 }
 0x8be   : > { %v2352_v1 = vpop.trf.xlu0 }
 0x8bf   : > { %v2320_v44 = vpop.trf.xlu1  ;;  %v2370_v53 = vpack.c.bf16 %v2352_v1, %v2351_v46 }
 0x8c0   : > { %v2362_v17 = vpack.c.bf16 %v2320_v44, %v2319_v23 }
 0x8c2   : > { %4878 = vmatmul.mubr.msk.bf16.gmra.mrb[96].mxu0 %vm256_vm1, %v2362_v17  ;;  %v2353_v38 = vpop.trf.xlu0 }
 0x8c3   : > { %v2321_v37 = vpop.trf.xlu1  ;;  %2521 = vmatprep.mubr.bf16.mxu0 %v8767_v31 }
 0x8c6   : > { %v2354_v28 = vpop.trf.xlu0 }
 0x8c7   : > { %v2322_v3 = vpop.trf.xlu1  ;;  %v2371_v11 = vpack.c.bf16 %v2354_v28, %v2353_v38 }
 0x8c8   : > { %v2363_v0 = vpack.c.bf16 %v2322_v3, %v2321_v37 }
 0x8ca   : > { %4879 = vmatmul.mubr.msk.bf16.gmra.mrb[100].mxu0 %vm256_vm1, %v2363_v0  ;;  %v2355_v52 = vpop.trf.xlu0 }
 0x8cb   : > { %v2323_v59 = vpop.trf.xlu1  ;;  %2531 = vmatprep.mubr.bf16.mxu0 %v8767_v31 }
 0x8ce   : > { %v2356_v10 = vpop.trf.xlu0 }
 0x8cf   : > { %v2324_v45 = vpop.trf.xlu1  ;;  %v2372_v39 = vpack.c.bf16 %v2356_v10, %v2355_v52 }
 0x8d0   : > { %v2364_v18 = vpack.c.bf16 %v2324_v45, %v2323_v59 }
 0x8d2   : > { %4880 = vmatmul.mubr.msk.bf16.gmra.mrb[104].mxu0 %vm256_vm1, %v2364_v18 }
 0x8d3   : > { %2541 = vmatprep.mubr.bf16.mxu0 %v8767_v31 }
 0x8da   : > { %4881 = vmatmul.mubr.msk.bf16.gmra.mrb[108].mxu0 %vm256_vm1, %v2365_v48 }
 0x8db   : > { %2551 = vmatprep.mubr.bf16.mxu0 %v8767_v31 }
 0x8e2   : > { %4882 = vmatmul.mubr.msk.bf16.gmra.mrb[112].mxu0 %vm256_vm1, %v2366_v41 }
 0x8e3   : > { %2561 = vmatprep.mubr.bf16.mxu0 %v8767_v31 }
 0x8ea   : > { %4883 = vmatmul.mubr.msk.bf16.gmra.mrb[116].mxu0 %vm256_vm1, %v2367_v4 }
 0x8eb   : > { %2571 = vmatprep.mubr.bf16.mxu0 %v8767_v31 }
 0x8f2   : > { %4884 = vmatmul.mubr.msk.bf16.gmra.mrb[120].mxu0 %vm256_vm1, %v2368_v9 }
 0x8f3   : > { %2581 = vmatprep.mubr.bf16.mxu0 %v8767_v31 }
 0x8fa   : > { %4885 = vmatmul.mubr.msk.bf16.gmra.mrb[124].mxu0 %vm256_vm1, %v2369_v14 }
 0x8fb   : > { %2591 = vmatprep.mubr.bf16.mxu0 %v8767_v31 }
 0x902   : > { %4886 = vmatmul.mubr.msk.bf16.gmra.mrb[128].mxu0 %vm256_vm1, %v2370_v53 }
 0x903   : > { %2601 = vmatprep.mubr.bf16.mxu0 %v8767_v31 }
 0x90a   : > { %4887 = vmatmul.mubr.msk.bf16.gmra.mrb[132].mxu0 %vm256_vm1, %v2371_v11 }
 0x90b   : > { %2611 = vmatprep.mubr.bf16.mxu0 %v8767_v31 }
 0x912   : > { %4888 = vmatmul.mubr.msk.bf16.gmra.mrb[136].mxu0 %vm256_vm1, %v2372_v39 }
 0x956   : > { %v7159_v15 = vpop.f32.mrb[72].mxu0 }
 0x957   : > { %8768 = vst [vmem:[#allocation39_spill] sm:$0xff] %v7159_v15  ;;  %v7163_v2 = vpop.f32.mrb[73].mxu0 }
 0x958   : > { %8770 = vst [vmem:[#allocation24_spill] sm:$0xff] %v7163_v2  ;;  %v2290_v55 = vpop.f32.mrb[74].mxu0 }
 0x959   : > { %v2291_v42 = vpop.f32.mrb[75].mxu0 }
 0x96d   : > { %v7167_v30 = vpop.f32.mrb[76].mxu0 }
 0x96e   : > { %v7169_v7 = vpop.f32.mrb[77].mxu0 }
 0x96f   : > { %v2622_v54 = vmax.f32 %v7167_v30, %v7169_v7  ;;  %v7173_v26 = vpop.f32.mrb[78].mxu0 }
 0x970   : > { %v7175_v25 = vpop.f32.mrb[79].mxu0 }
 0x971   : > { %v2625_v47 = vmax.f32 %v7173_v26, %v7175_v25  ;;  %2623 = vmax.xlane.f32.xlu1 %v2622_v54 }
 0x973   : > { %2626 = vmax.xlane.f32.xlu0 %v2625_v47 }
 0x975   : > { %v7179_v63 = vpop.f32.mrb[80].mxu0 }
 0x976   : > { %v7181_v33 = vpop.f32.mrb[81].mxu0 }
 0x977   : > { %v2628_v61 = vmax.f32 %v7179_v63, %v7181_v33  ;;  %v7185_v34 = vpop.f32.mrb[82].mxu0 }
 0x978   : > { %v7187_v49 = vpop.f32.mrb[83].mxu0 }
 0x979   : > { %v2631_v43 = vmax.f32 %v7185_v34, %v7187_v49  ;;  %2629 = vmax.xlane.f32.xlu1 %v2628_v61 }
 0x97d   : > { %2632 = vmax.xlane.f32.xlu1 %v2631_v43  ;;  %v7191_v62 = vpop.f32.mrb[84].mxu0 }
 0x97e   : > { %v7193_v27 = vpop.f32.mrb[85].mxu0 }
 0x97f   : > { %v2634_v32 = vmax.f32 %v7191_v62, %v7193_v27  ;;  %v7197_v19 = vpop.f32.mrb[86].mxu0 }
 0x980   : > { %v7199_v6 = vpop.f32.mrb[87].mxu0 }
 0x981   : > { %v2637_v13 = vmax.f32 %v7197_v19, %v7199_v6  ;;  %2635 = vmax.xlane.f32.xlu0 %v2634_v32 }
 0x983   : > { %2638 = vmax.xlane.f32.xlu1 %v2637_v13 }
 0x985   : > { %v7203_v60 = vpop.f32.mrb[88].mxu0 }
 0x986   : > { %v7205_v29 = vpop.f32.mrb[89].mxu0 }
 0x987   : > { %v2640_v16 = vmax.f32 %v7203_v60, %v7205_v29  ;;  %v7209_v12 = vpop.f32.mrb[90].mxu0 }
 0x988   : > { %v7211_v8 = vpop.f32.mrb[91].mxu0 }
 0x989   : > { %v2643_v23 = vmax.f32 %v7209_v12, %v7211_v8  ;;  %2641 = vmax.xlane.f32.xlu0 %v2640_v16 }
 0x98b   : > { %2644 = vmax.xlane.f32.xlu1 %v2643_v23 }
 0x98d   : > { %v7215_v21 = vpop.f32.mrb[92].mxu0 }
 0x98e   : > { %v7217_v44 = vpop.f32.mrb[93].mxu0 }
 0x98f   : > { %v2646_v17 = vmax.f32 %v7215_v21, %v7217_v44  ;;  %v7221_v50 = vpop.f32.mrb[94].mxu0 }
 0x990   : > { %v7223_v37 = vpop.f32.mrb[95].mxu0 }
 0x991   : > { %v2649_v3 = vmax.f32 %v7221_v50, %v7223_v37  ;;  %2647 = vmax.xlane.f32.xlu0 %v2646_v17 }
 0x993   : > { %2650 = vmax.xlane.f32.xlu1 %v2649_v3 }
 0x995   : > { %v7227_v36 = vpop.f32.mrb[96].mxu0 }
 0x996   : > { %v7229_v0 = vpop.f32.mrb[97].mxu0 }
 0x997   : > { %v2652_v59 = vmax.f32 %v7227_v36, %v7229_v0  ;;  %v7233_v56 = vpop.f32.mrb[98].mxu0 }
 0x998   : > { %v7235_v45 = vpop.f32.mrb[99].mxu0 }
 0x999   : > { %v2655_v18 = vmax.f32 %v7233_v56, %v7235_v45  ;;  %2653 = vmax.xlane.f32.xlu0 %v2652_v59 }
 0x99b   : > { %2656 = vmax.xlane.f32.xlu1 %v2655_v18 }
 0x99d   : > { %v7239_v5 = vpop.f32.mrb[100].mxu0 }
 0x99e   : > { %v7241_v48 = vpop.f32.mrb[101].mxu0 }
 0x99f   : > { %v2658_v35 = vmax.f32 %v7239_v5, %v7241_v48  ;;  %v7245_v41 = vpop.f32.mrb[102].mxu0 }
 0x9a0   : > { %v7247_v20 = vpop.f32.mrb[103].mxu0 }
 0x9a1   : > { %v2661_v58 = vmax.f32 %v7245_v41, %v7247_v20  ;;  %2659 = vmax.xlane.f32.xlu0 %v2658_v35 }
 0x9a3   : > { %2662 = vmax.xlane.f32.xlu1 %v2661_v58 }
 0x9a5   : > { %v7251_v4 = vpop.f32.mrb[104].mxu0 }
 0x9a6   : > { %v7253_v22 = vpop.f32.mrb[105].mxu0 }
 0x9a7   : > { %v2664_v9 = vmax.f32 %v7251_v4, %v7253_v22  ;;  %v7257_v46 = vpop.f32.mrb[106].mxu0 }
 0x9a8   : > { %v7259_v1 = vpop.f32.mrb[107].mxu0 }
 0x9a9   : > { %v2667_v14 = vmax.f32 %v7257_v46, %v7259_v1  ;;  %2665 = vmax.xlane.f32.xlu0 %v2664_v9 }
 0x9ab   : > { %2668 = vmax.xlane.f32.xlu1 %v2667_v14 }
 0x9ad   : > { %v7263_v38 = vpop.f32.mrb[108].mxu0 }
 0x9ae   : > { %v7265_v53 = vpop.f32.mrb[109].mxu0 }
 0x9af   : > { %v2670_v28 = vmax.f32 %v7263_v38, %v7265_v53  ;;  %v7269_v52 = vpop.f32.mrb[110].mxu0 }
 0x9b0   : > { %v7271_v11 = vpop.f32.mrb[111].mxu0 }
 0x9b1   : > { %8772 = vst [vmem:[#allocation30_spill] sm:$0xff] %v7271_v11  ;;  %v2673_v10 = vmax.f32 %v7269_v52, %v7271_v11  ;;  %2671 = vmax.xlane.f32.xlu0 %v2670_v28 }
 0x9b3   : > { %2674 = vmax.xlane.f32.xlu1 %v2673_v10 }
 0x9b5   : > { %v7275_v39 = vpop.f32.mrb[112].mxu0 }
 0x9b6   : > { %8773 = vst [vmem:[#allocation28_spill] sm:$0xff] %v7275_v39  ;;  %v7277_v55 = vpop.f32.mrb[113].mxu0 }
 0x9b7   : > { %8774 = vst [vmem:[#allocation25_spill] sm:$0xff] %v7277_v55  ;;  %v2676_v42 = vmax.f32 %v7275_v39, %v7277_v55  ;;  %v7281_v54 = vpop.f32.mrb[114].mxu0 }
 0x9b8   : > { %8775 = vst [vmem:[#allocation10_spill] sm:$0xff] %v7281_v54  ;;  %v7283_v47 = vpop.f32.mrb[115].mxu0 }
 0x9b9   : > { %8776 = vst [vmem:[#allocation27_spill] sm:$0xff] %v7283_v47  ;;  %v2679_v61 = vmax.f32 %v7281_v54, %v7283_v47  ;;  %2677 = vmax.xlane.f32.xlu0 %v2676_v42 }
 0x9bb   : > { %2680 = vmax.xlane.f32.xlu1 %v2679_v61 }
 0x9bd   : > { %v7287_v43 = vpop.f32.mrb[116].mxu0 }
 0x9be   : > { %8777 = vst [vmem:[#allocation29_spill] sm:$0xff] %v7287_v43  ;;  %v7289_v32 = vpop.f32.mrb[117].mxu0 }
 0x9bf   : > { %8778 = vst [vmem:[#allocation12_spill] sm:$0xff] %v7289_v32  ;;  %v2682_v13 = vmax.f32 %v7287_v43, %v7289_v32  ;;  %v7293_v16 = vpop.f32.mrb[118].mxu0 }
 0x9c0   : > { %8779 = vst [vmem:[#allocation13_spill] sm:$0xff] %v7293_v16  ;;  %v7295_v23 = vpop.f32.mrb[119].mxu0 }
 0x9c1   : > { %8780 = vst [vmem:[#allocation17_spill] sm:$0xff] %v7295_v23  ;;  %v2685_v17 = vmax.f32 %v7293_v16, %v7295_v23  ;;  %2683 = vmax.xlane.f32.xlu0 %v2682_v13 }
 0x9c3   : > { %2686 = vmax.xlane.f32.xlu1 %v2685_v17 }
 0x9c5   : > { %v7299_v3 = vpop.f32.mrb[120].mxu0 }
 0x9c6   : > { %8781 = vst [vmem:[#allocation36_spill] sm:$0xff] %v7299_v3  ;;  %v7301_v59 = vpop.f32.mrb[121].mxu0 }
 0x9c7   : > { %8782 = vst [vmem:[#allocation16_spill] sm:$0xff] %v7301_v59  ;;  %v2688_v18 = vmax.f32 %v7299_v3, %v7301_v59  ;;  %v7305_v35 = vpop.f32.mrb[122].mxu0 }
 0x9c8   : > { %8783 = vst [vmem:[#allocation11_spill] sm:$0xff] %v7305_v35  ;;  %v7307_v58 = vpop.f32.mrb[123].mxu0 }
 0x9c9   : > { %8784 = vst [vmem:[#allocation38_spill] sm:$0xff] %v7307_v58  ;;  %v2691_v9 = vmax.f32 %v7305_v35, %v7307_v58  ;;  %2689 = vmax.xlane.f32.xlu0 %v2688_v18 }
 0x9cb   : > { %2692 = vmax.xlane.f32.xlu1 %v2691_v9 }
 0x9cd   : > { %v7311_v14 = vpop.f32.mrb[124].mxu0 }
 0x9ce   : > { %v7313_v28 = vpop.f32.mrb[125].mxu0 }
 0x9cf   : > { %v7317_v42 = vpop.f32.mrb[126].mxu0 }
 0x9d0   : > { %v7319_v61 = vpop.f32.mrb[127].mxu0 }
 0x9d5   : > { %v7323_v17 = vpop.f32.mrb[128].mxu0 }
 0x9d6   : > { %v7325_v24 = vpop.f32.mrb[129].mxu0 }
 0x9d7   : > { %v7329_v9 = vpop.f32.mrb[130].mxu0 }
 0x9d8   : > { %v7331_v40 = vpop.f32.mrb[131].mxu0 }
 0x9dd   : > { %v7335_v57 = vpop.f32.mrb[132].mxu0 }
 0x9de   : > { %v7337_v15 = vpop.f32.mrb[133].mxu0 }
 0x9df   : > { %v7341_v51 = vpop.f32.mrb[134].mxu0 }
 0x9e0   : > { %v7343_v2 = vpop.f32.mrb[135].mxu0 }
 0x9e5   : > { %v7347_v31 = vpop.f32.mrb[136].mxu0 }
 0x9e6   : > { %v7349_v58 = vpop.f32.mrb[137].mxu0 }
 0x9e7   : > { %v7353_v35 = vpop.f32.mrb[138].mxu0 }
 0x9e8   : > { %v7355_v59 = vpop.f32.mrb[139].mxu0 }
 0x9fe   : > { %v2624_v3 = vpop.xlane.xlu1 %2623 }
 0x9ff   : > { %v2718_v23 = vsub.f32 %v7167_v30, %v2624_v3  ;;  %v2719_v16 = vsub.f32 %v7169_v7, %v2624_v3 }
 0xa00   : > { %v2627_v18 = vpop.xlane.xlu0 %2626 }
 0xa01   : > { %v2782_v32 = vmul.f32 1.442695, %v2718_v23  ;;  %v2784_v43 = vmul.f32 1.442695, %v2719_v16  ;;  %v2720_v47 = vsub.f32 %v7173_v26, %v2627_v18  ;;  %v2721_v54 = vsub.f32 %v7175_v25, %v2627_v18 }
 0xa03   : > { %5376 = vpow2.f32 %v2782_v32  ;;  %v2786_v10 = vmul.f32 1.442695, %v2720_v47  ;;  %v2788_v55 = vmul.f32 1.442695, %v2721_v54 }
 0xa04   : > { %5378 = vpow2.f32 %v2784_v43 }
 0xa05   : > { %5380 = vpow2.f32 %v2786_v10 }
 0xa06   : > { %5382 = vpow2.f32 %v2788_v55  ;;  %v2630_v39 = vpop.xlane.xlu1 %2629 }
 0xa07   : > { %v2722_v13 = vsub.f32 %v7179_v63, %v2630_v39  ;;  %v2723_v30 = vsub.f32 %v7181_v33, %v2630_v39 }
 0xa09   : > { %v2790_v11 = vmul.f32 1.442695, %v2722_v13  ;;  %v2792_v7 = vmul.f32 1.442695, %v2723_v30 }
 0xa0a   : > { %v2633_v3 = vpop.xlane.xlu1 %2632 }
 0xa0b   : > { %5384 = vpow2.f32 %v2790_v11  ;;  %v2724_v16 = vsub.f32 %v7185_v34, %v2633_v3  ;;  %v2725_v26 = vsub.f32 %v7187_v49, %v2633_v3 }
 0xa0c   : > { %5386 = vpow2.f32 %v2792_v7  ;;  %v8785_v7 = vmax.f32 %v7311_v14, %v7313_v28 }
 0xa0d   : > { %v7367_v25 = vpop.eup %5376  ;;  %v2794_v54 = vmul.f32 1.442695, %v2724_v16  ;;  %v2796_v47 = vmul.f32 1.442695, %v2725_v26 }
 0xa0e   : > { %v7369_v43 = vpop.eup %5378  ;;  %v2636_v55 = vpop.xlane.xlu0 %2635 }
 0xa0f   : > { %v7371_v32 = vpop.eup %5380  ;;  %5388 = vpow2.f32 %v2794_v54  ;;  %v2726_v63 = vsub.f32 %v7191_v62, %v2636_v55  ;;  %v2727_v33 = vsub.f32 %v7193_v27, %v2636_v55  ;;  %v2910_v34 = vadd.f32 %v7369_v43, %v7367_v25 }
 0xa10   : > { %v7377_v11 = vpop.eup %5382  ;;  %5390 = vpow2.f32 %v2796_v47  ;;  %v2639_v49 = vpop.xlane.xlu1 %2638  ;;  %v8786_v54 = vmax.f32 %v7317_v42, %v7319_v61 }
 0xa11   : > { %v2798_v39 = vmul.f32 1.442695, %v2726_v63  ;;  %v2800_v23 = vmul.f32 1.442695, %v2727_v33  ;;  %2911 = vadd.xlane.f32.xlu0 %v2910_v34  ;;  %v2728_v10 = vsub.f32 %v7197_v19, %v2639_v49  ;;  %v2729_v13 = vsub.f32 %v7199_v6, %v2639_v49 }
 0xa12   : > { %v2913_v18 = vadd.f32 %v7377_v11, %v7371_v32 }
 0xa13   : > { %5392 = vpow2.f32 %v2798_v39  ;;  %v2802_v62 = vmul.f32 1.442695, %v2728_v10  ;;  %v2804_v27 = vmul.f32 1.442695, %v2729_v13  ;;  %v8787_v13 = vmax.f32 %v7323_v17, %v7325_v24 }
 0xa14   : > { %5394 = vpow2.f32 %v2800_v23  ;;  %2914 = vadd.xlane.f32.xlu1 %v2913_v18 }
 0xa15   : > { %v7383_v30 = vpop.eup %5384  ;;  %5396 = vpow2.f32 %v2802_v62  ;;  %2695 = vmax.xlane.f32.xlu0 %v8785_v7 }
 0xa16   : > { %v7388_v3 = vpop.eup %5386  ;;  %5398 = vpow2.f32 %v2804_v27  ;;  %v2642_v19 = vpop.xlane.xlu0 %2641 }
 0xa17   : > { %v2730_v6 = vsub.f32 %v7203_v60, %v2642_v19  ;;  %v2731_v16 = vsub.f32 %v7205_v29, %v2642_v19  ;;  %v2916_v26 = vadd.f32 %v7388_v3, %v7383_v30 }
 0xa18   : > { %2698 = vmax.xlane.f32.xlu1 %v8786_v54  ;;  %v2645_v47 = vpop.xlane.xlu1 %2644  ;;  %v8788_v54 = vmax.f32 %v7329_v9, %v7331_v40 }
 0xa19   : > { %v7397_v55 = vpop.eup %5388  ;;  %v2806_v63 = vmul.f32 1.442695, %v2730_v6  ;;  %v2808_v33 = vmul.f32 1.442695, %v2731_v16  ;;  %2917 = vadd.xlane.f32.xlu0 %v2916_v26  ;;  %v2732_v34 = vsub.f32 %v7209_v12, %v2645_v47  ;;  %v2733_v49 = vsub.f32 %v7211_v8, %v2645_v47 }
 0xa1a   : > { %v7401_v60 = vpop.eup %5390 }
 0xa1b   : > { %5400 = vpow2.f32 %v2806_v63  ;;  %v2810_v29 = vmul.f32 1.442695, %v2732_v34  ;;  %v2812_v39 = vmul.f32 1.442695, %v2733_v49  ;;  %v2919_v23 = vadd.f32 %v7401_v60, %v7397_v55 }
 0xa1c   : > { %5402 = vpow2.f32 %v2808_v33  ;;  %v8789_v49 = vmax.f32 %v7335_v57, %v7337_v15 }
 0xa1d   : > { %v7405_v10 = vpop.eup %5392  ;;  %5404 = vpow2.f32 %v2810_v29  ;;  %2701 = vmax.xlane.f32.xlu0 %v8787_v13  ;;  %2920 = vadd.xlane.f32.xlu1 %v2919_v23 }
 0xa1e   : > { %v7410_v12 = vpop.eup %5394  ;;  %5406 = vpow2.f32 %v2812_v39  ;;  %v2648_v8 = vpop.xlane.xlu0 %2647 }
 0xa1f   : > { %v7412_v18 = vpop.eup %5396  ;;  %v2734_v62 = vsub.f32 %v7215_v21, %v2648_v8  ;;  %v2735_v27 = vsub.f32 %v7217_v44, %v2648_v8  ;;  %v2922_v7 = vadd.f32 %v7410_v12, %v7405_v10 }
 0xa20   : > { %v7418_v19 = vpop.eup %5398  ;;  %v2651_v6 = vpop.xlane.xlu1 %2650 }
 0xa21   : > { %v2814_v16 = vmul.f32 1.442695, %v2734_v62  ;;  %v2816_v26 = vmul.f32 1.442695, %v2735_v27  ;;  %2923 = vadd.xlane.f32.xlu0 %v2922_v7  ;;  %2704 = vmax.xlane.f32.xlu1 %v8788_v54  ;;  %v2736_v47 = vsub.f32 %v7221_v50, %v2651_v6  ;;  %v2737_v63 = vsub.f32 %v7223_v37, %v2651_v6 }
 0xa22   : > { %v2925_v33 = vadd.f32 %v7418_v19, %v7412_v18  ;;  %v8790_v6 = vmax.f32 %v7341_v51, %v7343_v2 }
 0xa23   : > { %5408 = vpow2.f32 %v2814_v16  ;;  %v2818_v21 = vmul.f32 1.442695, %v2736_v47  ;;  %v2820_v44 = vmul.f32 1.442695, %v2737_v63  ;;  %v8791_v63 = vmax.f32 %v7347_v31, %v7349_v58 }
 0xa24   : > { %5410 = vpow2.f32 %v2816_v26 }
 0xa25   : > { %v7427_v34 = vpop.eup %5400  ;;  %5412 = vpow2.f32 %v2818_v21  ;;  %2707 = vmax.xlane.f32.xlu0 %v8789_v49  ;;  %2926 = vadd.xlane.f32.xlu1 %v2925_v33 }
 0xa26   : > { %v7432_v29 = vpop.eup %5402  ;;  %5414 = vpow2.f32 %v2820_v44  ;;  %v2654_v50 = vpop.xlane.xlu0 %2653 }
 0xa27   : > { %v7434_v37 = vpop.eup %5404  ;;  %v2738_v39 = vsub.f32 %v7227_v36, %v2654_v50  ;;  %v2739_v23 = vsub.f32 %v7229_v0, %v2654_v50  ;;  %v2928_v13 = vadd.f32 %v7432_v29, %v7427_v34 }
 0xa28   : > { %v7440_v8 = vpop.eup %5406  ;;  %v2657_v62 = vpop.xlane.xlu1 %2656 }
 0xa29   : > { %v2822_v27 = vmul.f32 1.442695, %v2738_v39  ;;  %v2824_v7 = vmul.f32 1.442695, %v2739_v23  ;;  %2929 = vadd.xlane.f32.xlu0 %v2928_v13  ;;  %2710 = vmax.xlane.f32.xlu1 %v8790_v6  ;;  %v2740_v16 = vsub.f32 %v7233_v56, %v2657_v62  ;;  %v2741_v26 = vsub.f32 %v7235_v45, %v2657_v62 }
 0xa2a   : > { %v2931_v54 = vadd.f32 %v7440_v8, %v7434_v37  ;;  %v8792_v62 = vmax.f32 %v7353_v35, %v7355_v59 }
 0xa2b   : > { %5416 = vpow2.f32 %v2822_v27  ;;  %v2826_v36 = vmul.f32 1.442695, %v2740_v16  ;;  %v2828_v0 = vmul.f32 1.442695, %v2741_v26 }
 0xa2c   : > { %5418 = vpow2.f32 %v2824_v7 }
 0xa2d   : > { %v7449_v47 = vpop.eup %5408  ;;  %5420 = vpow2.f32 %v2826_v36  ;;  %2713 = vmax.xlane.f32.xlu0 %v8791_v63  ;;  %2932 = vadd.xlane.f32.xlu1 %v2931_v54 }
 0xa2e   : > { %v7454_v21 = vpop.eup %5410  ;;  %5422 = vpow2.f32 %v2828_v0  ;;  %v2660_v56 = vpop.xlane.xlu0 %2659 }
 0xa2f   : > { %v7456_v45 = vpop.eup %5412  ;;  %v2742_v44 = vsub.f32 %v7239_v5, %v2660_v56  ;;  %v2743_v33 = vsub.f32 %v7241_v48, %v2660_v56  ;;  %v2934_v49 = vadd.f32 %v7454_v21, %v7449_v47 }
 0xa30   : > { %v7462_v50 = vpop.eup %5414  ;;  %v2663_v39 = vpop.xlane.xlu1 %2662 }
 0xa31   : > { %v2830_v23 = vmul.f32 1.442695, %v2742_v44  ;;  %v2832_v13 = vmul.f32 1.442695, %v2743_v33  ;;  %2935 = vadd.xlane.f32.xlu0 %v2934_v49  ;;  %2716 = vmax.xlane.f32.xlu1 %v8792_v62  ;;  %v2744_v27 = vsub.f32 %v7245_v41, %v2663_v39  ;;  %v2745_v7 = vsub.f32 %v7247_v20, %v2663_v39 }
 0xa32   : > { %v2937_v6 = vadd.f32 %v7462_v50, %v7456_v45 }
 0xa33   : > { %5424 = vpow2.f32 %v2830_v23  ;;  %v2834_v5 = vmul.f32 1.442695, %v2744_v27  ;;  %v2836_v48 = vmul.f32 1.442695, %v2745_v7 }
 0xa34   : > { %5426 = vpow2.f32 %v2832_v13 }
 0xa35   : > { %v7471_v16 = vpop.eup %5416  ;;  %5428 = vpow2.f32 %v2834_v5  ;;  %2938 = vadd.xlane.f32.xlu1 %v2937_v6 }
 0xa36   : > { %v7473_v26 = vpop.eup %5418  ;;  %5430 = vpow2.f32 %v2836_v48  ;;  %v2666_v36 = vpop.xlane.xlu0 %2665 }
 0xa37   : > { %v7475_v0 = vpop.eup %5420  ;;  %v2746_v41 = vsub.f32 %v7251_v4, %v2666_v36  ;;  %v2747_v20 = vsub.f32 %v7253_v22, %v2666_v36  ;;  %v2940_v54 = vadd.f32 %v7473_v26, %v7471_v16 }
 0xa38   : > { %v7481_v63 = vpop.eup %5422  ;;  %v2669_v56 = vpop.xlane.xlu1 %2668 }
 0xa39   : > { %v2838_v44 = vmul.f32 1.442695, %v2746_v41  ;;  %v2840_v33 = vmul.f32 1.442695, %v2747_v20  ;;  %2941 = vadd.xlane.f32.xlu0 %v2940_v54  ;;  %v2748_v49 = vsub.f32 %v7257_v46, %v2669_v56  ;;  %v2749_v39 = vsub.f32 %v7259_v1, %v2669_v56  ;;  %v8793_v54 = vld [vmem:[#allocation30_spill] sm:$0xff] }
 0xa3a   : > { %v2943_v23 = vadd.f32 %v7481_v63, %v7475_v0 }
 0xa3b   : > { %5432 = vpow2.f32 %v2838_v44  ;;  %v2842_v4 = vmul.f32 1.442695, %v2748_v49  ;;  %v2844_v13 = vmul.f32 1.442695, %v2749_v39 }
 0xa3c   : > { %5434 = vpow2.f32 %v2840_v33  ;;  %2944 = vadd.xlane.f32.xlu1 %v2943_v23 }
 0xa3d   : > { %v7487_v22 = vpop.eup %5424  ;;  %5436 = vpow2.f32 %v2842_v4 }
 0xa3e   : > { %v7489_v62 = vpop.eup %5426  ;;  %5438 = vpow2.f32 %v2844_v13  ;;  %v2672_v27 = vpop.xlane.xlu0 %2671  ;;  %v8797_v13 = vld [vmem:[#allocation25_spill] sm:$0xff] }
 0xa3f   : > { %v7491_v7 = vpop.eup %5428  ;;  %v2750_v46 = vsub.f32 %v7263_v38, %v2672_v27  ;;  %v2751_v1 = vsub.f32 %v7265_v53, %v2672_v27  ;;  %v2946_v5 = vadd.f32 %v7489_v62, %v7487_v22 }
 0xa40   : > { %v7497_v48 = vpop.eup %5430  ;;  %v2675_v6 = vpop.xlane.xlu1 %2674 }
 0xa41   : > { %v2846_v36 = vmul.f32 1.442695, %v2750_v46  ;;  %v2848_v41 = vmul.f32 1.442695, %v2751_v1  ;;  %2947 = vadd.xlane.f32.xlu0 %v2946_v5  ;;  %v2752_v20 = vsub.f32 %v7269_v52, %v2675_v6  ;;  %v2753_v56 = vsub.f32 %v8793_v54, %v2675_v6  ;;  %v8796_v52 = vld [vmem:[#allocation28_spill] sm:$0xff]  ;;  %v8800_v54 = vld [vmem:[#allocation27_spill] sm:$0xff] }
 0xa42   : > { %v2949_v44 = vadd.f32 %v7497_v48, %v7491_v7 }
 0xa43   : > { %5440 = vpow2.f32 %v2846_v36  ;;  %v2850_v38 = vmul.f32 1.442695, %v2752_v20  ;;  %v2852_v33 = vmul.f32 1.442695, %v2753_v56 }
 0xa44   : > { %5442 = vpow2.f32 %v2848_v41  ;;  %2950 = vadd.xlane.f32.xlu1 %v2949_v44  ;;  %v8799_v41 = vld [vmem:[#allocation10_spill] sm:$0xff] }
 0xa45   : > { %v7503_v53 = vpop.eup %5432  ;;  %5444 = vpow2.f32 %v2850_v38 }
 0xa46   : > { %8794 = vst [vmem:[#allocation37_spill] sm:$0xff] %v7503_v53  ;;  %v7505_v49 = vpop.eup %5434  ;;  %5446 = vpow2.f32 %v2852_v33  ;;  %v2678_v39 = vpop.xlane.xlu0 %2677 }
 0xa47   : > { %v7507_v23 = vpop.eup %5436  ;;  %v2754_v4 = vsub.f32 %v8796_v52, %v2678_v39  ;;  %v2755_v27 = vsub.f32 %v8797_v13, %v2678_v39  ;;  %v2952_v46 = vadd.f32 %v7505_v49, %v7503_v53  ;;  %v8808_v53 = vld [vmem:[#allocation17_spill] sm:$0xff] }
 0xa48   : > { %8795 = vst [vmem:[#allocation31_spill] sm:$0xff] %v7507_v23  ;;  %v7513_v1 = vpop.eup %5438  ;;  %v2681_v5 = vpop.xlane.xlu1 %2680 }
 0xa49   : > { %8798 = vst [vmem:[#allocation33_spill] sm:$0xff] %v7513_v1  ;;  %v2854_v6 = vmul.f32 1.442695, %v2754_v4  ;;  %v2856_v36 = vmul.f32 1.442695, %v2755_v27  ;;  %2953 = vadd.xlane.f32.xlu0 %v2952_v46  ;;  %v2756_v20 = vsub.f32 %v8799_v41, %v2681_v5  ;;  %v2757_v56 = vsub.f32 %v8800_v54, %v2681_v5  ;;  %v8804_v27 = vld [vmem:[#allocation29_spill] sm:$0xff] }
 0xa4a   : > { %v2955_v44 = vadd.f32 %v7513_v1, %v7507_v23  ;;  %v8805_v5 = vld [vmem:[#allocation12_spill] sm:$0xff] }
 0xa4b   : > { %5448 = vpow2.f32 %v2854_v6  ;;  %v2858_v38 = vmul.f32 1.442695, %v2756_v20  ;;  %v2860_v33 = vmul.f32 1.442695, %v2757_v56 }
 0xa4c   : > { %5450 = vpow2.f32 %v2856_v36  ;;  %2956 = vadd.xlane.f32.xlu1 %v2955_v44  ;;  %v8807_v44 = vld [vmem:[#allocation13_spill] sm:$0xff] }
 0xa4d   : > { %v7519_v39 = vpop.eup %5440  ;;  %5452 = vpow2.f32 %v2858_v38 }
 0xa4e   : > { %8801 = vst [vmem:[#allocation32_spill] sm:$0xff] %v7519_v39  ;;  %v7521_v52 = vpop.eup %5442  ;;  %5454 = vpow2.f32 %v2860_v33  ;;  %v2684_v4 = vpop.xlane.xlu0 %2683 }
 0xa4f   : > { %8802 = vst [vmem:[#allocation19_spill] sm:$0xff] %v7521_v52  ;;  %v7523_v13 = vpop.eup %5444  ;;  %v2758_v46 = vsub.f32 %v8804_v27, %v2684_v4  ;;  %v2759_v41 = vsub.f32 %v8805_v5, %v2684_v4  ;;  %v2958_v6 = vadd.f32 %v7521_v52, %v7519_v39 }
 0xa50   : > { %8803 = vst [vmem:[#allocation30_spill] sm:$0xff] %v7523_v13  ;;  %v7529_v20 = vpop.eup %5446  ;;  %v2687_v36 = vpop.xlane.xlu1 %2686 }
 0xa51   : > { %8806 = vst [vmem:[#allocation28_spill] sm:$0xff] %v7529_v20  ;;  %v2862_v54 = vmul.f32 1.442695, %v2758_v46  ;;  %v2864_v56 = vmul.f32 1.442695, %v2759_v41  ;;  %2959 = vadd.xlane.f32.xlu0 %v2958_v6  ;;  %v2760_v38 = vsub.f32 %v8807_v44, %v2687_v36  ;;  %v2761_v33 = vsub.f32 %v8808_v53, %v2687_v36  ;;  %v8809_v6 = vld [vmem:[#allocation36_spill] sm:$0xff] }
 0xa52   : > { %v2961_v23 = vadd.f32 %v7529_v20, %v7523_v13  ;;  %v8810_v53 = vld [vmem:[#allocation16_spill] sm:$0xff]  ;;  %v8812_v13 = vld [vmem:[#allocation38_spill] sm:$0xff] }
 0xa53   : > { %5456 = vpow2.f32 %v2862_v54  ;;  %v2866_v27 = vmul.f32 1.442695, %v2760_v38  ;;  %v2868_v1 = vmul.f32 1.442695, %v2761_v33 }
 0xa54   : > { %5458 = vpow2.f32 %v2864_v56  ;;  %2962 = vadd.xlane.f32.xlu1 %v2961_v23 }
 0xa55   : > { %v7535_v4 = vpop.eup %5448  ;;  %5460 = vpow2.f32 %v2866_v27  ;;  %v8811_v27 = vld [vmem:[#allocation11_spill] sm:$0xff] }
 0xa56   : > { %v7537_v5 = vpop.eup %5450  ;;  %5462 = vpow2.f32 %v2868_v1  ;;  %v2690_v46 = vpop.xlane.xlu0 %2689 }
 0xa57   : > { %v7539_v41 = vpop.eup %5452  ;;  %v2762_v44 = vsub.f32 %v8809_v6, %v2690_v46  ;;  %v2763_v36 = vsub.f32 %v8810_v53, %v2690_v46  ;;  %v2964_v54 = vadd.f32 %v7537_v5, %v7535_v4 }
 0xa58   : > { %v7545_v38 = vpop.eup %5454  ;;  %v2693_v56 = vpop.xlane.xlu1 %2692 }
 0xa59   : > { %v2870_v23 = vmul.f32 1.442695, %v2762_v44  ;;  %v2872_v33 = vmul.f32 1.442695, %v2763_v36  ;;  %2965 = vadd.xlane.f32.xlu0 %v2964_v54  ;;  %v2764_v39 = vsub.f32 %v8811_v27, %v2693_v56  ;;  %v2765_v1 = vsub.f32 %v8812_v13, %v2693_v56 }
 0xa5a   : > { %v2967_v20 = vadd.f32 %v7545_v38, %v7539_v41 }
 0xa5b   : > { %5464 = vpow2.f32 %v2870_v23  ;;  %v2874_v6 = vmul.f32 1.442695, %v2764_v39  ;;  %v2876_v52 = vmul.f32 1.442695, %v2765_v1 }
 0xa5c   : > { %5466 = vpow2.f32 %v2872_v33  ;;  %2968 = vadd.xlane.f32.xlu1 %v2967_v20 }
 0xa5d   : > { %v7551_v46 = vpop.eup %5456  ;;  %5468 = vpow2.f32 %v2874_v6 }
 0xa5e   : > { %8813 = vst [vmem:[#allocation25_spill] sm:$0xff] %v7551_v46  ;;  %v7553_v53 = vpop.eup %5458  ;;  %5470 = vpow2.f32 %v2876_v52 }
 0xa5f   : > { %v7555_v44 = vpop.eup %5460  ;;  %v2970_v36 = vadd.f32 %v7553_v53, %v7551_v46 }
 0xa60   : > { %8814 = vst [vmem:[#allocation10_spill] sm:$0xff] %v7555_v44  ;;  %v7559_v13 = vpop.eup %5462 }
 0xa61   : > { %8815 = vst [vmem:[#allocation27_spill] sm:$0xff] %v7559_v13  ;;  %2971 = vadd.xlane.f32.xlu0 %v2970_v36  ;;  %v2973_v39 = vadd.f32 %v7559_v13, %v7555_v44 }
 0xa63   : > { %2974 = vadd.xlane.f32.xlu1 %v2973_v39 }
 0xa65   : > { %v7563_v54 = vpop.eup %5464 }
 0xa66   : > { %8816 = vst [vmem:[#allocation29_spill] sm:$0xff] %v7563_v54  ;;  %v7565_v20 = vpop.eup %5466 }
 0xa67   : > { %8817 = vst [vmem:[#allocation12_spill] sm:$0xff] %v7565_v20  ;;  %v7567_v56 = vpop.eup %5468  ;;  %v2976_v52 = vadd.f32 %v7565_v20, %v7563_v54 }
 0xa68   : > { %8818 = vst [vmem:[#allocation13_spill] sm:$0xff] %v7567_v56  ;;  %v7571_v23 = vpop.eup %5470 }
 0xa69   : > { %8819 = vst [vmem:[#allocation17_spill] sm:$0xff] %v7571_v23  ;;  %2977 = vadd.xlane.f32.xlu0 %v2976_v52  ;;  %v2979_v33 = vadd.f32 %v7571_v23, %v7567_v56 }
 0xa6b   : > { %2980 = vadd.xlane.f32.xlu1 %v2979_v33 }
 0xa9e   : > { %v2912_v27 = vpop.xlane.xlu0 %2911 }
 0xa9f   : > { %5472 = vrcp.f32 %v2912_v27 }
 0xaa1   : > { %v2915_v1 = vpop.xlane.xlu1 %2914 }
 0xaa2   : > { %5474 = vrcp.f32 %v2915_v1  ;;  %v2696_v6 = vpop.xlane.xlu0 %2695 }
 0xaa3   : > { %v2766_v36 = vsub.f32 %v7311_v14, %v2696_v6  ;;  %v2767_v39 = vsub.f32 %v7313_v28, %v2696_v6 }
 0xaa5   : > { %v2878_v46 = vmul.f32 1.442695, %v2766_v36  ;;  %v2880_v44 = vmul.f32 1.442695, %v2767_v39  ;;  %v2699_v13 = vpop.xlane.xlu1 %2698 }
 0xaa6   : > { %v2768_v54 = vsub.f32 %v7317_v42, %v2699_v13  ;;  %v2769_v52 = vsub.f32 %v7319_v61, %v2699_v13  ;;  %v2918_v20 = vpop.xlane.xlu0 %2917 }
 0xaa7   : > { %5476 = vpow2.f32 %v2878_v46 }
 0xaa8   : > { %5478 = vpow2.f32 %v2880_v44  ;;  %v2882_v33 = vmul.f32 1.442695, %v2768_v54  ;;  %v2884_v56 = vmul.f32 1.442695, %v2769_v52 }
 0xaa9   : > { %v5473_v27 = vpop.eup %5472  ;;  %5480 = vrcp.f32 %v2918_v20 }
 0xaaa   : > { %5482 = vpow2.f32 %v2882_v33  ;;  %v2702_v1 = vpop.xlane.xlu0 %2701  ;;  %v2921_v23 = vpop.xlane.xlu1 %2920  ;;  %v3039_v42 = vmul.f32 %v5473_v27, %v7369_v43  ;;  %v3038_v36 = vmul.f32 %v5473_v27, %v7367_v25 }
 0xaab   : > { %5484 = vpow2.f32 %v2884_v56  ;;  %v2770_v14 = vsub.f32 %v7323_v17, %v2702_v1  ;;  %v2771_v28 = vsub.f32 %v7325_v24, %v2702_v1 }
 0xaac   : > { %v5475_v6 = vpop.eup %5474  ;;  %5486 = vrcp.f32 %v2921_v23 }
 0xaad   : > { %v2886_v61 = vmul.f32 1.442695, %v2770_v14  ;;  %v2888_v13 = vmul.f32 1.442695, %v2771_v28  ;;  %v3041_v46 = vmul.f32 %v5475_v6, %v7377_v11  ;;  %v3040_v44 = vmul.f32 %v5475_v6, %v7371_v32 }
 0xaae   : > { %v2924_v54 = vpop.xlane.xlu0 %2923  ;;  %v2705_v20 = vpop.xlane.xlu1 %2704 }
 0xaaf   : > { %5488 = vpow2.f32 %v2886_v61  ;;  %v2772_v56 = vsub.f32 %v7329_v9, %v2705_v20  ;;  %v2773_v17 = vsub.f32 %v7331_v40, %v2705_v20  ;;  %v3105_v24 = vpack.c.bf16 %v3041_v46, %v3039_v42 }
 0xab0   : > { %5490 = vpow2.f32 %v2888_v13  ;;  %v3104_v23 = vpack.c.bf16 %v3040_v44, %v3038_v36 }
 0xab1   : > { %v7587_v39 = vpop.eup %5476  ;;  %5492 = vrcp.f32 %v2924_v54  ;;  %v2890_v43 = vmul.f32 1.442695, %v2772_v56  ;;  %v2892_v52 = vmul.f32 1.442695, %v2773_v17  ;;  %3136 = vmatprep.subr.bf16.mxu1 %v3105_v24 }
 0xab2   : > { %v7589_v11 = vpop.eup %5478  ;;  %3137 = vmatpush1.bf16.xpose.msra.mxu1 %v3104_v23  ;;  %v2708_v32 = vpop.xlane.xlu0 %2707 }
 0xab3   : > { %v2927_v33 = vpop.xlane.xlu1 %2926  ;;  %v5481_v25 = vpop.eup %5480  ;;  %5494 = vpow2.f32 %v2890_v43  ;;  %v2774_v9 = vsub.f32 %v7335_v57, %v2708_v32  ;;  %v2775_v40 = vsub.f32 %v7337_v15, %v2708_v32  ;;  %v2982_v27 = vadd.f32 %v7589_v11, %v7587_v39 }
 0xab4   : > { %v7595_v1 = vpop.eup %5482  ;;  %5496 = vpow2.f32 %v2892_v52  ;;  %v3043_v15 = vmul.f32 %v5481_v25, %v7388_v3  ;;  %v3042_v20 = vmul.f32 %v5481_v25, %v7383_v30 }
 0xab5   : > { %v7597_v14 = vpop.eup %5484  ;;  %v2894_v28 = vmul.f32 1.442695, %v2774_v9  ;;  %v2896_v6 = vmul.f32 1.442695, %v2775_v40  ;;  %5498 = vrcp.f32 %v2927_v33  ;;  %2983 = vadd.xlane.f32.xlu0 %v2982_v27 }
 0xab6   : > { %v5487_v42 = vpop.eup %5486  ;;  %v2930_v61 = vpop.xlane.xlu0 %2929  ;;  %v2985_v13 = vadd.f32 %v7597_v14, %v7595_v1 }
 0xab7   : > { %v2711_v57 = vpop.xlane.xlu1 %2710  ;;  %5500 = vpow2.f32 %v2894_v28  ;;  %v3045_v54 = vmul.f32 %v5487_v42, %v7401_v60  ;;  %v3044_v36 = vmul.f32 %v5487_v42, %v7397_v55 }
 0xab8   : > { %v2776_v46 = vsub.f32 %v7341_v51, %v2711_v57  ;;  %v2777_v44 = vsub.f32 %v7343_v2, %v2711_v57  ;;  %5502 = vpow2.f32 %v2896_v6  ;;  %2986 = vadd.xlane.f32.xlu1 %v2985_v13 }
 0xab9   : > { %v7607_v56 = vpop.eup %5488  ;;  %v3107_v23 = vpack.c.bf16 %v3045_v54, %v3043_v15  ;;  %5504 = vrcp.f32 %v2930_v61  ;;  %v3106_v52 = vpack.c.bf16 %v3044_v36, %v3042_v20 }
 0xaba   : > { %v2898_v17 = vmul.f32 1.442695, %v2776_v46  ;;  %v2900_v24 = vmul.f32 1.442695, %v2777_v44  ;;  %v7609_v43 = vpop.eup %5490  ;;  %v2714_v3 = vpop.xlane.xlu0 %2713 }
 0xabb   : > { %v2933_v51 = vpop.xlane.xlu1 %2932  ;;  %v5493_v2 = vpop.eup %5492  ;;  %v2778_v60 = vsub.f32 %v7347_v31, %v2714_v3  ;;  %v2779_v32 = vsub.f32 %v7349_v58, %v2714_v3  ;;  %3138 = vmatprep.subr.bf16.mxu1 %v3107_v23  ;;  %v2988_v30 = vadd.f32 %v7609_v43, %v7607_v56 }
 0xabc   : > { %5506 = vpow2.f32 %v2898_v17  ;;  %3139 = vmatpush1.bf16.xpose.msra.mxu1 %v3106_v52  ;;  %v3047_v27 = vmul.f32 %v5493_v2, %v7410_v12  ;;  %v3046_v13 = vmul.f32 %v5493_v2, %v7405_v10 }
 0xabd   : > { %5508 = vpow2.f32 %v2900_v24  ;;  %v7615_v55 = vpop.eup %5494  ;;  %v2902_v33 = vmul.f32 1.442695, %v2778_v60  ;;  %v2904_v25 = vmul.f32 1.442695, %v2779_v32  ;;  %2989 = vadd.xlane.f32.xlu0 %v2988_v30 }
 0xabe   : > { %5510 = vrcp.f32 %v2933_v51  ;;  %v7617_v9 = vpop.eup %5496  ;;  %v2936_v58 = vpop.xlane.xlu0 %2935 }
 0xabf   : > { %v2717_v40 = vpop.xlane.xlu1 %2716  ;;  %v5499_v31 = vpop.eup %5498  ;;  %5512 = vpow2.f32 %v2902_v33  ;;  %v2991_v42 = vadd.f32 %v7617_v9, %v7615_v55 }
 0xac0   : > { %v2780_v28 = vsub.f32 %v7353_v35, %v2717_v40  ;;  %v2781_v6 = vsub.f32 %v7355_v59, %v2717_v40  ;;  %5514 = vpow2.f32 %v2904_v25  ;;  %v3049_v61 = vmul.f32 %v5499_v31, %v7418_v19 }
 0xac1   : > { %v3048_v57 = vmul.f32 %v5499_v31, %v7412_v18  ;;  %v7627_v15 = vpop.eup %5500  ;;  %2992 = vadd.xlane.f32.xlu1 %v2991_v42  ;;  %5516 = vrcp.f32 %v2936_v58 }
 0xac2   : > { %v2906_v12 = vmul.f32 1.442695, %v2780_v28  ;;  %v2908_v46 = vmul.f32 1.442695, %v2781_v6  ;;  %v7629_v44 = vpop.eup %5502  ;;  %v3109_v35 = vpack.c.bf16 %v3049_v61, %v3047_v27 }
 0xac3   : > { %v2939_v59 = vpop.xlane.xlu1 %2938  ;;  %v3108_v54 = vpack.c.bf16 %v3048_v57, %v3046_v13  ;;  %v2994_v20 = vadd.f32 %v7629_v44, %v7627_v15  ;;  %v5505_v19 = vpop.eup %5504 }
 0xac4   : > { %5518 = vpow2.f32 %v2906_v12  ;;  %3140 = vmatprep.subr.bf16.mxu1 %v3109_v35  ;;  %v3051_v23 = vmul.f32 %v5505_v19, %v7432_v29  ;;  %v3050_v51 = vmul.f32 %v5505_v19, %v7427_v34 }
 0xac5   : > { %5520 = vpow2.f32 %v2908_v46  ;;  %3141 = vmatpush1.bf16.xpose.msra.mxu1 %v3108_v54  ;;  %2995 = vadd.xlane.f32.xlu0 %v2994_v20  ;;  %v5770_v20 = vld [vmem:[%s8476_s2 + $0x18] sm:$0xff] }
 0xac6   : > { %v7633_v10 = vpop.eup %5506  ;;  %5522 = vrcp.f32 %v2939_v59  ;;  %v2942_v36 = vpop.xlane.xlu0 %2941 }
 0xac7   : > { %v7635_v18 = vpop.eup %5508  ;;  %5524 = vrcp.f32 %v2942_v36 }
 0xac8   : > { %v5511_v17 = vpop.eup %5510  ;;  %v2997_v24 = vadd.f32 %v7635_v18, %v7633_v10 }
 0xac9   : > { %v3053_v3 = vmul.f32 %v5511_v17, %v7440_v8  ;;  %v3052_v52 = vmul.f32 %v5511_v17, %v7434_v37  ;;  %v7643_v2 = vpop.eup %5512  ;;  %v2945_v60 = vpop.xlane.xlu1 %2944 }
 0xaca   : > { %2998 = vadd.xlane.f32.xlu1 %v2997_v24  ;;  %v7645_v32 = vpop.eup %5514  ;;  %5526 = vrcp.f32 %v2945_v60  ;;  %v219_v24 = vld [vmem:[%s8476_s2 + $0x50] sm:$0xff] }
 0xacb   : > { %v3111_v30 = vpack.c.bf16 %v3053_v3, %v3051_v23  ;;  %v3110_v33 = vpack.c.bf16 %v3052_v52, %v3050_v51  ;;  %v3000_v25 = vadd.f32 %v7645_v32, %v7643_v2  ;;  %v5517_v29 = vpop.eup %5516 }
 0xacc   : > { %v3055_v31 = vmul.f32 %v5517_v29, %v7454_v21  ;;  %v3054_v28 = vmul.f32 %v5517_v29, %v7449_v47 }
 0xacd   : > { %3142 = vmatprep.subr.bf16.mxu1 %v3111_v30  ;;  %v8820_v30 = vld [vmem:[#allocation33_spill] sm:$0xff] }
 0xace   : > { %v7649_v40 = vpop.eup %5518  ;;  %3143 = vmatpush1.bf16.xpose.msra.mxu1 %v3110_v33  ;;  %3001 = vadd.xlane.f32.xlu1 %v3000_v25  ;;  %v2948_v37 = vpop.xlane.xlu0 %2947 }
 0xacf   : > { %v7651_v34 = vpop.eup %5520  ;;  %5528 = vrcp.f32 %v2948_v37  ;;  %v8821_v37 = vld [vmem:[#allocation31_spill] sm:$0xff] }
 0xad0   : > { %v5523_v8 = vpop.eup %5522  ;;  %v3003_v27 = vadd.f32 %v7651_v34, %v7649_v40 }
 0xad1   : > { %v3057_v58 = vmul.f32 %v5523_v8, %v7462_v50  ;;  %v3056_v6 = vmul.f32 %v5523_v8, %v7456_v45  ;;  %v2951_v42 = vpop.xlane.xlu1 %2950  ;;  %v5525_v61 = vpop.eup %5524 }
 0xad2   : > { %3004 = vadd.xlane.f32.xlu1 %v3003_v27  ;;  %5530 = vrcp.f32 %v2951_v42  ;;  %v3059_v46 = vmul.f32 %v5525_v61, %v7473_v26  ;;  %v3058_v45 = vmul.f32 %v5525_v61, %v7471_v16  ;;  %v8822_v27 = vld [vmem:[#allocation37_spill] sm:$0xff]  ;;  %v8824_v61 = vld [vmem:[#allocation28_spill] sm:$0xff] }
 0xad3   : > { %v3113_v13 = vpack.c.bf16 %v3057_v58, %v3055_v31  ;;  %v3112_v57 = vpack.c.bf16 %v3056_v6, %v3054_v28  ;;  %v8823_v6 = vld [vmem:[#allocation19_spill] sm:$0xff] }
 0xad4   : > { %v5527_v12 = vpop.eup %5526 }
 0xad5   : > { %3144 = vmatprep.subr.bf16.mxu1 %v3113_v13  ;;  %v3061_v21 = vmul.f32 %v5527_v12, %v7481_v63  ;;  %v3060_v50 = vmul.f32 %v5527_v12, %v7475_v0  ;;  %v216_v63 = vld [vmem:[%s8476_s2 + $0x38] sm:$0xff]  ;;  %v8825_v12 = vld [vmem:[#allocation30_spill] sm:$0xff] }
 0xad6   : > { %3145 = vmatpush1.bf16.xpose.msra.mxu1 %v3112_v57  ;;  %v2954_v35 = vpop.xlane.xlu0 %2953 }
 0xad7   : > { %v3115_v59 = vpack.c.bf16 %v3061_v21, %v3059_v46  ;;  %5532 = vrcp.f32 %v2954_v35  ;;  %v3114_v19 = vpack.c.bf16 %v3060_v50, %v3058_v45  ;;  %v8826_v35 = vld [vmem:[#allocation32_spill] sm:$0xff] }
 0xad9   : > { %3146 = vmatprep.subr.bf16.mxu1 %v3115_v59  ;;  %v2957_v47 = vpop.xlane.xlu1 %2956  ;;  %v5529_v54 = vpop.eup %5528 }
 0xada   : > { %5534 = vrcp.f32 %v2957_v47  ;;  %v3063_v0 = vmul.f32 %v5529_v54, %v7489_v62  ;;  %v3062_v51 = vmul.f32 %v5529_v54, %v7487_v22 }
 0xadb   : > { %340 = vperm.xlu0 %4951, %v5770_v20  }
 0xadc   : > { %v5531_v26 = vpop.eup %5530 }
 0xadd   : > { %v3065_v36 = vmul.f32 %v5531_v26, %v7497_v48  ;;  %v3064_v23 = vmul.f32 %v5531_v26, %v7491_v7 }
 0xade   : > { %3147 = vmatpush1.bf16.xpose.msra.mxu1 %v3114_v19  ;;  %v2960_v17 = vpop.xlane.xlu0 %2959 }
 0xadf   : > { %360 = vperm.xlu0 %4951, %v216_v63   ;;  %v3117_v16 = vpack.c.bf16 %v3065_v36, %v3063_v0  ;;  %5536 = vrcp.f32 %v2960_v17  ;;  %v3116_v62 = vpack.c.bf16 %v3064_v23, %v3062_v51 }
 0xae1   : > { %3148 = vmatprep.subr.bf16.mxu1 %v3117_v16  ;;  %v2963_v3 = vpop.xlane.xlu1 %2962  ;;  %v5533_v52 = vpop.eup %5532 }
 0xae2   : > { %5538 = vrcp.f32 %v2963_v3  ;;  %v3067_v48 = vmul.f32 %v5533_v52, %v7505_v49  ;;  %v3066_v31 = vmul.f32 %v5533_v52, %v8822_v27  ;;  %v8827_v3 = vld [vmem:[#allocation27_spill] sm:$0xff] }
 0xae3   : > { %375 = vperm.xlu1 %4952, %v219_v24  }
 0xae4   : > { %v5535_v60 = vpop.eup %5534 }
 0xae5   : > { %v3069_v33 = vmul.f32 %v5535_v60, %v8820_v30  ;;  %v3068_v8 = vmul.f32 %v5535_v60, %v8821_v37  ;;  %v8829_v60 = vld [vmem:[#allocation25_spill] sm:$0xff] }
 0xae6   : > { %3149 = vmatpush1.bf16.xpose.msra.mxu1 %v3116_v62  ;;  %v2966_v25 = vpop.xlane.xlu0 %2965 }
 0xae7   : > { %v3119_v29 = vpack.c.bf16 %v3069_v33, %v3067_v48  ;;  %5540 = vrcp.f32 %v2966_v25  ;;  %v3118_v58 = vpack.c.bf16 %v3068_v8, %v3066_v31  ;;  %v8830_v33 = vld [vmem:[#allocation12_spill] sm:$0xff]  ;;  %v8832_v8 = vld [vmem:[#allocation13_spill] sm:$0xff] }
 0xae9   : > { %3150 = vmatprep.subr.bf16.mxu1 %v3119_v29  ;;  %v2969_v7 = vpop.xlane.xlu1 %2968  ;;  %v5537_v22 = vpop.eup %5536  ;;  %v8831_v29 = vld [vmem:[#allocation17_spill] sm:$0xff] }
 0xaea   : > { %5542 = vrcp.f32 %v2969_v7  ;;  %v3071_v42 = vmul.f32 %v5537_v22, %v8823_v6  ;;  %v3070_v59 = vmul.f32 %v5537_v22, %v8826_v35  ;;  %v8833_v7 = vld [vmem:[#allocation29_spill] sm:$0xff] }
 0xaec   : > { %v5539_v28 = vpop.eup %5538 }
 0xaed   : > { %v3073_v49 = vmul.f32 %v5539_v28, %v8824_v61  ;;  %v3072_v46 = vmul.f32 %v5539_v28, %v8825_v12 }
 0xaee   : > { %3151 = vmatpush1.bf16.xpose.msra.mxu1 %v3118_v58  ;;  %v2972_v13 = vpop.xlane.xlu0 %2971 }
 0xaef   : > { %5544 = vrcp.f32 %v2972_v13  ;;  %v3121_v57 = vpack.c.bf16 %v3073_v49, %v3071_v42  ;;  %v3120_v47 = vpack.c.bf16 %v3072_v46, %v3070_v59 }
 0xaf0   : > { %v2975_v21 = vpop.xlane.xlu1 %2974 }
 0xaf1   : > { %3152 = vmatprep.subr.bf16.mxu1 %v3121_v57  ;;  %5546 = vrcp.f32 %v2975_v21  ;;  %v5541_v50 = vpop.eup %5540 }
 0xaf2   : > { %v3075_v54 = vmul.f32 %v5541_v50, %v7537_v5  ;;  %v3074_v17 = vmul.f32 %v5541_v50, %v7535_v4 }
 0xaf4   : > { %v5543_v45 = vpop.eup %5542 }
 0xaf5   : > { %v3077_v20 = vmul.f32 %v5543_v45, %v7545_v38  ;;  %v3076_v63 = vmul.f32 %v5543_v45, %v7539_v41  ;;  %v8828_v38 = vld [vmem:[#allocation10_spill] sm:$0xff] }
 0xaf6   : > { %3153 = vmatpush1.bf16.xpose.msra.mxu1 %v3120_v47  ;;  %v2978_v19 = vpop.xlane.xlu0 %2977 }
 0xaf7   : > { %5548 = vrcp.f32 %v2978_v19  ;;  %v3123_v26 = vpack.c.bf16 %v3077_v20, %v3075_v54  ;;  %v3122_v24 = vpack.c.bf16 %v3076_v63, %v3074_v17  ;;  %v8834_v20 = vld [vmem:[#allocation14_spill] sm:$0xff] }
 0xaf8   : > { %v2981_v0 = vpop.xlane.xlu1 %2980 }
 0xaf9   : > { %v5545_v36 = vpop.eup %5544  ;;  %3154 = vmatprep.subr.bf16.mxu1 %v3123_v26  ;;  %5550 = vrcp.f32 %v2981_v0  ;;  %v8835_v26 = vld [vmem:[#allocation15_spill] sm:$0xff] }
 0xafa   : > { %v3079_v23 = vmul.f32 %v5545_v36, %v7553_v53  ;;  %v3078_v41 = vmul.f32 %v5545_v36, %v8829_v60 }
 0xafb   : > { %v5547_v16 = vpop.eup %5546 }
 0xafc   : > { %v3081_v51 = vmul.f32 %v5547_v16, %v8827_v3  ;;  %v3080_v52 = vmul.f32 %v5547_v16, %v8828_v38  ;;  %v8836_v3 = vld [vmem:[#allocation21_spill] sm:$0xff] }
 0xafe   : > { %3155 = vmatpush1.bf16.xpose.msra.mxu1 %v3122_v24  ;;  %v3125_v5 = vpack.c.bf16 %v3081_v51, %v3079_v23  ;;  %v3124_v30 = vpack.c.bf16 %v3080_v52, %v3078_v41 }
 0xb00   : > { %3156 = vmatprep.subr.bf16.mxu1 %v3125_v5 }
 0xb01   : > { %v5549_v62 = vpop.eup %5548 }
 0xb02   : > { %v3083_v25 = vmul.f32 %v5549_v62, %v8830_v33  ;;  %v3082_v27 = vmul.f32 %v5549_v62, %v8833_v7 }
 0xb03   : > { %v5551_v48 = vpop.eup %5550 }
 0xb04   : > { %v3085_v4 = vmul.f32 %v5551_v48, %v8831_v29  ;;  %v3084_v53 = vmul.f32 %v5551_v48, %v8832_v8  ;;  %v8837_v48 = vld [vmem:[#allocation35_spill] sm:$0xff]  ;;  %v8838_v29 = vld [vmem:[#allocation34_spill] sm:$0xff] }
 0xb05   : > { %v8839_v8 = vld [vmem:[#allocation18_spill] sm:$0xff] }
 0xb06   : > { %3157 = vmatpush1.bf16.xpose.msra.mxu1 %v3124_v30  ;;  %v3127_v37 = vpack.c.bf16 %v3085_v4, %v3083_v25  ;;  %v3126_v31 = vpack.c.bf16 %v3084_v53, %v3082_v27 }
 0xb08   : > { %3158 = vmatprep.subr.bf16.mxu1 %v3127_v37 }
 0xb0e   : > { %3159 = vmatpush1.bf16.xpose.msra.mxu1 %v3126_v31 }
 0xb42   : > { %v2984_v22 = vpop.xlane.xlu0 %2983 }
 0xb43   : > { %5552 = vrcp.f32 %v2984_v22 }
 0xb45   : > { %v2987_v58 = vpop.xlane.xlu1 %2986 }
 0xb46   : > { %5554 = vrcp.f32 %v2987_v58 }
 0xb4a   : > { %v2990_v28 = vpop.xlane.xlu0 %2989 }
 0xb4b   : > { %5556 = vrcp.f32 %v2990_v28 }
 0xb4d   : > { %v5553_v6 = vpop.eup %5552 }
 0xb4e   : > { %v2993_v42 = vpop.xlane.xlu1 %2992  ;;  %v3087_v49 = vmul.f32 %v5553_v6, %v7589_v11  ;;  %v3086_v57 = vmul.f32 %v5553_v6, %v7587_v39 }
 0xb4f   : > { %5558 = vrcp.f32 %v2993_v42 }
 0xb50   : > { %v5555_v61 = vpop.eup %5554 }
 0xb51   : > { %v3089_v13 = vmul.f32 %v5555_v61, %v7597_v14  ;;  %v3088_v12 = vmul.f32 %v5555_v61, %v7595_v1 }
 0xb52   : > { %v2996_v46 = vpop.xlane.xlu0 %2995 }
 0xb53   : > { %v3129_v21 = vpack.c.bf16 %v3089_v13, %v3087_v49  ;;  %v3128_v35 = vpack.c.bf16 %v3088_v12, %v3086_v57  ;;  %5560 = vrcp.f32 %v2996_v46 }
 0xb55   : > { %3160 = vmatprep.subr.bf16.mxu1 %v3129_v21  ;;  %v5557_v50 = vpop.eup %5556 }
 0xb56   : > { %3161 = vmatpush1.bf16.xpose.msra.mxu1 %v3128_v35  ;;  %v3091_v11 = vmul.f32 %v5557_v50, %v7609_v43  ;;  %v3090_v39 = vmul.f32 %v5557_v50, %v7607_v56 }
 0xb57   : > { %v2999_v59 = vpop.xlane.xlu1 %2998 }
 0xb58   : > { %5562 = vrcp.f32 %v2999_v59 }
 0xb59   : > { %v5559_v47 = vpop.eup %5558 }
 0xb5a   : > { %v341_v45 = vpop.permute.xlu0 %340  ;;  %v3093_v14 = vmul.f32 %v5559_v47, %v7617_v9  ;;  %v3092_v1 = vmul.f32 %v5559_v47, %v7615_v55 }
 0xb5b   : > { %v3002_v54 = vpop.xlane.xlu1 %3001  ;;  %v481_v19 = vadd.f32 %v8834_v20, %v341_v45  ;;  %v483_v63 = vadd.f32 %v8835_v26, %v341_v45 }
 0xb5c   : > { %v3131_v0 = vpack.c.bf16 %v3093_v14, %v3091_v11  ;;  %v3130_v36 = vpack.c.bf16 %v3092_v1, %v3090_v39  ;;  %5564 = vrcp.f32 %v3002_v54 }
 0xb5d   : > { %3177 = vxpose.xlu0.b32.start.end [1/1] (short) %v481_v19, 128  ;;  %3209 = vxpose.xlu1.b32.start.end [1/1] (short) %v483_v63, 128  ;;  %v5561_v16 = vpop.eup %5560 }
 0xb5e   : > { %3162 = vmatprep.subr.bf16.mxu1 %v3131_v0  ;;  %v3095_v56 = vmul.f32 %v5561_v16, %v7629_v44  ;;  %v3094_v24 = vmul.f32 %v5561_v16, %v7627_v15  ;;  %v361_v62 = vpop.permute.xlu0 %360 }
 0xb5f   : > { %v3005_v17 = vpop.xlane.xlu1 %3004  ;;  %3163 = vmatpush1.bf16.xpose.msra.mxu1 %v3130_v36  ;;  %v503_v30 = vadd.f32 %v8837_v48, %v361_v62  ;;  %v501_v4 = vadd.f32 %v8838_v29, %v361_v62 }
 0xb60   : > { %5566 = vrcp.f32 %v3005_v17 }
 0xb61   : > { %v3258_v37 = vpack.c.bf16 %v503_v30, %v503_v30  ;;  %v3257_v7 = vpack.c.bf16 %v501_v4, %v501_v4 }
 0xb62   : > { %v5563_v43 = vpop.eup %5562 }
 0xb63   : > { %v376_v9 = vpop.permute.xlu1 %375  ;;  %v3097_v55 = vmul.f32 %v5563_v43, %v7635_v18  ;;  %v3096_v23 = vmul.f32 %v5563_v43, %v7633_v10 }
 0xb64   : > { %v519_v51 = vadd.f32 %v8836_v3, %v376_v9  ;;  %v517_v53 = vadd.f32 %v8839_v8, %v376_v9 }
 0xb65   : > { %v3133_v5 = vpack.c.bf16 %v3097_v55, %v3095_v56  ;;  %v3132_v38 = vpack.c.bf16 %v3096_v23, %v3094_v24 }
 0xb66   : > { %v3103_v52 = vpack.c.bf16 %v519_v51, %v519_v51  ;;  %v5565_v60 = vpop.eup %5564  ;;  %v3102_v27 = vpack.c.bf16 %v517_v53, %v517_v53 }
 0xb67   : > { %3164 = vmatprep.subr.bf16.mxu1 %v3133_v5  ;;  %v3099_v44 = vmul.f32 %v5565_v60, %v7645_v32  ;;  %v3098_v15 = vmul.f32 %v5565_v60, %v7643_v2  ;;  %v3308_v32 = vsel %vm263_vm0, %v3257_v7, 0  ;;  %v8840_v2 = vmov 0  }
 0xb68   : > { %3165 = vmatpush1.bf16.xpose.msra.mxu1 %v3132_v38  ;;  %3168 = vmatprep.mubr.bf16.mxu1 %v3103_v52 }
 0xb6a   : > { %v5567_v41 = vpop.eup %5566 }
 0xb6b   : > { %v3101_v18 = vmul.f32 %v5567_v41, %v7651_v34  ;;  %v3100_v10 = vmul.f32 %v5567_v41, %v7649_v40 }
 0xb6d   : > { %v3135_v33 = vpack.c.bf16 %v3101_v18, %v3099_v44  ;;  %v3134_v25 = vpack.c.bf16 %v3100_v10, %v3098_v15 }
 0xb6f   : > { %3166 = vmatprep.subr.bf16.mxu1 %v3135_v33 }
 0xb70   : > { %3167 = vmatpush1.bf16.xpose.msra.mxu1 %v3134_v25 }
 0xb71   : > { %4889 = vmatprep.subr.msk.bf16.mxu1 %vm263_vm0, %v3258_v37 }
 0xb77   : > { %3169 = vmatmul.mubr.bf16.vlgmr.msra.gmra.mrb[92].mxu1 %v3102_v27 }
 0xb78   : > { %3314 = vmatpush1.bf16.msra.mxu1 %v3308_v32  ;;  %3345 = vmatprep.mubr.bf16.mxu1 %v8840_v2 }
 0xbdd   : > { %v3193_v40 = vpop.trf.xlu0  ;;  %v3225_v46 = vpop.trf.xlu1 }
 0xbe1   : > { %v3194_v34 = vpop.trf.xlu0  ;;  %v3226_v59 = vpop.trf.xlu1 }
 0xbe2   : > { %v3241_v31 = vpack.c.bf16 %v3194_v34, %v3193_v40  ;;  %v3249_v36 = vpack.c.bf16 %v3226_v59, %v3225_v46 }
 0xbe4   : > { %4890 = vmatmul.mubr.msk.bf16.vlgmr.msra.gmra.mrb[96].mxu1 %vm256_vm1, %v3241_v31 }
 0xbe5   : > { %v3195_v22 = vpop.trf.xlu0  ;;  %3355 = vmatprep.mubr.bf16.mxu1 %v8840_v2  ;;  %v3227_v45 = vpop.trf.xlu1 }
 0xbe9   : > { %v3196_v58 = vpop.trf.xlu0  ;;  %v3228_v14 = vpop.trf.xlu1 }
 0xbea   : > { %v3242_v28 = vpack.c.bf16 %v3196_v58, %v3195_v22  ;;  %v3250_v43 = vpack.c.bf16 %v3228_v14, %v3227_v45 }
 0xbec   : > { %4891 = vmatmul.mubr.msk.bf16.gmra.mrb[100].mxu1 %vm256_vm1, %v3242_v28 }
 0xbed   : > { %v3197_v6 = vpop.trf.xlu0  ;;  %3365 = vmatprep.mubr.bf16.mxu1 %v8840_v2  ;;  %v3229_v19 = vpop.trf.xlu1 }
 0xbf1   : > { %v3198_v42 = vpop.trf.xlu0  ;;  %v3230_v0 = vpop.trf.xlu1 }
 0xbf2   : > { %v3243_v61 = vpack.c.bf16 %v3198_v42, %v3197_v6  ;;  %v3251_v56 = vpack.c.bf16 %v3230_v0, %v3229_v19 }
 0xbf4   : > { %4892 = vmatmul.mubr.msk.bf16.gmra.mrb[104].mxu1 %vm256_vm1, %v3243_v61 }
 0xbf5   : > { %v3199_v49 = vpop.trf.xlu0  ;;  %3375 = vmatprep.mubr.bf16.mxu1 %v8840_v2  ;;  %v3231_v17 = vpop.trf.xlu1 }
 0xbf9   : > { %v3200_v13 = vpop.trf.xlu0  ;;  %v3232_v16 = vpop.trf.xlu1 }
 0xbfa   : > { %v3244_v57 = vpack.c.bf16 %v3200_v13, %v3199_v49  ;;  %v3252_v23 = vpack.c.bf16 %v3232_v16, %v3231_v17 }
 0xbfc   : > { %4893 = vmatmul.mubr.msk.bf16.gmra.mrb[108].mxu1 %vm256_vm1, %v3244_v57 }
 0xbfd   : > { %v3201_v12 = vpop.trf.xlu0  ;;  %3385 = vmatprep.mubr.bf16.mxu1 %v8840_v2  ;;  %v3233_v9 = vpop.trf.xlu1 }
 0xc01   : > { %v3202_v21 = vpop.trf.xlu0  ;;  %v3234_v55 = vpop.trf.xlu1 }
 0xc02   : > { %v3245_v35 = vpack.c.bf16 %v3202_v21, %v3201_v12  ;;  %v3253_v51 = vpack.c.bf16 %v3234_v55, %v3233_v9 }
 0xc04   : > { %4894 = vmatmul.mubr.msk.bf16.gmra.mrb[112].mxu1 %vm256_vm1, %v3245_v35 }
 0xc05   : > { %v3203_v50 = vpop.trf.xlu0  ;;  %3395 = vmatprep.mubr.bf16.mxu1 %v8840_v2  ;;  %v3235_v24 = vpop.trf.xlu1 }
 0xc09   : > { %v3204_v47 = vpop.trf.xlu0  ;;  %v3236_v3 = vpop.trf.xlu1 }
 0xc0a   : > { %v3246_v54 = vpack.c.bf16 %v3204_v47, %v3203_v50  ;;  %v3254_v38 = vpack.c.bf16 %v3236_v3, %v3235_v24 }
 0xc0c   : > { %4895 = vmatmul.mubr.msk.bf16.gmra.mrb[116].mxu1 %vm256_vm1, %v3246_v54 }
 0xc0d   : > { %v3205_v11 = vpop.trf.xlu0  ;;  %3405 = vmatprep.mubr.bf16.mxu1 %v8840_v2  ;;  %v3237_v5 = vpop.trf.xlu1 }
 0xc11   : > { %v3206_v39 = vpop.trf.xlu0  ;;  %v3238_v62 = vpop.trf.xlu1 }
 0xc12   : > { %v3247_v1 = vpack.c.bf16 %v3206_v39, %v3205_v11  ;;  %v3255_v44 = vpack.c.bf16 %v3238_v62, %v3237_v5 }
 0xc14   : > { %4896 = vmatmul.mubr.msk.bf16.gmra.mrb[120].mxu1 %vm256_vm1, %v3247_v1 }
 0xc15   : > { %v3207_v20 = vpop.trf.xlu0  ;;  %3415 = vmatprep.mubr.bf16.mxu1 %v8840_v2  ;;  %v3239_v30 = vpop.trf.xlu1 }
 0xc19   : > { %v3208_v26 = vpop.trf.xlu0  ;;  %v3240_v18 = vpop.trf.xlu1 }
 0xc1a   : > { %v3248_v63 = vpack.c.bf16 %v3208_v26, %v3207_v20  ;;  %v3256_v15 = vpack.c.bf16 %v3240_v18, %v3239_v30 }
 0xc1c   : > { %4897 = vmatmul.mubr.msk.bf16.gmra.mrb[124].mxu1 %vm256_vm1, %v3248_v63 }
 0xc1d   : > { %3425 = vmatprep.mubr.bf16.mxu1 %v8840_v2 }
 0xc24   : > { %4898 = vmatmul.mubr.msk.bf16.gmra.mrb[128].mxu1 %vm256_vm1, %v3249_v36 }
 0xc25   : > { %3435 = vmatprep.mubr.bf16.mxu1 %v8840_v2 }
 0xc2c   : > { %4899 = vmatmul.mubr.msk.bf16.gmra.mrb[132].mxu1 %vm256_vm1, %v3250_v43 }
 0xc2d   : > { %3445 = vmatprep.mubr.bf16.mxu1 %v8840_v2 }
 0xc34   : > { %4900 = vmatmul.mubr.msk.bf16.gmra.mrb[136].mxu1 %vm256_vm1, %v3251_v56 }
 0xc35   : > { %3455 = vmatprep.mubr.bf16.mxu1 %v8840_v2 }
 0xc3c   : > { %4901 = vmatmul.mubr.msk.bf16.gmra.mrb[140].mxu1 %vm256_vm1, %v3252_v23 }
 0xc3d   : > { %3465 = vmatprep.mubr.bf16.mxu1 %v8840_v2 }
 0xc44   : > { %4902 = vmatmul.mubr.msk.bf16.gmra.mrb[144].mxu1 %vm256_vm1, %v3253_v51 }
 0xc45   : > { %3475 = vmatprep.mubr.bf16.mxu1 %v8840_v2 }
 0xc4a   : > { %v7747_v52 = vpop.f32.mrb[92].mxu1 }
 0xc4b   : > { %8841 = vst [vmem:[#allocation36_spill] sm:$0xff] %v7747_v52  ;;  %v7749_v60 = vpop.f32.mrb[93].mxu1 }
 0xc4c   : > { %8842 = vst [vmem:[#allocation16_spill] sm:$0xff] %v7749_v60  ;;  %v3174_v41 = vpop.f32.mrb[94].mxu1  ;;  %4903 = vmatmul.mubr.msk.bf16.gmra.mrb[148].mxu1 %vm256_vm1, %v3254_v38 }
 0xc4d   : > { %v3175_v48 = vpop.f32.mrb[95].mxu1  ;;  %3485 = vmatprep.mubr.bf16.mxu1 %v8840_v2 }
 0xc54   : > { %4904 = vmatmul.mubr.msk.bf16.gmra.mrb[152].mxu1 %vm256_vm1, %v3255_v44 }
 0xc55   : > { %3495 = vmatprep.mubr.bf16.mxu1 %v8840_v2 }
 0xc5c   : > { %4905 = vmatmul.mubr.msk.bf16.gmra.mrb[156].mxu1 %vm256_vm1, %v3256_v15 }
 0xcb7   : > { %v7756_v10 = vpop.f32.mrb[96].mxu1 }
 0xcb8   : > { %v7758_v33 = vpop.f32.mrb[97].mxu1 }
 0xcb9   : > { %v3506_v25 = vmax.f32 %v7756_v10, %v7758_v33  ;;  %v7762_v29 = vpop.f32.mrb[98].mxu1 }
 0xcba   : > { %v7764_v4 = vpop.f32.mrb[99].mxu1 }
 0xcbb   : > { %v3509_v37 = vmax.f32 %v7762_v29, %v7764_v4  ;;  %3507 = vmax.xlane.f32.xlu0 %v3506_v25 }
 0xcbd   : > { %3510 = vmax.xlane.f32.xlu1 %v3509_v37 }
 0xcbf   : > { %v7768_v8 = vpop.f32.mrb[100].mxu1 }
 0xcc0   : > { %v7770_v53 = vpop.f32.mrb[101].mxu1 }
 0xcc1   : > { %v3512_v7 = vmax.f32 %v7768_v8, %v7770_v53  ;;  %v7774_v27 = vpop.f32.mrb[102].mxu1 }
 0xcc2   : > { %v7776_v32 = vpop.f32.mrb[103].mxu1 }
 0xcc3   : > { %v3515_v40 = vmax.f32 %v7774_v27, %v7776_v32  ;;  %3513 = vmax.xlane.f32.xlu0 %v3512_v7 }
 0xcc7   : > { %3516 = vmax.xlane.f32.xlu0 %v3515_v40  ;;  %v7780_v34 = vpop.f32.mrb[104].mxu1 }
 0xcc8   : > { %v7782_v31 = vpop.f32.mrb[105].mxu1 }
 0xcc9   : > { %v3518_v22 = vmax.f32 %v7780_v34, %v7782_v31  ;;  %v7786_v58 = vpop.f32.mrb[106].mxu1 }
 0xcca   : > { %v7788_v28 = vpop.f32.mrb[107].mxu1 }
 0xccb   : > { %v3521_v6 = vmax.f32 %v7786_v58, %v7788_v28  ;;  %3519 = vmax.xlane.f32.xlu1 %v3518_v22 }
 0xccd   : > { %3522 = vmax.xlane.f32.xlu0 %v3521_v6 }
 0xccf   : > { %v7792_v42 = vpop.f32.mrb[108].mxu1 }
 0xcd0   : > { %v7794_v61 = vpop.f32.mrb[109].mxu1 }
 0xcd1   : > { %v3524_v49 = vmax.f32 %v7792_v42, %v7794_v61  ;;  %v7798_v13 = vpop.f32.mrb[110].mxu1 }
 0xcd2   : > { %v7800_v57 = vpop.f32.mrb[111].mxu1 }
 0xcd3   : > { %v3527_v12 = vmax.f32 %v7798_v13, %v7800_v57  ;;  %3525 = vmax.xlane.f32.xlu1 %v3524_v49 }
 0xcd5   : > { %3528 = vmax.xlane.f32.xlu0 %v3527_v12 }
 0xcd7   : > { %v7804_v46 = vpop.f32.mrb[112].mxu1 }
 0xcd8   : > { %v7806_v21 = vpop.f32.mrb[113].mxu1 }
 0xcd9   : > { %v3530_v35 = vmax.f32 %v7804_v46, %v7806_v21  ;;  %v7810_v59 = vpop.f32.mrb[114].mxu1 }
 0xcda   : > { %v7812_v50 = vpop.f32.mrb[115].mxu1 }
 0xcdb   : > { %v3533_v47 = vmax.f32 %v7810_v59, %v7812_v50  ;;  %3531 = vmax.xlane.f32.xlu1 %v3530_v35 }
 0xcdd   : > { %3534 = vmax.xlane.f32.xlu0 %v3533_v47 }
 0xcdf   : > { %v7816_v45 = vpop.f32.mrb[116].mxu1 }
 0xce0   : > { %v7818_v54 = vpop.f32.mrb[117].mxu1 }
 0xce1   : > { %v3536_v11 = vmax.f32 %v7816_v45, %v7818_v54  ;;  %v7822_v14 = vpop.f32.mrb[118].mxu1 }
 0xce2   : > { %v7824_v39 = vpop.f32.mrb[119].mxu1 }
 0xce3   : > { %v3539_v1 = vmax.f32 %v7822_v14, %v7824_v39  ;;  %3537 = vmax.xlane.f32.xlu1 %v3536_v11 }
 0xce5   : > { %3540 = vmax.xlane.f32.xlu0 %v3539_v1 }
 0xce7   : > { %v7828_v20 = vpop.f32.mrb[120].mxu1 }
 0xce8   : > { %v7830_v19 = vpop.f32.mrb[121].mxu1 }
 0xce9   : > { %v3542_v26 = vmax.f32 %v7828_v20, %v7830_v19  ;;  %v7834_v63 = vpop.f32.mrb[122].mxu1 }
 0xcea   : > { %v7836_v0 = vpop.f32.mrb[123].mxu1 }
 0xceb   : > { %v3545_v36 = vmax.f32 %v7834_v63, %v7836_v0  ;;  %3543 = vmax.xlane.f32.xlu1 %v3542_v26 }
 0xced   : > { %3546 = vmax.xlane.f32.xlu0 %v3545_v36 }
 0xcef   : > { %v7840_v17 = vpop.f32.mrb[124].mxu1 }
 0xcf0   : > { %v7842_v16 = vpop.f32.mrb[125].mxu1 }
 0xcf1   : > { %v3548_v43 = vmax.f32 %v7840_v17, %v7842_v16  ;;  %v7846_v9 = vpop.f32.mrb[126].mxu1 }
 0xcf2   : > { %v7848_v56 = vpop.f32.mrb[127].mxu1 }
 0xcf3   : > { %v3551_v55 = vmax.f32 %v7846_v9, %v7848_v56  ;;  %3549 = vmax.xlane.f32.xlu1 %v3548_v43 }
 0xcf5   : > { %3552 = vmax.xlane.f32.xlu0 %v3551_v55 }
 0xcf7   : > { %v7852_v24 = vpop.f32.mrb[128].mxu1 }
 0xcf8   : > { %v7854_v23 = vpop.f32.mrb[129].mxu1 }
 0xcf9   : > { %v3554_v3 = vmax.f32 %v7852_v24, %v7854_v23  ;;  %v7858_v51 = vpop.f32.mrb[130].mxu1 }
 0xcfa   : > { %v7860_v5 = vpop.f32.mrb[131].mxu1 }
 0xcfb   : > { %8843 = vst [vmem:[#allocation11_spill] sm:$0xff] %v7860_v5  ;;  %v3557_v38 = vmax.f32 %v7858_v51, %v7860_v5  ;;  %3555 = vmax.xlane.f32.xlu1 %v3554_v3 }
 0xcfd   : > { %3558 = vmax.xlane.f32.xlu0 %v3557_v38 }
 0xcff   : > { %v7864_v62 = vpop.f32.mrb[132].mxu1 }
 0xd00   : > { %8844 = vst [vmem:[#allocation38_spill] sm:$0xff] %v7864_v62  ;;  %v7866_v41 = vpop.f32.mrb[133].mxu1 }
 0xd01   : > { %8845 = vst [vmem:[#allocation33_spill] sm:$0xff] %v7866_v41  ;;  %v3560_v48 = vmax.f32 %v7864_v62, %v7866_v41  ;;  %v7870_v30 = vpop.f32.mrb[134].mxu1 }
 0xd02   : > { %8846 = vst [vmem:[#allocation31_spill] sm:$0xff] %v7870_v30  ;;  %v7872_v44 = vpop.f32.mrb[135].mxu1 }
 0xd03   : > { %8847 = vst [vmem:[#allocation37_spill] sm:$0xff] %v7872_v44  ;;  %v3563_v18 = vmax.f32 %v7870_v30, %v7872_v44  ;;  %3561 = vmax.xlane.f32.xlu1 %v3560_v48 }
 0xd05   : > { %3564 = vmax.xlane.f32.xlu0 %v3563_v18 }
 0xd07   : > { %v7876_v15 = vpop.f32.mrb[136].mxu1 }
 0xd08   : > { %8848 = vst [vmem:[#allocation19_spill] sm:$0xff] %v7876_v15  ;;  %v7878_v25 = vpop.f32.mrb[137].mxu1 }
 0xd09   : > { %8849 = vst [vmem:[#allocation28_spill] sm:$0xff] %v7878_v25  ;;  %v3566_v37 = vmax.f32 %v7876_v15, %v7878_v25  ;;  %v7882_v7 = vpop.f32.mrb[138].mxu1 }
 0xd0a   : > { %8850 = vst [vmem:[#allocation30_spill] sm:$0xff] %v7882_v7  ;;  %v7884_v40 = vpop.f32.mrb[139].mxu1 }
 0xd0b   : > { %8851 = vst [vmem:[#allocation32_spill] sm:$0xff] %v7884_v40  ;;  %v3569_v22 = vmax.f32 %v7882_v7, %v7884_v40  ;;  %3567 = vmax.xlane.f32.xlu1 %v3566_v37 }
 0xd0d   : > { %3570 = vmax.xlane.f32.xlu0 %v3569_v22 }
 0xd0f   : > { %v7888_v6 = vpop.f32.mrb[140].mxu1 }
 0xd10   : > { %8852 = vst [vmem:[#allocation27_spill] sm:$0xff] %v7888_v6  ;;  %v7890_v49 = vpop.f32.mrb[141].mxu1 }
 0xd11   : > { %8853 = vst [vmem:[#allocation10_spill] sm:$0xff] %v7890_v49  ;;  %v3572_v12 = vmax.f32 %v7888_v6, %v7890_v49  ;;  %v7894_v35 = vpop.f32.mrb[142].mxu1 }
 0xd12   : > { %8854 = vst [vmem:[#allocation25_spill] sm:$0xff] %v7894_v35  ;;  %v7896_v47 = vpop.f32.mrb[143].mxu1 }
 0xd13   : > { %8855 = vst [vmem:[#allocation12_spill] sm:$0xff] %v7896_v47  ;;  %v3575_v11 = vmax.f32 %v7894_v35, %v7896_v47  ;;  %3573 = vmax.xlane.f32.xlu1 %v3572_v12 }
 0xd15   : > { %3576 = vmax.xlane.f32.xlu0 %v3575_v11 }
 0xd17   : > { %v7900_v1 = vpop.f32.mrb[144].mxu1 }
 0xd18   : > { %v7902_v26 = vpop.f32.mrb[145].mxu1 }
 0xd19   : > { %v7906_v43 = vpop.f32.mrb[146].mxu1 }
 0xd1a   : > { %v7908_v55 = vpop.f32.mrb[147].mxu1 }
 0xd1f   : > { %v7912_v38 = vpop.f32.mrb[148].mxu1 }
 0xd20   : > { %v7914_v48 = vpop.f32.mrb[149].mxu1 }
 0xd21   : > { %v7918_v37 = vpop.f32.mrb[150].mxu1 }
 0xd22   : > { %v7920_v22 = vpop.f32.mrb[151].mxu1 }
 0xd27   : > { %v7924_v11 = vpop.f32.mrb[152].mxu1 }
 0xd28   : > { %v7926_v36 = vpop.f32.mrb[153].mxu1 }
 0xd29   : > { %v7930_v60 = vpop.f32.mrb[154].mxu1 }
 0xd2a   : > { %v7932_v52 = vpop.f32.mrb[155].mxu1 }
 0xd2f   : > { %v7936_v2 = vpop.f32.mrb[156].mxu1 }
 0xd30   : > { %v7938_v47 = vpop.f32.mrb[157].mxu1 }
 0xd31   : > { %v7942_v35 = vpop.f32.mrb[158].mxu1 }
 0xd32   : > { %v7944_v49 = vpop.f32.mrb[159].mxu1 }
 0xd48   : > { %v3508_v6 = vpop.xlane.xlu0 %3507 }
 0xd49   : > { %v3602_v40 = vsub.f32 %v7756_v10, %v3508_v6  ;;  %v3603_v7 = vsub.f32 %v7758_v33, %v3508_v6 }
 0xd4a   : > { %v3511_v18 = vpop.xlane.xlu1 %3510 }
 0xd4b   : > { %v3666_v25 = vmul.f32 1.442695, %v3602_v40  ;;  %v3668_v15 = vmul.f32 1.442695, %v3603_v7  ;;  %v3604_v44 = vsub.f32 %v7762_v29, %v3511_v18  ;;  %v3605_v30 = vsub.f32 %v7764_v4, %v3511_v18 }
 0xd4d   : > { %5568 = vpow2.f32 %v3666_v25  ;;  %v3670_v12 = vmul.f32 1.442695, %v3604_v44  ;;  %v3672_v41 = vmul.f32 1.442695, %v3605_v30 }
 0xd4e   : > { %5570 = vpow2.f32 %v3668_v15 }
 0xd4f   : > { %5572 = vpow2.f32 %v3670_v12 }
 0xd50   : > { %5574 = vpow2.f32 %v3672_v41  ;;  %v3514_v62 = vpop.xlane.xlu0 %3513 }
 0xd51   : > { %v3606_v3 = vsub.f32 %v7768_v8, %v3514_v62  ;;  %v3607_v10 = vsub.f32 %v7770_v53, %v3514_v62 }
 0xd53   : > { %v3674_v5 = vmul.f32 1.442695, %v3606_v3  ;;  %v3676_v33 = vmul.f32 1.442695, %v3607_v10 }
 0xd54   : > { %v3517_v6 = vpop.xlane.xlu0 %3516 }
 0xd55   : > { %5576 = vpow2.f32 %v3674_v5  ;;  %v3608_v7 = vsub.f32 %v7774_v27, %v3517_v6  ;;  %v3609_v29 = vsub.f32 %v7776_v32, %v3517_v6 }
 0xd56   : > { %5578 = vpow2.f32 %v3676_v33  ;;  %v8856_v33 = vmax.f32 %v7900_v1, %v7902_v26 }
 0xd57   : > { %v7956_v4 = vpop.eup %5568  ;;  %v3678_v30 = vmul.f32 1.442695, %v3608_v7  ;;  %v3680_v44 = vmul.f32 1.442695, %v3609_v29 }
 0xd58   : > { %v7958_v15 = vpop.eup %5570  ;;  %v3520_v41 = vpop.xlane.xlu1 %3519 }
 0xd59   : > { %v7960_v25 = vpop.eup %5572  ;;  %5580 = vpow2.f32 %v3678_v30  ;;  %v3610_v8 = vsub.f32 %v7780_v34, %v3520_v41  ;;  %v3611_v53 = vsub.f32 %v7782_v31, %v3520_v41  ;;  %v3794_v27 = vadd.f32 %v7958_v15, %v7956_v4 }
 0xd5a   : > { %v7966_v5 = vpop.eup %5574  ;;  %5582 = vpow2.f32 %v3680_v44  ;;  %v3523_v32 = vpop.xlane.xlu0 %3522  ;;  %v8857_v30 = vmax.f32 %v7906_v43, %v7908_v55 }
 0xd5b   : > { %v3682_v62 = vmul.f32 1.442695, %v3610_v8  ;;  %v3684_v40 = vmul.f32 1.442695, %v3611_v53  ;;  %v3612_v3 = vsub.f32 %v7786_v58, %v3523_v32  ;;  %v3613_v18 = vsub.f32 %v7788_v28, %v3523_v32  ;;  %3795 = vadd.xlane.f32.xlu1 %v3794_v27 }
 0xd5c   : > { %v3797_v12 = vadd.f32 %v7966_v5, %v7960_v25 }
 0xd5d   : > { %5584 = vpow2.f32 %v3682_v62  ;;  %v3686_v34 = vmul.f32 1.442695, %v3612_v3  ;;  %v3688_v31 = vmul.f32 1.442695, %v3613_v18  ;;  %v8858_v18 = vmax.f32 %v7912_v38, %v7914_v48 }
 0xd5e   : > { %5586 = vpow2.f32 %v3684_v40  ;;  %3798 = vadd.xlane.f32.xlu0 %v3797_v12 }
 0xd5f   : > { %v7972_v10 = vpop.eup %5576  ;;  %5588 = vpow2.f32 %v3686_v34  ;;  %3579 = vmax.xlane.f32.xlu1 %v8856_v33 }
 0xd60   : > { %v7977_v6 = vpop.eup %5578  ;;  %5590 = vpow2.f32 %v3688_v31  ;;  %v3526_v58 = vpop.xlane.xlu1 %3525 }
 0xd61   : > { %v3614_v28 = vsub.f32 %v7792_v42, %v3526_v58  ;;  %v3615_v7 = vsub.f32 %v7794_v61, %v3526_v58  ;;  %v3800_v29 = vadd.f32 %v7977_v6, %v7972_v10 }
 0xd62   : > { %3582 = vmax.xlane.f32.xlu0 %v8857_v30  ;;  %v3529_v44 = vpop.xlane.xlu0 %3528 }
 0xd63   : > { %v7986_v41 = vpop.eup %5580  ;;  %v3690_v8 = vmul.f32 1.442695, %v3614_v28  ;;  %v3692_v53 = vmul.f32 1.442695, %v3615_v7  ;;  %v3616_v27 = vsub.f32 %v7798_v13, %v3529_v44  ;;  %v3617_v32 = vsub.f32 %v7800_v57, %v3529_v44  ;;  %3801 = vadd.xlane.f32.xlu1 %v3800_v29 }
 0xd64   : > { %v7990_v42 = vpop.eup %5582 }
 0xd65   : > { %5592 = vpow2.f32 %v3690_v8  ;;  %v3694_v61 = vmul.f32 1.442695, %v3616_v27  ;;  %v3696_v62 = vmul.f32 1.442695, %v3617_v32  ;;  %v3803_v40 = vadd.f32 %v7990_v42, %v7986_v41 }
 0xd66   : > { %5594 = vpow2.f32 %v3692_v53  ;;  %v8859_v8 = vmax.f32 %v7918_v37, %v7920_v22 }
 0xd67   : > { %v7994_v3 = vpop.eup %5584  ;;  %5596 = vpow2.f32 %v3694_v61  ;;  %3585 = vmax.xlane.f32.xlu1 %v8858_v18  ;;  %3804 = vadd.xlane.f32.xlu0 %v3803_v40 }
 0xd68   : > { %v7999_v13 = vpop.eup %5586  ;;  %5598 = vpow2.f32 %v3696_v62  ;;  %v3532_v57 = vpop.xlane.xlu1 %3531 }
 0xd69   : > { %v8001_v12 = vpop.eup %5588  ;;  %v3618_v34 = vsub.f32 %v7804_v46, %v3532_v57  ;;  %v3619_v31 = vsub.f32 %v7806_v21, %v3532_v57  ;;  %v3806_v33 = vadd.f32 %v7999_v13, %v7994_v3 }
 0xd6a   : > { %v8007_v58 = vpop.eup %5590  ;;  %v3535_v28 = vpop.xlane.xlu0 %3534 }
 0xd6b   : > { %v3698_v7 = vmul.f32 1.442695, %v3618_v34  ;;  %v3700_v29 = vmul.f32 1.442695, %v3619_v31  ;;  %v3620_v30 = vsub.f32 %v7810_v59, %v3535_v28  ;;  %v3621_v44 = vsub.f32 %v7812_v50, %v3535_v28  ;;  %3588 = vmax.xlane.f32.xlu0 %v8859_v8  ;;  %3807 = vadd.xlane.f32.xlu1 %v3806_v33 }
 0xd6c   : > { %v3809_v53 = vadd.f32 %v8007_v58, %v8001_v12  ;;  %v8860_v59 = vmax.f32 %v7924_v11, %v7926_v36 }
 0xd6d   : > { %5600 = vpow2.f32 %v3698_v7  ;;  %v3702_v46 = vmul.f32 1.442695, %v3620_v30  ;;  %v3704_v21 = vmul.f32 1.442695, %v3621_v44 }
 0xd6e   : > { %5602 = vpow2.f32 %v3700_v29  ;;  %v8861_v29 = vmax.f32 %v7930_v60, %v7932_v52 }
 0xd6f   : > { %v8016_v27 = vpop.eup %5592  ;;  %5604 = vpow2.f32 %v3702_v46  ;;  %3810 = vadd.xlane.f32.xlu0 %v3809_v53  ;;  %3591 = vmax.xlane.f32.xlu1 %v8860_v59 }
 0xd70   : > { %v8021_v50 = vpop.eup %5594  ;;  %5606 = vpow2.f32 %v3704_v21  ;;  %v3538_v32 = vpop.xlane.xlu1 %3537 }
 0xd71   : > { %v8023_v61 = vpop.eup %5596  ;;  %v3622_v62 = vsub.f32 %v7816_v45, %v3538_v32  ;;  %v3623_v40 = vsub.f32 %v7818_v54, %v3538_v32  ;;  %v3812_v18 = vadd.f32 %v8021_v50, %v8016_v27 }
 0xd72   : > { %v8029_v57 = vpop.eup %5598  ;;  %v3541_v34 = vpop.xlane.xlu0 %3540 }
 0xd73   : > { %v3706_v31 = vmul.f32 1.442695, %v3622_v62  ;;  %v3708_v33 = vmul.f32 1.442695, %v3623_v40  ;;  %v3624_v28 = vsub.f32 %v7822_v14, %v3541_v34  ;;  %v3625_v7 = vsub.f32 %v7824_v39, %v3541_v34  ;;  %3594 = vmax.xlane.f32.xlu0 %v8861_v29  ;;  %3813 = vadd.xlane.f32.xlu1 %v3812_v18 }
 0xd74   : > { %v3815_v30 = vadd.f32 %v8029_v57, %v8023_v61  ;;  %v8862_v14 = vmax.f32 %v7936_v2, %v7938_v47 }
 0xd75   : > { %5608 = vpow2.f32 %v3706_v31  ;;  %v3710_v45 = vmul.f32 1.442695, %v3624_v28  ;;  %v3712_v54 = vmul.f32 1.442695, %v3625_v7 }
 0xd76   : > { %5610 = vpow2.f32 %v3708_v33  ;;  %v8863_v33 = vmax.f32 %v7942_v35, %v7944_v49 }
 0xd77   : > { %v8038_v44 = vpop.eup %5600  ;;  %5612 = vpow2.f32 %v3710_v45  ;;  %3816 = vadd.xlane.f32.xlu0 %v3815_v30  ;;  %3597 = vmax.xlane.f32.xlu1 %v8862_v14 }
 0xd78   : > { %v8043_v39 = vpop.eup %5602  ;;  %5614 = vpow2.f32 %v3712_v54  ;;  %v3544_v8 = vpop.xlane.xlu1 %3543 }
 0xd79   : > { %v8045_v46 = vpop.eup %5604  ;;  %v3626_v21 = vsub.f32 %v7828_v20, %v3544_v8  ;;  %v3627_v53 = vsub.f32 %v7830_v19, %v3544_v8  ;;  %v3818_v59 = vadd.f32 %v8043_v39, %v8038_v44 }
 0xd7a   : > { %v8051_v32 = vpop.eup %5606  ;;  %v3547_v62 = vpop.xlane.xlu0 %3546 }
 0xd7b   : > { %v3714_v40 = vmul.f32 1.442695, %v3626_v21  ;;  %v3716_v18 = vmul.f32 1.442695, %v3627_v53  ;;  %v3628_v34 = vsub.f32 %v7834_v63, %v3547_v62  ;;  %v3629_v31 = vsub.f32 %v7836_v0, %v3547_v62  ;;  %3600 = vmax.xlane.f32.xlu0 %v8863_v33  ;;  %3819 = vadd.xlane.f32.xlu1 %v3818_v59 }
 0xd7c   : > { %v3821_v28 = vadd.f32 %v8051_v32, %v8045_v46 }
 0xd7d   : > { %5616 = vpow2.f32 %v3714_v40  ;;  %v3718_v20 = vmul.f32 1.442695, %v3628_v34  ;;  %v3720_v19 = vmul.f32 1.442695, %v3629_v31 }
 0xd7e   : > { %5618 = vpow2.f32 %v3716_v18 }
 0xd7f   : > { %v8060_v7 = vpop.eup %5608  ;;  %5620 = vpow2.f32 %v3718_v20  ;;  %3822 = vadd.xlane.f32.xlu0 %v3821_v28 }
 0xd80   : > { %v8062_v29 = vpop.eup %5610  ;;  %5622 = vpow2.f32 %v3720_v19  ;;  %v3550_v63 = vpop.xlane.xlu1 %3549 }
 0xd81   : > { %v8064_v0 = vpop.eup %5612  ;;  %v3630_v45 = vsub.f32 %v7840_v17, %v3550_v63  ;;  %v3631_v54 = vsub.f32 %v7842_v16, %v3550_v63  ;;  %v3824_v30 = vadd.f32 %v8062_v29, %v8060_v7 }
 0xd82   : > { %v8070_v14 = vpop.eup %5614  ;;  %v3553_v8 = vpop.xlane.xlu0 %3552 }
 0xd83   : > { %v3722_v21 = vmul.f32 1.442695, %v3630_v45  ;;  %v3724_v53 = vmul.f32 1.442695, %v3631_v54  ;;  %v3632_v59 = vsub.f32 %v7846_v9, %v3553_v8  ;;  %v3633_v62 = vsub.f32 %v7848_v56, %v3553_v8  ;;  %3825 = vadd.xlane.f32.xlu1 %v3824_v30  ;;  %v8864_v30 = vld [vmem:[#allocation11_spill] sm:$0xff] }
 0xd84   : > { %v3827_v40 = vadd.f32 %v8070_v14, %v8064_v0 }
 0xd85   : > { %5624 = vpow2.f32 %v3722_v21  ;;  %v3726_v17 = vmul.f32 1.442695, %v3632_v59  ;;  %v3728_v18 = vmul.f32 1.442695, %v3633_v62 }
 0xd86   : > { %5626 = vpow2.f32 %v3724_v53  ;;  %3828 = vadd.xlane.f32.xlu0 %v3827_v40 }
 0xd87   : > { %v8076_v16 = vpop.eup %5616  ;;  %5628 = vpow2.f32 %v3726_v17 }
 0xd88   : > { %v8078_v34 = vpop.eup %5618  ;;  %5630 = vpow2.f32 %v3728_v18  ;;  %v3556_v31 = vpop.xlane.xlu1 %3555  ;;  %v8868_v18 = vld [vmem:[#allocation33_spill] sm:$0xff] }
 0xd89   : > { %v8080_v33 = vpop.eup %5620  ;;  %v3634_v9 = vsub.f32 %v7852_v24, %v3556_v31  ;;  %v3635_v56 = vsub.f32 %v7854_v23, %v3556_v31  ;;  %v3830_v20 = vadd.f32 %v8078_v34, %v8076_v16 }
 0xd8a   : > { %v8086_v19 = vpop.eup %5622  ;;  %v3559_v28 = vpop.xlane.xlu0 %3558 }
 0xd8b   : > { %v3730_v63 = vmul.f32 1.442695, %v3634_v9  ;;  %v3732_v45 = vmul.f32 1.442695, %v3635_v56  ;;  %v3636_v54 = vsub.f32 %v7858_v51, %v3559_v28  ;;  %v3637_v8 = vsub.f32 %v8864_v30, %v3559_v28  ;;  %3831 = vadd.xlane.f32.xlu1 %v3830_v20  ;;  %v8867_v51 = vld [vmem:[#allocation38_spill] sm:$0xff]  ;;  %v8871_v30 = vld [vmem:[#allocation37_spill] sm:$0xff] }
 0xd8c   : > { %v3833_v21 = vadd.f32 %v8086_v19, %v8080_v33 }
 0xd8d   : > { %5632 = vpow2.f32 %v3730_v63  ;;  %v3734_v24 = vmul.f32 1.442695, %v3636_v54  ;;  %v3736_v53 = vmul.f32 1.442695, %v3637_v8 }
 0xd8e   : > { %5634 = vpow2.f32 %v3732_v45  ;;  %3834 = vadd.xlane.f32.xlu0 %v3833_v21  ;;  %v8870_v45 = vld [vmem:[#allocation31_spill] sm:$0xff] }
 0xd8f   : > { %v8092_v23 = vpop.eup %5624  ;;  %5636 = vpow2.f32 %v3734_v24 }
 0xd90   : > { %8865 = vst [vmem:[#allocation17_spill] sm:$0xff] %v8092_v23  ;;  %v8094_v59 = vpop.eup %5626  ;;  %5638 = vpow2.f32 %v3736_v53  ;;  %v3562_v62 = vpop.xlane.xlu1 %3561 }
 0xd91   : > { %v8096_v40 = vpop.eup %5628  ;;  %v3638_v17 = vsub.f32 %v8867_v51, %v3562_v62  ;;  %v3639_v31 = vsub.f32 %v8868_v18, %v3562_v62  ;;  %v3836_v9 = vadd.f32 %v8094_v59, %v8092_v23  ;;  %v8879_v23 = vld [vmem:[#allocation32_spill] sm:$0xff] }
 0xd92   : > { %8866 = vst [vmem:[#allocation13_spill] sm:$0xff] %v8096_v40  ;;  %v8102_v56 = vpop.eup %5630  ;;  %v3565_v20 = vpop.xlane.xlu0 %3564 }
 0xd93   : > { %8869 = vst [vmem:[#allocation29_spill] sm:$0xff] %v8102_v56  ;;  %v3738_v28 = vmul.f32 1.442695, %v3638_v17  ;;  %v3740_v63 = vmul.f32 1.442695, %v3639_v31  ;;  %v3640_v54 = vsub.f32 %v8870_v45, %v3565_v20  ;;  %v3641_v8 = vsub.f32 %v8871_v30, %v3565_v20  ;;  %3837 = vadd.xlane.f32.xlu1 %v3836_v9  ;;  %v8875_v31 = vld [vmem:[#allocation19_spill] sm:$0xff] }
 0xd94   : > { %v3839_v21 = vadd.f32 %v8102_v56, %v8096_v40  ;;  %v8876_v9 = vld [vmem:[#allocation28_spill] sm:$0xff] }
 0xd95   : > { %5640 = vpow2.f32 %v3738_v28  ;;  %v3742_v24 = vmul.f32 1.442695, %v3640_v54  ;;  %v3744_v53 = vmul.f32 1.442695, %v3641_v8 }
 0xd96   : > { %5642 = vpow2.f32 %v3740_v63  ;;  %3840 = vadd.xlane.f32.xlu0 %v3839_v21  ;;  %v8878_v21 = vld [vmem:[#allocation30_spill] sm:$0xff] }
 0xd97   : > { %v8108_v62 = vpop.eup %5632  ;;  %5644 = vpow2.f32 %v3742_v24 }
 0xd98   : > { %8872 = vst [vmem:[#allocation14_spill] sm:$0xff] %v8108_v62  ;;  %v8110_v51 = vpop.eup %5634  ;;  %5646 = vpow2.f32 %v3744_v53  ;;  %v3568_v17 = vpop.xlane.xlu1 %3567 }
 0xd99   : > { %8873 = vst [vmem:[#allocation15_spill] sm:$0xff] %v8110_v51  ;;  %v8112_v18 = vpop.eup %5636  ;;  %v3642_v20 = vsub.f32 %v8875_v31, %v3568_v17  ;;  %v3643_v45 = vsub.f32 %v8876_v9, %v3568_v17  ;;  %v3842_v28 = vadd.f32 %v8110_v51, %v8108_v62  ;;  %v8882_v62 = vld [vmem:[#allocation25_spill] sm:$0xff] }
 0xd9a   : > { %8874 = vst [vmem:[#allocation21_spill] sm:$0xff] %v8112_v18  ;;  %v8118_v54 = vpop.eup %5638  ;;  %v3571_v63 = vpop.xlane.xlu0 %3570 }
 0xd9b   : > { %8877 = vst [vmem:[#allocation35_spill] sm:$0xff] %v8118_v54  ;;  %v3746_v30 = vmul.f32 1.442695, %v3642_v20  ;;  %v3748_v8 = vmul.f32 1.442695, %v3643_v45  ;;  %v3644_v24 = vsub.f32 %v8878_v21, %v3571_v63  ;;  %v3645_v40 = vsub.f32 %v8879_v23, %v3571_v63  ;;  %3843 = vadd.xlane.f32.xlu1 %v3842_v28  ;;  %v8880_v21 = vld [vmem:[#allocation27_spill] sm:$0xff] }
 0xd9c   : > { %v3845_v53 = vadd.f32 %v8118_v54, %v8112_v18  ;;  %v8881_v28 = vld [vmem:[#allocation10_spill] sm:$0xff]  ;;  %v8883_v18 = vld [vmem:[#allocation12_spill] sm:$0xff] }
 0xd9d   : > { %5648 = vpow2.f32 %v3746_v30  ;;  %v3750_v31 = vmul.f32 1.442695, %v3644_v24  ;;  %v3752_v56 = vmul.f32 1.442695, %v3645_v40 }
 0xd9e   : > { %5650 = vpow2.f32 %v3748_v8  ;;  %3846 = vadd.xlane.f32.xlu0 %v3845_v53 }
 0xd9f   : > { %v8124_v17 = vpop.eup %5640  ;;  %5652 = vpow2.f32 %v3750_v31 }
 0xda0   : > { %v8126_v9 = vpop.eup %5642  ;;  %5654 = vpow2.f32 %v3752_v56  ;;  %v3574_v20 = vpop.xlane.xlu1 %3573 }
 0xda1   : > { %v8128_v45 = vpop.eup %5644  ;;  %v3646_v23 = vsub.f32 %v8880_v21, %v3574_v20  ;;  %v3647_v63 = vsub.f32 %v8881_v28, %v3574_v20  ;;  %v3848_v30 = vadd.f32 %v8126_v9, %v8124_v17 }
 0xda2   : > { %v8134_v24 = vpop.eup %5646  ;;  %v3577_v40 = vpop.xlane.xlu0 %3576 }
 0xda3   : > { %v3754_v8 = vmul.f32 1.442695, %v3646_v23  ;;  %v3756_v53 = vmul.f32 1.442695, %v3647_v63  ;;  %v3648_v31 = vsub.f32 %v8882_v62, %v3577_v40  ;;  %v3649_v54 = vsub.f32 %v8883_v18, %v3577_v40  ;;  %3849 = vadd.xlane.f32.xlu1 %v3848_v30 }
 0xda4   : > { %v3851_v56 = vadd.f32 %v8134_v24, %v8128_v45 }
 0xda5   : > { %5656 = vpow2.f32 %v3754_v8  ;;  %v3758_v21 = vmul.f32 1.442695, %v3648_v31  ;;  %v3760_v51 = vmul.f32 1.442695, %v3649_v54 }
 0xda6   : > { %5658 = vpow2.f32 %v3756_v53  ;;  %3852 = vadd.xlane.f32.xlu0 %v3851_v56 }
 0xda7   : > { %v8140_v20 = vpop.eup %5648  ;;  %5660 = vpow2.f32 %v3758_v21 }
 0xda8   : > { %8884 = vst [vmem:[#allocation34_spill] sm:$0xff] %v8140_v20  ;;  %v8142_v28 = vpop.eup %5650  ;;  %5662 = vpow2.f32 %v3760_v51 }
 0xda9   : > { %v8144_v23 = vpop.eup %5652  ;;  %v3854_v62 = vadd.f32 %v8142_v28, %v8140_v20 }
 0xdaa   : > { %8885 = vst [vmem:[#allocation18_spill] sm:$0xff] %v8144_v23  ;;  %v8148_v18 = vpop.eup %5654 }
 0xdab   : > { %8886 = vst [vmem:[#allocation11_spill] sm:$0xff] %v8148_v18  ;;  %3855 = vadd.xlane.f32.xlu1 %v3854_v62  ;;  %v3857_v63 = vadd.f32 %v8148_v18, %v8144_v23 }
 0xdad   : > { %3858 = vadd.xlane.f32.xlu0 %v3857_v63 }
 0xdaf   : > { %v8152_v54 = vpop.eup %5656 }
 0xdb0   : > { %8887 = vst [vmem:[#allocation38_spill] sm:$0xff] %v8152_v54  ;;  %v8154_v30 = vpop.eup %5658 }
 0xdb1   : > { %8888 = vst [vmem:[#allocation33_spill] sm:$0xff] %v8154_v30  ;;  %v8156_v40 = vpop.eup %5660  ;;  %v3860_v51 = vadd.f32 %v8154_v30, %v8152_v54 }
 0xdb2   : > { %8889 = vst [vmem:[#allocation31_spill] sm:$0xff] %v8156_v40  ;;  %v8160_v8 = vpop.eup %5662 }
 0xdb3   : > { %8890 = vst [vmem:[#allocation37_spill] sm:$0xff] %v8160_v8  ;;  %3861 = vadd.xlane.f32.xlu1 %v3860_v51  ;;  %v3863_v53 = vadd.f32 %v8160_v8, %v8156_v40 }
 0xdb5   : > { %3864 = vadd.xlane.f32.xlu0 %v3863_v53 }
 0xde8   : > { %v3796_v31 = vpop.xlane.xlu1 %3795 }
 0xde9   : > { %5664 = vrcp.f32 %v3796_v31 }
 0xdeb   : > { %v3799_v56 = vpop.xlane.xlu0 %3798 }
 0xdec   : > { %5666 = vrcp.f32 %v3799_v56  ;;  %v3580_v21 = vpop.xlane.xlu1 %3579 }
 0xded   : > { %v3650_v62 = vsub.f32 %v7900_v1, %v3580_v21  ;;  %v3651_v63 = vsub.f32 %v7902_v26, %v3580_v21 }
 0xdef   : > { %v3762_v20 = vmul.f32 1.442695, %v3650_v62  ;;  %v3764_v23 = vmul.f32 1.442695, %v3651_v63  ;;  %v3583_v18 = vpop.xlane.xlu0 %3582 }
 0xdf0   : > { %v3652_v54 = vsub.f32 %v7906_v43, %v3583_v18  ;;  %v3653_v51 = vsub.f32 %v7908_v55, %v3583_v18  ;;  %v3802_v30 = vpop.xlane.xlu1 %3801 }
 0xdf1   : > { %5668 = vpow2.f32 %v3762_v20 }
 0xdf2   : > { %5670 = vpow2.f32 %v3764_v23  ;;  %v3766_v53 = vmul.f32 1.442695, %v3652_v54  ;;  %v3768_v40 = vmul.f32 1.442695, %v3653_v51 }
 0xdf3   : > { %v5665_v31 = vpop.eup %5664  ;;  %5672 = vrcp.f32 %v3802_v30 }
 0xdf4   : > { %5674 = vpow2.f32 %v3766_v53  ;;  %v3805_v56 = vpop.xlane.xlu0 %3804  ;;  %v3586_v8 = vpop.xlane.xlu1 %3585  ;;  %v3923_v43 = vmul.f32 %v5665_v31, %v7958_v15  ;;  %v3922_v62 = vmul.f32 %v5665_v31, %v7956_v4 }
 0xdf5   : > { %5676 = vpow2.f32 %v3768_v40  ;;  %v3654_v1 = vsub.f32 %v7912_v38, %v3586_v8  ;;  %v3655_v26 = vsub.f32 %v7914_v48, %v3586_v8 }
 0xdf6   : > { %v5667_v21 = vpop.eup %5666  ;;  %5678 = vrcp.f32 %v3805_v56 }
 0xdf7   : > { %v3770_v55 = vmul.f32 1.442695, %v3654_v1  ;;  %v3772_v18 = vmul.f32 1.442695, %v3655_v26  ;;  %v3925_v20 = vmul.f32 %v5667_v21, %v7966_v5  ;;  %v3924_v23 = vmul.f32 %v5667_v21, %v7960_v25 }
 0xdf8   : > { %v3589_v54 = vpop.xlane.xlu0 %3588  ;;  %v3808_v30 = vpop.xlane.xlu1 %3807 }
 0xdf9   : > { %5680 = vpow2.f32 %v3770_v55  ;;  %v3656_v40 = vsub.f32 %v7918_v37, %v3589_v54  ;;  %v3657_v38 = vsub.f32 %v7920_v22, %v3589_v54  ;;  %v3989_v48 = vpack.c.bf16 %v3925_v20, %v3923_v43 }
 0xdfa   : > { %5682 = vpow2.f32 %v3772_v18  ;;  %v3988_v8 = vpack.c.bf16 %v3924_v23, %v3922_v62 }
 0xdfb   : > { %v8176_v63 = vpop.eup %5668  ;;  %v3774_v15 = vmul.f32 1.442695, %v3656_v40  ;;  %v3776_v51 = vmul.f32 1.442695, %v3657_v38  ;;  %5684 = vrcp.f32 %v3808_v30  ;;  %4020 = vmatprep.subr.bf16.mxu0 %v3989_v48 }
 0xdfc   : > { %v8178_v5 = vpop.eup %5670  ;;  %4021 = vmatpush1.bf16.xpose.msra.mxu0 %v3988_v8  ;;  %v3811_v25 = vpop.xlane.xlu0 %3810 }
 0xdfd   : > { %v3592_v53 = vpop.xlane.xlu1 %3591  ;;  %v5673_v4 = vpop.eup %5672  ;;  %5686 = vpow2.f32 %v3774_v15  ;;  %v3866_v31 = vadd.f32 %v8178_v5, %v8176_v63 }
 0xdfe   : > { %v3658_v37 = vsub.f32 %v7924_v11, %v3592_v53  ;;  %v3659_v22 = vsub.f32 %v7926_v36, %v3592_v53  ;;  %v8184_v56 = vpop.eup %5674  ;;  %5688 = vpow2.f32 %v3776_v51  ;;  %v3927_v36 = vmul.f32 %v5673_v4, %v7977_v6 }
 0xdff   : > { %v8186_v1 = vpop.eup %5676  ;;  %5690 = vrcp.f32 %v3811_v25  ;;  %3867 = vadd.xlane.f32.xlu1 %v3866_v31  ;;  %v3926_v30 = vmul.f32 %v5673_v4, %v7972_v10 }
 0xe00   : > { %v3778_v26 = vmul.f32 1.442695, %v3658_v37  ;;  %v3780_v21 = vmul.f32 1.442695, %v3659_v22  ;;  %v5679_v43 = vpop.eup %5678  ;;  %v3869_v55 = vadd.f32 %v8186_v1, %v8184_v56  ;;  %v3595_v18 = vpop.xlane.xlu0 %3594 }
 0xe01   : > { %v3814_v11 = vpop.xlane.xlu1 %3813  ;;  %v3660_v20 = vsub.f32 %v7930_v60, %v3595_v18  ;;  %v3661_v23 = vsub.f32 %v7932_v52, %v3595_v18  ;;  %v3929_v54 = vmul.f32 %v5679_v43, %v7990_v42  ;;  %v3928_v62 = vmul.f32 %v5679_v43, %v7986_v41 }
 0xe02   : > { %5692 = vpow2.f32 %v3778_v26  ;;  %3870 = vadd.xlane.f32.xlu0 %v3869_v55 }
 0xe03   : > { %5694 = vpow2.f32 %v3780_v21  ;;  %v8196_v40 = vpop.eup %5680  ;;  %v3782_v38 = vmul.f32 1.442695, %v3660_v20  ;;  %v3784_v48 = vmul.f32 1.442695, %v3661_v23  ;;  %v3991_v8 = vpack.c.bf16 %v3929_v54, %v3927_v36 }
 0xe04   : > { %v8198_v15 = vpop.eup %5682  ;;  %5696 = vrcp.f32 %v3814_v11  ;;  %v3817_v6 = vpop.xlane.xlu0 %3816  ;;  %v3990_v51 = vpack.c.bf16 %v3928_v62, %v3926_v30 }
 0xe05   : > { %v3598_v60 = vpop.xlane.xlu1 %3597  ;;  %v5685_v52 = vpop.eup %5684  ;;  %5698 = vpow2.f32 %v3782_v38  ;;  %4022 = vmatprep.subr.bf16.mxu0 %v3991_v8  ;;  %v3872_v41 = vadd.f32 %v8198_v15, %v8196_v40 }
 0xe06   : > { %v3662_v42 = vsub.f32 %v7936_v2, %v3598_v60  ;;  %v3663_v10 = vsub.f32 %v7938_v47, %v3598_v60  ;;  %5700 = vpow2.f32 %v3784_v48  ;;  %4023 = vmatpush1.bf16.xpose.msra.mxu0 %v3990_v51  ;;  %v3931_v31 = vmul.f32 %v5685_v52, %v7999_v13 }
 0xe07   : > { %v8204_v25 = vpop.eup %5686  ;;  %5702 = vrcp.f32 %v3817_v6  ;;  %3873 = vadd.xlane.f32.xlu1 %v3872_v41  ;;  %v3930_v18 = vmul.f32 %v5685_v52, %v7994_v3 }
 0xe08   : > { %v3786_v53 = vmul.f32 1.442695, %v3662_v42  ;;  %v3788_v4 = vmul.f32 1.442695, %v3663_v10  ;;  %v8206_v37 = vpop.eup %5688  ;;  %v3601_v22 = vpop.xlane.xlu0 %3600 }
 0xe09   : > { %v5691_v26 = vpop.eup %5690  ;;  %v3664_v2 = vsub.f32 %v7942_v35, %v3601_v22  ;;  %v3665_v47 = vsub.f32 %v7944_v49, %v3601_v22  ;;  %v3820_v21 = vpop.xlane.xlu1 %3819  ;;  %v3875_v43 = vadd.f32 %v8206_v37, %v8204_v25 }
 0xe0a   : > { %5704 = vpow2.f32 %v3786_v53  ;;  %v3933_v55 = vmul.f32 %v5691_v26, %v8007_v58  ;;  %v3932_v11 = vmul.f32 %v5691_v26, %v8001_v12 }
 0xe0b   : > { %5706 = vpow2.f32 %v3788_v4  ;;  %v3790_v13 = vmul.f32 1.442695, %v3664_v2  ;;  %v3792_v20 = vmul.f32 1.442695, %v3665_v47  ;;  %3876 = vadd.xlane.f32.xlu0 %v3875_v43 }
 0xe0c   : > { %v8216_v36 = vpop.eup %5692  ;;  %5708 = vrcp.f32 %v3820_v21  ;;  %v3823_v49 = vpop.xlane.xlu0 %3822  ;;  %v3993_v35 = vpack.c.bf16 %v3933_v55, %v3931_v31  ;;  %v3992_v54 = vpack.c.bf16 %v3932_v11, %v3930_v18 }
 0xe0d   : > { %v8218_v23 = vpop.eup %5694  ;;  %5710 = vpow2.f32 %v3790_v13 }
 0xe0e   : > { %v3878_v30 = vadd.f32 %v8218_v23, %v8216_v36  ;;  %v5697_v58 = vpop.eup %5696  ;;  %5712 = vpow2.f32 %v3792_v20  ;;  %4024 = vmatprep.subr.bf16.mxu0 %v3993_v35 }
 0xe0f   : > { %v8222_v3 = vpop.eup %5698  ;;  %5714 = vrcp.f32 %v3823_v49  ;;  %4025 = vmatpush1.bf16.xpose.msra.mxu0 %v3992_v54  ;;  %v3935_v8 = vmul.f32 %v5697_v58, %v8021_v50  ;;  %v3934_v60 = vmul.f32 %v5697_v58, %v8016_v27  ;;  %v220_v58 = vld [vmem:[%s8476_s2 + $0x58] sm:$0xff] }
 0xe10   : > { %3879 = vadd.xlane.f32.xlu1 %v3878_v30  ;;  %v8224_v12 = vpop.eup %5700  ;;  %v3826_v62 = vpop.xlane.xlu1 %3825 }
 0xe11   : > { %v5703_v38 = vpop.eup %5702  ;;  %v3881_v48 = vadd.f32 %v8224_v12, %v8222_v3  ;;  %5716 = vrcp.f32 %v3826_v62 }
 0xe12   : > { %v3937_v6 = vmul.f32 %v5703_v38, %v8029_v57  ;;  %v3936_v51 = vmul.f32 %v5703_v38, %v8023_v61 }
 0xe13   : > { %3882 = vadd.xlane.f32.xlu0 %v3881_v48  ;;  %v3829_v42 = vpop.xlane.xlu0 %3828 }
 0xe14   : > { %v8232_v52 = vpop.eup %5704  ;;  %5718 = vrcp.f32 %v3829_v42  ;;  %v3995_v41 = vpack.c.bf16 %v3937_v6, %v3935_v8  ;;  %v3994_v53 = vpack.c.bf16 %v3936_v51, %v3934_v60 }
 0xe15   : > { %v8234_v10 = vpop.eup %5706 }
 0xe16   : > { %v3884_v4 = vadd.f32 %v8234_v10, %v8232_v52  ;;  %v5709_v50 = vpop.eup %5708  ;;  %4026 = vmatprep.subr.bf16.mxu0 %v3995_v41 }
 0xe17   : > { %v8238_v22 = vpop.eup %5710  ;;  %4027 = vmatpush1.bf16.xpose.msra.mxu0 %v3994_v53  ;;  %v3939_v26 = vmul.f32 %v5709_v50, %v8043_v39  ;;  %v3938_v47 = vmul.f32 %v5709_v50, %v8038_v44 }
 0xe18   : > { %3885 = vadd.xlane.f32.xlu1 %v3884_v4  ;;  %v8240_v27 = vpop.eup %5712  ;;  %v3832_v61 = vpop.xlane.xlu1 %3831  ;;  %v8892_v4 = vld [vmem:[#allocation13_spill] sm:$0xff] }
 0xe19   : > { %v5715_v57 = vpop.eup %5714  ;;  %v3887_v31 = vadd.f32 %v8240_v27, %v8238_v22  ;;  %5720 = vrcp.f32 %v3832_v61  ;;  %v8893_v61 = vld [vmem:[#allocation17_spill] sm:$0xff] }
 0xe1a   : > { %v3941_v2 = vmul.f32 %v5715_v57, %v8051_v32  ;;  %v3940_v21 = vmul.f32 %v5715_v57, %v8045_v46 }
 0xe1b   : > { %3888 = vadd.xlane.f32.xlu0 %v3887_v31  ;;  %v3835_v43 = vpop.xlane.xlu0 %3834  ;;  %v5717_v55 = vpop.eup %5716 }
 0xe1c   : > { %5722 = vrcp.f32 %v3835_v43  ;;  %v3997_v18 = vpack.c.bf16 %v3941_v2, %v3939_v26  ;;  %v3996_v11 = vpack.c.bf16 %v3940_v21, %v3938_v47  ;;  %v3943_v20 = vmul.f32 %v5717_v55, %v8062_v29  ;;  %v8894_v2 = vld [vmem:[#allocation15_spill] sm:$0xff] }
 0xe1d   : > { %v3942_v46 = vmul.f32 %v5717_v55, %v8060_v7  ;;  %v8895_v21 = vld [vmem:[#allocation35_spill] sm:$0xff] }
 0xe1e   : > { %v5719_v13 = vpop.eup %5718  ;;  %4028 = vmatprep.subr.bf16.mxu0 %v3997_v18  ;;  %v8896_v18 = vld [vmem:[#allocation21_spill] sm:$0xff] }
 0xe1f   : > { %4029 = vmatpush1.bf16.xpose.msra.mxu0 %v3996_v11  ;;  %v3945_v39 = vmul.f32 %v5719_v13, %v8070_v14  ;;  %v3944_v32 = vmul.f32 %v5719_v13, %v8064_v0 }
 0xe20   : > { %v3838_v49 = vpop.xlane.xlu1 %3837 }
 0xe21   : > { %v3999_v35 = vpack.c.bf16 %v3945_v39, %v3943_v20  ;;  %5724 = vrcp.f32 %v3838_v49  ;;  %v3998_v30 = vpack.c.bf16 %v3944_v32, %v3942_v46  ;;  %v8897_v20 = vld [vmem:[#allocation14_spill] sm:$0xff] }
 0xe23   : > { %v3841_v44 = vpop.xlane.xlu0 %3840  ;;  %4030 = vmatprep.subr.bf16.mxu0 %v3999_v35  ;;  %v5721_v54 = vpop.eup %5720 }
 0xe24   : > { %5726 = vrcp.f32 %v3841_v44  ;;  %v3947_v29 = vmul.f32 %v5721_v54, %v8078_v34  ;;  %v3946_v8 = vmul.f32 %v5721_v54, %v8076_v16  ;;  %v8891_v34 = vld [vmem:[#allocation29_spill] sm:$0xff] }
 0xe26   : > { %v5723_v62 = vpop.eup %5722 }
 0xe27   : > { %4031 = vmatpush1.bf16.xpose.msra.mxu0 %v3998_v30  ;;  %v3949_v14 = vmul.f32 %v5723_v62, %v8086_v19  ;;  %v3948_v48 = vmul.f32 %v5723_v62, %v8080_v33 }
 0xe28   : > { %v3844_v0 = vpop.xlane.xlu1 %3843 }
 0xe29   : > { %380 = vperm.xlu1 %4952, %v220_v58   ;;  %v4001_v38 = vpack.c.bf16 %v3949_v14, %v3947_v29  ;;  %5728 = vrcp.f32 %v3844_v0  ;;  %v4000_v60 = vpack.c.bf16 %v3948_v48, %v3946_v8 }
 0xe2b   : > { %v3847_v7 = vpop.xlane.xlu0 %3846  ;;  %4032 = vmatprep.subr.bf16.mxu0 %v4001_v38  ;;  %v5725_v6 = vpop.eup %5724 }
 0xe2c   : > { %5730 = vrcp.f32 %v3847_v7  ;;  %v3951_v42 = vmul.f32 %v5725_v6, %v8094_v59  ;;  %v3950_v57 = vmul.f32 %v5725_v6, %v8893_v61  ;;  %v8898_v7 = vld [vmem:[#allocation11_spill] sm:$0xff] }
 0xe2e   : > { %v5727_v51 = vpop.eup %5726 }
 0xe2f   : > { %4033 = vmatpush1.bf16.xpose.msra.mxu0 %v4000_v60  ;;  %v3953_v41 = vmul.f32 %v5727_v51, %v8891_v34  ;;  %v3952_v50 = vmul.f32 %v5727_v51, %v8892_v4  ;;  %v8900_v51 = vld [vmem:[#allocation34_spill] sm:$0xff] }
 0xe30   : > { %v3850_v19 = vpop.xlane.xlu1 %3849 }
 0xe31   : > { %v4003_v53 = vpack.c.bf16 %v3953_v41, %v3951_v42  ;;  %5732 = vrcp.f32 %v3850_v19  ;;  %v4002_v16 = vpack.c.bf16 %v3952_v50, %v3950_v57  ;;  %v8901_v41 = vld [vmem:[#allocation33_spill] sm:$0xff]  ;;  %v8903_v50 = vld [vmem:[#allocation31_spill] sm:$0xff] }
 0xe33   : > { %v3853_v33 = vpop.xlane.xlu0 %3852  ;;  %4034 = vmatprep.subr.bf16.mxu0 %v4003_v53  ;;  %v5729_v31 = vpop.eup %5728  ;;  %v8902_v53 = vld [vmem:[#allocation37_spill] sm:$0xff] }
 0xe34   : > { %5734 = vrcp.f32 %v3853_v33  ;;  %v3955_v47 = vmul.f32 %v5729_v31, %v8894_v2  ;;  %v3954_v39 = vmul.f32 %v5729_v31, %v8897_v20  ;;  %v8904_v33 = vld [vmem:[#allocation38_spill] sm:$0xff] }
 0xe36   : > { %v5731_v26 = vpop.eup %5730 }
 0xe37   : > { %4035 = vmatpush1.bf16.xpose.msra.mxu0 %v4002_v16  ;;  %v3957_v59 = vmul.f32 %v5731_v26, %v8895_v21  ;;  %v3956_v11 = vmul.f32 %v5731_v26, %v8896_v18 }
 0xe38   : > { %v3856_v43 = vpop.xlane.xlu1 %3855 }
 0xe39   : > { %5736 = vrcp.f32 %v3856_v43  ;;  %v4005_v55 = vpack.c.bf16 %v3957_v59, %v3955_v47  ;;  %v4004_v35 = vpack.c.bf16 %v3956_v11, %v3954_v39 }
 0xe3a   : > { %v3859_v13 = vpop.xlane.xlu0 %3858 }
 0xe3b   : > { %5738 = vrcp.f32 %v3859_v13  ;;  %4036 = vmatprep.subr.bf16.mxu0 %v4005_v55  ;;  %v5733_v49 = vpop.eup %5732 }
 0xe3c   : > { %v3959_v44 = vmul.f32 %v5733_v49, %v8126_v9  ;;  %v3958_v14 = vmul.f32 %v5733_v49, %v8124_v17 }
 0xe3e   : > { %v5735_v32 = vpop.eup %5734 }
 0xe3f   : > { %4037 = vmatpush1.bf16.xpose.msra.mxu0 %v4004_v35  ;;  %v3961_v46 = vmul.f32 %v5735_v32, %v8134_v24  ;;  %v3960_v58 = vmul.f32 %v5735_v32, %v8128_v45  ;;  %v8899_v24 = vld [vmem:[#allocation18_spill] sm:$0xff] }
 0xe40   : > { %v3862_v54 = vpop.xlane.xlu1 %3861 }
 0xe41   : > { %5740 = vrcp.f32 %v3862_v54  ;;  %v4007_v30 = vpack.c.bf16 %v3961_v46, %v3959_v44  ;;  %v4006_v38 = vpack.c.bf16 %v3960_v58, %v3958_v14 }
 0xe42   : > { %v3865_v62 = vpop.xlane.xlu0 %3864 }
 0xe43   : > { %v5737_v29 = vpop.eup %5736  ;;  %5742 = vrcp.f32 %v3865_v62  ;;  %4038 = vmatprep.subr.bf16.mxu0 %v4007_v30  ;;  %v8905_v62 = vld [vmem:[#allocation22_spill] sm:$0xff] }
 0xe44   : > { %v3963_v48 = vmul.f32 %v5737_v29, %v8142_v28  ;;  %v3962_v45 = vmul.f32 %v5737_v29, %v8900_v51  ;;  %v8907_v51 = vld [vmem:[#allocation24_spill] sm:$0xff] }
 0xe45   : > { %v5739_v0 = vpop.eup %5738 }
 0xe46   : > { %v3965_v8 = vmul.f32 %v5739_v0, %v8898_v7  ;;  %v3964_v6 = vmul.f32 %v5739_v0, %v8899_v24 }
 0xe47   : > { %4039 = vmatpush1.bf16.xpose.msra.mxu0 %v4006_v38 }
 0xe48   : > { %v4009_v9 = vpack.c.bf16 %v3965_v8, %v3963_v48  ;;  %v4008_v34 = vpack.c.bf16 %v3964_v6, %v3962_v45  ;;  %v8908_v45 = vld [vmem:[#allocation26_spill] sm:$0xff] }
 0xe4a   : > { %4040 = vmatprep.subr.bf16.mxu0 %v4009_v9 }
 0xe4b   : > { %v5741_v60 = vpop.eup %5740 }
 0xe4c   : > { %v3967_v19 = vmul.f32 %v5741_v60, %v8901_v41  ;;  %v3966_v61 = vmul.f32 %v5741_v60, %v8904_v33  ;;  %v8910_v41 = vld [vmem:[#allocation39_spill] sm:$0xff] }
 0xe4d   : > { %v5743_v42 = vpop.eup %5742 }
 0xe4e   : > { %v3969_v17 = vmul.f32 %v5743_v42, %v8902_v53  ;;  %v3968_v28 = vmul.f32 %v5743_v42, %v8903_v50  ;;  %v8909_v42 = vpack.c.bf16 %v8907_v51, %v8908_v45  ;;  %v8313_v53 = vld [vmem:[%s8476_s2] sm:$0xff]  ;;  %v8325_v50 = vld [vmem:[%s8476_s2 + $0x18] sm:$0xff] }
 0xe4f   : > { %4041 = vmatpush1.bf16.xpose.msra.mxu0 %v4008_v34  ;;  %v8922_v45 = vld [vmem:[#allocation6_spill] sm:$0xff] }
 0xe50   : > { %v4011_v4 = vpack.c.bf16 %v3969_v17, %v3967_v19  ;;  %v4010_v57 = vpack.c.bf16 %v3968_v28, %v3966_v61  ;;  %v8319_v17 = vld [vmem:[%s8476_s2 + $0x10] sm:$0xff]  ;;  %v5791_v28 = vmov 4  }
 0xe51   : > { %v8914_v61 = vld [vmem:[#allocation36_spill] sm:$0xff] }
 0xe52   : > { %4042 = vmatprep.subr.bf16.mxu0 %v4011_v4  ;;  %v5790_v4 = vmov 3  }
 0xe57   : > { %4043 = vmatpush1.bf16.xpose.msra.mxu0 %v4010_v57 }
 0xe8c   : > { %v3868_v31 = vpop.xlane.xlu1 %3867 }
 0xe8d   : > { %5744 = vrcp.f32 %v3868_v31 }
 0xe8f   : > { %v3871_v16 = vpop.xlane.xlu0 %3870 }
 0xe90   : > { %5746 = vrcp.f32 %v3871_v16  ;;  %v8915_v16 = vld [vmem:[#allocation16_spill] sm:$0xff] }
 0xe94   : > { %v3874_v26 = vpop.xlane.xlu1 %3873 }
 0xe95   : > { %5748 = vrcp.f32 %v3874_v26 }
 0xe97   : > { %v5745_v2 = vpop.eup %5744 }
 0xe98   : > { %v3877_v47 = vpop.xlane.xlu0 %3876  ;;  %v3971_v59 = vmul.f32 %v5745_v2, %v8178_v5  ;;  %v3970_v55 = vmul.f32 %v5745_v2, %v8176_v63 }
 0xe99   : > { %5750 = vrcp.f32 %v3877_v47 }
 0xe9a   : > { %v5747_v21 = vpop.eup %5746 }
 0xe9b   : > { %v3973_v43 = vmul.f32 %v5747_v21, %v8186_v1  ;;  %v3972_v18 = vmul.f32 %v5747_v21, %v8184_v56  ;;  %v4982_v21 = vld [vmem:[%s8475_s1 + $0x40] sm:$0xff]  }
 0xe9d   : > { %v3880_v11 = vpop.xlane.xlu1 %3879  ;;  %v4013_v13 = vpack.c.bf16 %v3973_v43, %v3971_v59  ;;  %v4012_v20 = vpack.c.bf16 %v3972_v18, %v3970_v55  ;;  %v4983_v59 = vld [vmem:[%s8475_s1 + $0x48] sm:$0xff]   ;;  %v5792_v43 = vmov 5   ;;  %v5776_v18 = vld [vmem:[%s8476_s2 + $0x20] sm:$0xff] }
 0xe9e   : > { %5752 = vrcp.f32 %v3880_v11  ;;  %v5775_v55 = vld [vmem:[%s8476_s2 + $0x28] sm:$0xff]  ;;  %v5777_v11 = vld [vmem:[%s8476_s2 + $0x38] sm:$0xff] }
 0xe9f   : > { %4044 = vmatprep.subr.bf16.mxu0 %v4013_v13  ;;  %v5749_v49 = vpop.eup %5748  ;;  %v5778_v13 = vld [vmem:[%s8476_s2 + $0x30] sm:$0xff] }
 0xea0   : > { %4045 = vmatpush1.bf16.xpose.msra.mxu0 %v4012_v20  ;;  %v3883_v39 = vpop.xlane.xlu0 %3882  ;;  %v3975_v44 = vmul.f32 %v5749_v49, %v8198_v15  ;;  %v3974_v1 = vmul.f32 %v5749_v49, %v8196_v40 }
 0xea1   : > { %5754 = vrcp.f32 %v3883_v39 }
 0xea3   : > { %v5751_v35 = vpop.eup %5750 }
 0xea4   : > { %v3977_v5 = vmul.f32 %v5751_v35, %v8206_v37  ;;  %v3976_v63 = vmul.f32 %v5751_v35, %v8204_v25 }
 0xea5   : > { %v3886_v32 = vpop.xlane.xlu1 %3885 }
 0xea6   : > { %v4015_v56 = vpack.c.bf16 %v3977_v5, %v3975_v44  ;;  %v4014_v46 = vpack.c.bf16 %v3976_v63, %v3974_v1  ;;  %5756 = vrcp.f32 %v3886_v32 }
 0xea8   : > { %v3889_v54 = vpop.xlane.xlu0 %3888  ;;  %4046 = vmatprep.subr.bf16.mxu0 %v4015_v56  ;;  %v5753_v58 = vpop.eup %5752 }
 0xea9   : > { %v381_v30 = vpop.permute.xlu1 %380  ;;  %5758 = vrcp.f32 %v3889_v54  ;;  %4047 = vmatpush1.bf16.xpose.msra.mxu0 %v4014_v46  ;;  %v3979_v15 = vmul.f32 %v5753_v58, %v8218_v23  ;;  %v3978_v40 = vmul.f32 %v5753_v58, %v8216_v36  ;;  %v8906_v36 = vld [vmem:[#allocation23_spill] sm:$0xff]  ;;  %v8916_v54 = vld [vmem:[#allocation5_spill] sm:$0xff]  ;;  %v8917_v58 = vld [vmem:[#allocation2_spill] sm:$0xff] }
 0xeaa   : > { %v523_v29 = vadd.f32 %v8905_v62, %v381_v30 }
 0xeab   : > { %v5755_v14 = vpop.eup %5754 }
 0xeac   : > { %v3987_v0 = vpack.c.bf16 %v523_v29, %v523_v29  ;;  %v3981_v37 = vmul.f32 %v5755_v14, %v8224_v12  ;;  %v3980_v25 = vmul.f32 %v5755_v14, %v8222_v3  ;;  %v521_v3 = vadd.f32 %v8906_v36, %v381_v30  ;;  %v8918_v29 = vld [vmem:[#allocation3_spill] sm:$0xff] }
 0xeae   : > { %4052 = vmatprep.mubr.bf16.mxu0 %v3987_v0  ;;  %v4017_v38 = vpack.c.bf16 %v3981_v37, %v3979_v15  ;;  %v4016_v48 = vpack.c.bf16 %v3980_v25, %v3978_v40  ;;  %v3986_v34 = vpack.c.bf16 %v521_v3, %v521_v3  ;;  %v8919_v0 = vld [vmem:[#allocation4_spill] sm:$0xff] }
 0xeb0   : > { %4048 = vmatprep.subr.bf16.mxu0 %v4017_v38  ;;  %v5757_v7 = vpop.eup %5756 }
 0xeb1   : > { %4049 = vmatpush1.bf16.xpose.msra.mxu0 %v4016_v48  ;;  %v3983_v9 = vmul.f32 %v5757_v7, %v8234_v10  ;;  %v3982_v6 = vmul.f32 %v5757_v7, %v8232_v52  ;;  %v8911_v10 = vld [vmem:[#allocation20_spill] sm:$0xff]  ;;  %v5789_v52 = vmov 2  }
 0xeb2   : > { %v8912_v19 = vpack.c.bf16 %v8910_v41, %v8911_v10  ;;  %4954 = vset.pattern.permute.xlu1 %v5789_v52  ;;  %4953 = vset.pattern.permute.xlu0 %v5789_v52  ;;  %v8923_v41 = vld [vmem:[#allocation8_spill] sm:$0xff] }
 0xeb3   : > { %v5759_v8 = vpop.eup %5758  ;;  %4066 = vperm.xlu0 %4953, %v8313_v53  }
 0xeb4   : > { %v3985_v24 = vmul.f32 %v5759_v8, %v8240_v27  ;;  %v3984_v23 = vmul.f32 %v5759_v8, %v8238_v22  ;;  %v8913_v27 = vmov 0   ;;  %v8307_v22 = vld [vmem:[%s8476_s2 + $0x8] sm:$0xff] }
 0xeb5   : > { %4070 = vperm.xlu1 %4954, %v8307_v22  }
 0xeb6   : > { %v4019_v12 = vpack.c.bf16 %v3985_v24, %v3983_v9  ;;  %v4018_v60 = vpack.c.bf16 %v3984_v23, %v3982_v6  ;;  %v8920_v24 = vld [vmem:[#allocation9_spill] sm:$0xff] }
 0xeb7   : > { %4958 = vset.pattern.permute.xlu0 %v5790_v4 }
 0xeb8   : > { %4050 = vmatprep.subr.bf16.mxu0 %v4019_v12  ;;  %4240 = vperm.xlu0 %4958, %v8325_v50  }
 0xeb9   : > { %4051 = vmatpush1.bf16.xpose.msra.mxu0 %v4018_v60  ;;  %4074 = vperm.xlu1 %4954, %v8319_v17   ;;  %v8921_v60 = vld [vmem:[#allocation7_spill] sm:$0xff] }
 0xeba   : > { %4097 = vmatprep.subr.bf16.mxu0 %v8909_v42 }
 0xebc   : > { %4960 = vset.pattern.permute.xlu0 %v5792_v43 }
 0xebd   : > { %4078 = vperm.xlu1 %4954, %v8325_v50   ;;  %4280 = vperm.xlu0 %4960, %v8313_v53  }
 0xec0   : > { %4053 = vmatmul.mubr.bf16.vlgmr.msra.gmra.mrb[140].mxu0 %v3986_v34 }
 0xec1   : > { %4098 = vmatpush1.bf16.msra.mxu0 %v8912_v19  ;;  %4129 = vmatprep.mubr.bf16.mxu0 %v8913_v27 }
 0xec2   : > { %4955 = vset.pattern.permute.xlu1 %v5790_v4  ;;  %4292 = vperm.xlu0 %4960, %v8325_v50  }
 0xec3   : > { %4228 = vperm.xlu1 %4955, %v8313_v53  }
 0xec6   : > { %4300 = vperm.xlu0 %4960, %v5775_v55  }
 0xec7   : > { %4232 = vperm.xlu1 %4955, %v8307_v22  }
 0xeca   : > { %4308 = vperm.xlu0 %4960, %v5777_v11  }
 0xecb   : > { %4956 = vset.pattern.permute.xlu1 %v5791_v28 }
 0xecc   : > { %4252 = vperm.xlu1 %4956, %v8313_v53  }
 0xed0   : > { %4256 = vperm.xlu1 %4956, %v8307_v22  }
 0xed4   : > { %4957 = vset.pattern.permute.xlu1 %v5790_v4 }
 0xed5   : > { %4236 = vperm.xlu1 %4957, %v8319_v17  }
 0xed9   : > { %4959 = vset.pattern.permute.xlu1 %v5791_v28 }
 0xeda   : > { %4260 = vperm.xlu1 %4959, %v8319_v17  }
 0xede   : > { %4264 = vperm.xlu1 %4959, %v8325_v50  }
 0xee2   : > { %4961 = vset.pattern.permute.xlu1 %v5792_v43 }
 0xee3   : > { %4284 = vperm.xlu1 %4961, %v8307_v22  }
 0xee7   : > { %4288 = vperm.xlu1 %4961, %v8319_v17  }
 0xeeb   : > { %4296 = vperm.xlu1 %4961, %v5776_v18  }
 0xeef   : > { %4304 = vperm.xlu1 %4961, %v5778_v13  }
 0xf32   : > { %v4067_v39 = vpop.permute.xlu0 %4066 }
 0xf34   : > { %v4071_v20 = vpop.permute.xlu1 %4070 }
 0xf38   : > { %v4075_v56 = vpop.permute.xlu1 %4074 }
 0xf3c   : > { %v4079_v7 = vpop.permute.xlu1 %4078 }
 0xf93   : > { %v4054_v33 = vpop.f32.mrb[140].mxu0 }
 0xf94   : > { %v4063_v57 = vpack.c.bf16 %v4054_v33, %v8914_v61  ;;  %v4056_v31 = vpop.f32.mrb[141].mxu0 }
 0xf95   : > { %v4064_v26 = vpack.c.bf16 %v4056_v31, %v8915_v16  ;;  %v4058_v2 = vpop.f32.mrb[142].mxu0 }
 0xf96   : > { %v4059_v47 = vpop.f32.mrb[143].mxu0 }
 0xf97   : > { %4099 = vmatprep.subr.bf16.mxu0 %v4064_v26 }
 0xf98   : > { %4100 = vmatpush1.bf16.msra.mxu0 %v4063_v57 }
 0xf9b   : > { %4908 = vmatmul.mubr.msk.bf16.vlgmr.msra.gmra.mrb[144].mxu0 %vm413_vm2, %v4982_v21 }
 0xf9c   : > { %4139 = vmatprep.mubr.bf16.mxu0 %v8913_v27 }
 0xfa3   : > { %4909 = vmatmul.mubr.msk.bf16.gmra.mrb[148].mxu0 %vm413_vm2, %v4983_v59 }
 0xfa4   : > { %4375 = vmatprep.mubr.bf16.mxu0 %v8913_v27 }
0x106e   : > { %v4131_v49 = vpop.f32.mrb[144].mxu0 }
0x106f   : > { %v4132_v35 = vadd.f32 %v4131_v49, %v4067_v39  ;;  %v4133_v32 = vpop.f32.mrb[145].mxu0 }
0x1070   : > { %v4134_v44 = vadd.f32 %v4133_v32, %v4067_v39  ;;  %v4135_v5 = vpop.f32.mrb[146].mxu0 }
0x1071   : > { %v4136_v1 = vadd.f32 %v4135_v5, %v4071_v20  ;;  %v4137_v63 = vpop.f32.mrb[147].mxu0  ;;  %v4150_v30 = vadd.f32 %v4132_v35, %v8916_v54 }
0x1072   : > { %v4138_v46 = vadd.f32 %v4137_v63, %v4071_v20  ;;  %v4151_v14 = vadd.f32 %v4134_v44, %v8918_v29 }
0x1073   : > { %v4152_v62 = vadd.f32 %v4136_v1, %v8917_v58 }
0x1074   : > { %v4153_v15 = vadd.f32 %v4138_v46, %v8919_v0 }
0x1075   : > { %v4158_v37 = vadd.f32 %v4152_v62, %v4150_v30 }
0x1076   : > { %v4167_v40 = vadd.f32 %v4153_v15, %v4151_v14  ;;  %v4141_v25 = vpop.f32.mrb[148].mxu0 }
0x1077   : > { %v4142_v38 = vadd.f32 %v4141_v25, %v4075_v56  ;;  %v4143_v48 = vpop.f32.mrb[149].mxu0 }
0x1078   : > { %v4144_v8 = vadd.f32 %v4143_v48, %v4075_v56  ;;  %v4145_v9 = vpop.f32.mrb[150].mxu0  ;;  %v4229_v56 = vpop.permute.xlu1 %4228 }
0x1079   : > { %v4154_v6 = vadd.f32 %v4142_v38, %v8920_v24  ;;  %v4146_v23 = vadd.f32 %v4145_v9, %v4079_v7  ;;  %v4147_v12 = vpop.f32.mrb[151].mxu0 }
0x107a   : > { %v4155_v36 = vadd.f32 %v4144_v8, %v8921_v60  ;;  %v4148_v3 = vadd.f32 %v4147_v12, %v4079_v7 }
0x107b   : > { %v4159_v51 = vadd.f32 %v4158_v37, %v4154_v6  ;;  %v4156_v42 = vadd.f32 %v4146_v23, %v8922_v45 }
0x107c   : > { %v4168_v34 = vadd.f32 %v4167_v40, %v4155_v36  ;;  %v4157_v10 = vadd.f32 %v4148_v3, %v8923_v41 }
0x107d   : > { %v4160_v19 = vadd.f32 %v4159_v51, %v4156_v42 }
0x107e   : > { %v4169_v52 = vadd.f32 %v4168_v34, %v4157_v10 }
0x107f   : > { %v4161_v4 = vrot.slane %v4160_v19, 4 }
0x1080   : > { %v4170_v28 = vrot.slane %v4169_v52, 4 }
0x1081   : > { %v4162_v33 = vadd.f32 %v4161_v4, %v4160_v19 }
0x1082   : > { %v4171_v61 = vadd.f32 %v4170_v28, %v4169_v52 }
0x1083   : > { %v4163_v57 = vrot.slane %v4162_v33, 2 }
0x1084   : > { %v4172_v31 = vrot.slane %v4171_v61, 2 }
0x1085   : > { %v4164_v16 = vadd.f32 %v4163_v57, %v4162_v33  ;;  %v4241_v57 = vpop.permute.xlu0 %4240 }
0x1086   : > { %v4173_v26 = vadd.f32 %v4172_v31, %v4171_v61 }
0x1087   : > { %v4165_v2 = vrot.slane %v4164_v16, 1 }
0x1088   : > { %v4174_v47 = vrot.slane %v4173_v26, 1 }
0x1089   : > { %v4166_v21 = vadd.f32 %v4165_v2, %v4164_v16 }
0x108a   : > { %v4175_v59 = vadd.f32 %v4174_v47, %v4173_v26 }
0x108b   : > { %v4177_v43 = vmul.f32 0.03125, %v4166_v21 }
0x108c   : > { %v4178_v55 = vmul.f32 0.03125, %v4175_v59 }
0x108d   : > { %v4181_v18 = vsub.f32 %v4152_v62, %v4177_v43  ;;  %v4183_v11 = vsub.f32 %v4154_v6, %v4177_v43  ;;  %v4185_v13 = vsub.f32 %v4156_v42, %v4177_v43  ;;  %v4179_v20 = vsub.f32 %v4150_v30, %v4177_v43  ;;  %v4233_v30 = vpop.permute.xlu1 %4232 }
0x108e   : > { %v4182_v39 = vsub.f32 %v4153_v15, %v4178_v55  ;;  %v4184_v49 = vsub.f32 %v4155_v36, %v4178_v55  ;;  %v4186_v35 = vsub.f32 %v4157_v10, %v4178_v55  ;;  %v4180_v32 = vsub.f32 %v4151_v14, %v4178_v55 }
0x108f   : > { %v4187_v44 = vmul.f32 %v4179_v20, %v4179_v20  ;;  %v4189_v5 = vmul.f32 %v4181_v18, %v4181_v18  ;;  %v4191_v46 = vmul.f32 %v4183_v11, %v4183_v11  ;;  %v4193_v0 = vmul.f32 %v4185_v13, %v4185_v13 }
0x1090   : > { %v4188_v1 = vmul.f32 %v4180_v32, %v4180_v32  ;;  %v4190_v63 = vmul.f32 %v4182_v39, %v4182_v39  ;;  %v4192_v58 = vmul.f32 %v4184_v49, %v4184_v49  ;;  %v4194_v40 = vmul.f32 %v4186_v35, %v4186_v35 }
0x1091   : > { %v4195_v54 = vadd.f32 %v4189_v5, %v4187_v44  ;;  %v4253_v24 = vpop.permute.xlu1 %4252 }
0x1092   : > { %v4204_v29 = vadd.f32 %v4190_v63, %v4188_v1 }
0x1093   : > { %v4196_v37 = vadd.f32 %v4195_v54, %v4191_v46 }
0x1094   : > { %v4205_v62 = vadd.f32 %v4204_v29, %v4192_v58 }
0x1095   : > { %v4197_v25 = vadd.f32 %v4196_v37, %v4193_v0  ;;  %v4257_v51 = vpop.permute.xlu1 %4256  ;;  %v4984_v0 = vld [vmem:[%s8475_s1 + $0x50] sm:$0xff]   ;;  %v4985_v37 = vld [vmem:[%s8475_s1 + $0x58] sm:$0xff]  }
0x1096   : > { %v4206_v38 = vadd.f32 %v4205_v62, %v4194_v40  ;;  %v4986_v40 = vld [vmem:[%s8475_s1 + $0x60] sm:$0xff]   ;;  %v4987_v62 = vld [vmem:[%s8475_s1 + $0x68] sm:$0xff]  }
0x1097   : > { %v4198_v15 = vrot.slane %v4197_v25, 4 }
0x1098   : > { %v4207_v48 = vrot.slane %v4206_v38, 4 }
0x1099   : > { %v4199_v7 = vadd.f32 %v4198_v15, %v4197_v25  ;;  %v4237_v10 = vpop.permute.xlu1 %4236  ;;  %v5793_v25 = vmov 6   ;;  %v4281_v15 = vpop.permute.xlu0 %4280 }
0x109a   : > { %v4208_v14 = vadd.f32 %v4207_v48, %v4206_v38  ;;  %4962 = vset.pattern.permute.xlu1 %v5793_v25  ;;  %4963 = vset.pattern.permute.xlu0 %v5793_v25  ;;  %v5794_v38 = vmov 7  }
0x109b   : > { %v4200_v8 = vrot.slane %v4199_v7, 2  ;;  %4441 = vperm.xlu1 %4962, %v8313_v53   ;;  %4445 = vperm.xlu0 %4963, %v8307_v22  }
0x109c   : > { %v4209_v9 = vrot.slane %v4208_v14, 2 }
0x109d   : > { %v4201_v6 = vadd.f32 %v4200_v8, %v4199_v7  ;;  %v4261_v19 = vpop.permute.xlu1 %4260 }
0x109e   : > { %v4210_v23 = vadd.f32 %v4209_v9, %v4208_v14 }
0x109f   : > { %v4202_v12 = vrot.slane %v4201_v6, 1  ;;  %4449 = vperm.xlu1 %4962, %v8319_v17   ;;  %4964 = vset.pattern.permute.xlu0 %v5794_v38 }
0x10a0   : > { %v4211_v60 = vrot.slane %v4210_v23, 1  ;;  %4603 = vperm.xlu0 %4964, %v8313_v53  }
0x10a1   : > { %v4203_v36 = vadd.f32 %v4202_v12, %v4201_v6  ;;  %v4265_v43 = vpop.permute.xlu1 %4264 }
0x10a2   : > { %v4212_v3 = vadd.f32 %v4211_v60, %v4210_v23 }
0x10a3   : > { %v4213_v45 = vmul.f32 0.03125, %v4203_v36  ;;  %4453 = vperm.xlu1 %4962, %v8325_v50  }
0x10a4   : > { %v4214_v42 = vmul.f32 0.03125, %v4212_v3 }
0x10a5   : > { %v4215_v34 = vadd.f32 1e-05, %v4213_v45  ;;  %v4285_v48 = vpop.permute.xlu1 %4284 }
0x10a6   : > { %v4216_v41 = vadd.f32 1e-05, %v4214_v42 }
0x10a7   : > { %5760 = vrsqrt.f32 %v4215_v34  ;;  %4965 = vset.pattern.permute.xlu1 %v5794_v38 }
0x10a8   : > { %5762 = vrsqrt.f32 %v4216_v41  ;;  %4607 = vperm.xlu1 %4965, %v8307_v22  }
0x10a9   : > { %v4289_v3 = vpop.permute.xlu1 %4288 }
0x10b1   : > { %v5761_v52 = vpop.eup %5760 }
0x10b2   : > { %v5763_v4 = vpop.eup %5762  ;;  %v4219_v28 = vmul.f32 %v5761_v52, %v4179_v20  ;;  %v4221_v33 = vmul.f32 %v5761_v52, %v4181_v18  ;;  %v4223_v61 = vmul.f32 %v5761_v52, %v4183_v11  ;;  %v4225_v31 = vmul.f32 %v5761_v52, %v4185_v13  ;;  %v4293_v52 = vpop.permute.xlu0 %4292 }
0x10b3   : > { %v4220_v16 = vmul.f32 %v5763_v4, %v4180_v32  ;;  %v4222_v26 = vmul.f32 %v5763_v4, %v4182_v39  ;;  %v4224_v2 = vmul.f32 %v5763_v4, %v4184_v49  ;;  %v4226_v47 = vmul.f32 %v5763_v4, %v4186_v35 }
0x10b4   : > { %v4243_v21 = vmul.f32 %v4229_v56, %v4219_v28  ;;  %v4245_v59 = vmul.f32 %v4233_v30, %v4221_v33  ;;  %v4247_v20 = vmul.f32 %v4237_v10, %v4223_v61  ;;  %v4249_v18 = vmul.f32 %v4241_v57, %v4225_v31 }
0x10b5   : > { %v4244_v55 = vmul.f32 %v4229_v56, %v4220_v16  ;;  %v4246_v44 = vmul.f32 %v4233_v30, %v4222_v26  ;;  %v4248_v5 = vmul.f32 %v4237_v10, %v4224_v2  ;;  %v4250_v1 = vmul.f32 %v4241_v57, %v4226_v47 }
0x10b6   : > { %v8372_v63 = vadd.f32 %v4253_v24, %v4243_v21  ;;  %v8374_v46 = vadd.f32 %v4257_v51, %v4245_v59  ;;  %v8388_v56 = vadd.f32 %v4261_v19, %v4247_v20  ;;  %v8390_v54 = vadd.f32 %v4265_v43, %v4249_v18  ;;  %v4297_v21 = vpop.permute.xlu1 %4296 }
0x10b7   : > { %v8376_v11 = vadd.f32 %v4253_v24, %v4244_v55  ;;  %v8378_v13 = vadd.f32 %v4257_v51, %v4246_v44  ;;  %v8380_v39 = vadd.f32 %v4261_v19, %v4248_v5  ;;  %v8382_v49 = vadd.f32 %v4265_v43, %v4250_v1  ;;  %v4301_v5 = vpop.permute.xlu0 %4300 }
0x10b8   : > { %v4275_v32 = vpack.c.bf16 %v8374_v46, %v8372_v63  ;;  %v4277_v29 = vpack.c.bf16 %v8390_v54, %v8388_v56  ;;  %v5795_v30 = vmov 8  }
0x10b9   : > { %v4276_v35 = vpack.c.bf16 %v8378_v13, %v8376_v11  ;;  %v4278_v58 = vpack.c.bf16 %v8382_v49, %v8380_v39  ;;  %4967 = vset.pattern.permute.xlu0 %v5795_v30  ;;  %4966 = vset.pattern.permute.xlu1 %v5795_v30 }
0x10ba   : > { %4631 = vperm.xlu0 %4967, %v8307_v22   ;;  %4627 = vperm.xlu1 %4966, %v8313_v53  }
0x10bb   : > { %4343 = vmatprep.subr.bf16.mxu0 %v4276_v35 }
0x10bc   : > { %4344 = vmatpush1.bf16.msra.mxu0 %v4275_v32 }
0x10bd   : > { %4345 = vmatprep.subr.bf16.mxu0 %v4278_v58 }
0x10be   : > { %4635 = vperm.xlu0 %4967, %v8319_v17   ;;  %4968 = vset.pattern.permute.xlu1 %v5794_v38 }
0x10bf   : > { %4611 = vperm.xlu1 %4968, %v8319_v17  }
0x10c0   : > { %4346 = vmatpush1.bf16.msra.mxu0 %v4277_v29 }
0x10c3   : > { %4914 = vmatmul.mubr.msk.bf16.vlgmr.msra.gmra.mrb[152].mxu0 %vm413_vm2, %v4984_v0  ;;  %4615 = vperm.xlu1 %4968, %v8325_v50  }
0x10c4   : > { %4385 = vmatprep.mubr.bf16.mxu0 %v8913_v27 }
0x10c7   : > { %4969 = vset.pattern.permute.xlu1 %v5795_v30 }
0x10c8   : > { %4639 = vperm.xlu1 %4969, %v8325_v50  }
0x10cb   : > { %4915 = vmatmul.mubr.msk.bf16.gmra.mrb[156].mxu0 %vm413_vm2, %v4985_v37 }
0x10cc   : > { %4395 = vmatprep.mubr.bf16.mxu0 %v8913_v27 }
0x10d3   : > { %4916 = vmatmul.mubr.msk.bf16.gmra.mrb[160].mxu0 %vm413_vm2, %v4986_v40 }
0x10d4   : > { %4405 = vmatprep.mubr.bf16.mxu0 %v8913_v27 }
0x10db   : > { %4917 = vmatmul.mubr.msk.bf16.gmra.mrb[164].mxu0 %vm413_vm2, %v4987_v62  ;;  %v4305_v62 = vpop.permute.xlu1 %4304 }
0x10dc   : > { %4505 = vmatprep.mubr.bf16.mxu0 %v8913_v27 }
0x1196   : > { %v4377_v7 = vpop.f32.mrb[152].mxu0 }
0x1197   : > { %v4378_v14 = vadd.f32 %v4377_v7, %v4281_v15  ;;  %v4379_v8 = vpop.f32.mrb[153].mxu0 }
0x1198   : > { %v4380_v9 = vadd.f32 %v4379_v8, %v4281_v15  ;;  %v4381_v24 = vpop.f32.mrb[154].mxu0 }
0x1199   : > { %v4382_v6 = vadd.f32 %v4381_v24, %v4285_v48  ;;  %v4383_v23 = vpop.f32.mrb[155].mxu0  ;;  %v4416_v60 = vmax.f32 %v4378_v14, 0.0 }
0x119a   : > { %v4384_v12 = vadd.f32 %v4383_v23, %v4285_v48  ;;  %v4417_v51 = vmax.f32 %v4380_v9, 0.0  ;;  %v4309_v48 = vpop.permute.xlu0 %4308 }
0x119b   : > { %v4418_v36 = vmax.f32 %v4382_v6, 0.0 }
0x119c   : > { %v4419_v45 = vmax.f32 %v4384_v12, 0.0 }
0x119d   : > { %v4432_v42 = vpack.c.bf16 %v4418_v36, %v4416_v60 }
0x119e   : > { %v4433_v34 = vpack.c.bf16 %v4419_v45, %v4417_v51  ;;  %v4387_v41 = vpop.f32.mrb[156].mxu0  ;;  %v4988_v51 = vld [vmem:[%s8475_s1 + $0x70] sm:$0xff]   ;;  %v4989_v45 = vld [vmem:[%s8475_s1 + $0x78] sm:$0xff]  }
0x119f   : > { %v4388_v10 = vadd.f32 %v4387_v41, %v4289_v3  ;;  %v4389_v19 = vpop.f32.mrb[157].mxu0 }
0x11a0   : > { %v4390_v4 = vadd.f32 %v4389_v19, %v4289_v3  ;;  %v4391_v28 = vpop.f32.mrb[158].mxu0  ;;  %4473 = vmatprep.subr.bf16.mxu0 %v4433_v34  ;;  %v4442_v34 = vpop.permute.xlu1 %4441 }
0x11a1   : > { %v4392_v33 = vadd.f32 %v4391_v28, %v4293_v52  ;;  %v4393_v61 = vpop.f32.mrb[159].mxu0  ;;  %4474 = vmatpush1.bf16.msra.mxu0 %v4432_v42  ;;  %v4420_v31 = vmax.f32 %v4388_v10, 0.0  ;;  %v5796_v42 = vmov 9   ;;  %v4446_v10 = vpop.permute.xlu0 %4445 }
0x11a2   : > { %v4394_v57 = vadd.f32 %v4393_v61, %v4293_v52  ;;  %v4421_v26 = vmax.f32 %v4390_v4, 0.0  ;;  %4970 = vset.pattern.permute.xlu0 %v5796_v42  ;;  %4971 = vset.pattern.permute.xlu1 %v5796_v42 }
0x11a3   : > { %v4422_v16 = vmax.f32 %v4392_v33, 0.0  ;;  %4655 = vperm.xlu0 %4970, %v8313_v53   ;;  %4659 = vperm.xlu1 %4971, %v8307_v22  }
0x11a4   : > { %v4423_v2 = vmax.f32 %v4394_v57, 0.0  ;;  %v4450_v57 = vpop.permute.xlu1 %4449 }
0x11a5   : > { %v4434_v47 = vpack.c.bf16 %v4422_v16, %v4420_v31 }
0x11a6   : > { %v4435_v59 = vpack.c.bf16 %v4423_v2, %v4421_v26  ;;  %v4397_v43 = vpop.f32.mrb[160].mxu0 }
0x11a7   : > { %v4398_v55 = vadd.f32 %v4397_v43, %v4297_v21  ;;  %v4399_v44 = vpop.f32.mrb[161].mxu0  ;;  %4667 = vperm.xlu0 %4970, %v8325_v50   ;;  %4663 = vperm.xlu1 %4971, %v8319_v17  }
0x11a8   : > { %v4400_v1 = vadd.f32 %v4399_v44, %v4297_v21  ;;  %v4401_v20 = vpop.f32.mrb[162].mxu0  ;;  %4475 = vmatprep.subr.bf16.mxu0 %v4435_v59  ;;  %v4454_v59 = vpop.permute.xlu1 %4453 }
0x11a9   : > { %v4402_v18 = vadd.f32 %v4401_v20, %v4301_v5  ;;  %v4403_v35 = vpop.f32.mrb[163].mxu0  ;;  %4476 = vmatpush1.bf16.msra.mxu0 %v4434_v47  ;;  %v4424_v58 = vmax.f32 %v4398_v55, 0.0 }
0x11aa   : > { %v4404_v32 = vadd.f32 %v4403_v35, %v4301_v5  ;;  %v4425_v0 = vmax.f32 %v4400_v1, 0.0 }
0x11ab   : > { %v4426_v29 = vmax.f32 %v4402_v18, 0.0 }
0x11ac   : > { %v4427_v37 = vmax.f32 %v4404_v32, 0.0 }
0x11ad   : > { %v4436_v40 = vpack.c.bf16 %v4426_v29, %v4424_v58 }
0x11ae   : > { %v4437_v25 = vpack.c.bf16 %v4427_v37, %v4425_v0  ;;  %v4407_v38 = vpop.f32.mrb[164].mxu0 }
0x11af   : > { %v4408_v30 = vadd.f32 %v4407_v38, %v4305_v62  ;;  %v4409_v15 = vpop.f32.mrb[165].mxu0 }
0x11b0   : > { %v4410_v7 = vadd.f32 %v4409_v15, %v4305_v62  ;;  %v4411_v14 = vpop.f32.mrb[166].mxu0  ;;  %4477 = vmatprep.subr.bf16.mxu0 %v4437_v25 }
0x11b1   : > { %v4412_v8 = vadd.f32 %v4411_v14, %v4309_v48  ;;  %v4413_v9 = vpop.f32.mrb[167].mxu0  ;;  %4478 = vmatpush1.bf16.msra.mxu0 %v4436_v40  ;;  %v4428_v6 = vmax.f32 %v4408_v30, 0.0 }
0x11b2   : > { %v4414_v24 = vadd.f32 %v4413_v9, %v4309_v48  ;;  %v4429_v12 = vmax.f32 %v4410_v7, 0.0 }
0x11b3   : > { %v4430_v23 = vmax.f32 %v4412_v8, 0.0 }
0x11b4   : > { %v4431_v60 = vmax.f32 %v4414_v24, 0.0 }
0x11b5   : > { %v4438_v36 = vpack.c.bf16 %v4430_v23, %v4428_v6 }
0x11b6   : > { %v4439_v3 = vpack.c.bf16 %v4431_v60, %v4429_v12 }
0x11b8   : > { %4479 = vmatprep.subr.bf16.mxu0 %v4439_v3 }
0x11b9   : > { %4480 = vmatpush1.bf16.msra.mxu0 %v4438_v36 }
0x11bc   : > { %4920 = vmatmul.mubr.msk.bf16.vlgmr.msra.gmra.mrb[168].mxu0 %vm4466_vm3, %v4988_v51 }
0x11bd   : > { %4515 = vmatprep.mubr.bf16.mxu0 %v8913_v27 }
0x11c4   : > { %4921 = vmatmul.mubr.msk.bf16.gmra.mrb[172].mxu0 %vm4466_vm3, %v4989_v45 }
0x11c5   : > { %4718 = vmatprep.mubr.bf16.mxu0 %v8913_v27 }
0x128f   : > { %v4507_v41 = vpop.f32.mrb[168].mxu0 }
0x1290   : > { %v4508_v19 = vadd.f32 %v4507_v41, %v4442_v34  ;;  %v4509_v52 = vpop.f32.mrb[169].mxu0 }
0x1291   : > { %v4510_v4 = vadd.f32 %v4509_v52, %v4442_v34  ;;  %v4511_v28 = vpop.f32.mrb[170].mxu0 }
0x1292   : > { %v4512_v33 = vadd.f32 %v4511_v28, %v4446_v10  ;;  %v4513_v61 = vpop.f32.mrb[171].mxu0  ;;  %v4526_v16 = vadd.f32 %v4508_v19, %v8372_v63 }
0x1293   : > { %v4514_v31 = vadd.f32 %v4513_v61, %v4446_v10  ;;  %v4527_v22 = vadd.f32 %v4510_v4, %v8376_v11 }
0x1294   : > { %v4528_v53 = vadd.f32 %v4512_v33, %v8374_v46 }
0x1295   : > { %v4529_v50 = vadd.f32 %v4514_v31, %v8378_v13 }
0x1296   : > { %v4534_v17 = vadd.f32 %v4528_v53, %v4526_v16 }
0x1297   : > { %v4543_v26 = vadd.f32 %v4529_v50, %v4527_v22  ;;  %v4517_v2 = vpop.f32.mrb[172].mxu0 }
0x1298   : > { %v4518_v47 = vadd.f32 %v4517_v2, %v4450_v57  ;;  %v4519_v21 = vpop.f32.mrb[173].mxu0 }
0x1299   : > { %v4520_v43 = vadd.f32 %v4519_v21, %v4450_v57  ;;  %v4521_v55 = vpop.f32.mrb[174].mxu0 }
0x129a   : > { %v4530_v44 = vadd.f32 %v4518_v47, %v8388_v56  ;;  %v4522_v5 = vadd.f32 %v4521_v55, %v4454_v59  ;;  %v4523_v1 = vpop.f32.mrb[175].mxu0 }
0x129b   : > { %v4531_v63 = vadd.f32 %v4520_v43, %v8380_v39  ;;  %v4524_v20 = vadd.f32 %v4523_v1, %v4454_v59  ;;  %v4604_v1 = vpop.permute.xlu0 %4603 }
0x129c   : > { %v4535_v46 = vadd.f32 %v4534_v17, %v4530_v44  ;;  %v4532_v11 = vadd.f32 %v4522_v5, %v8390_v54 }
0x129d   : > { %v4544_v18 = vadd.f32 %v4543_v26, %v4531_v63  ;;  %v4533_v13 = vadd.f32 %v4524_v20, %v8382_v49 }
0x129e   : > { %v4536_v35 = vadd.f32 %v4535_v46, %v4532_v11 }
0x129f   : > { %v4545_v32 = vadd.f32 %v4544_v18, %v4533_v13  ;;  %v4632_v20 = vpop.permute.xlu0 %4631 }
0x12a0   : > { %v4537_v58 = vrot.slane %v4536_v35, 4 }
0x12a1   : > { %v4546_v29 = vrot.slane %v4545_v32, 4 }
0x12a2   : > { %v4538_v0 = vadd.f32 %v4537_v58, %v4536_v35 }
0x12a3   : > { %v4547_v37 = vadd.f32 %v4546_v29, %v4545_v32 }
0x12a4   : > { %v4539_v40 = vrot.slane %v4538_v0, 2 }
0x12a5   : > { %v4548_v62 = vrot.slane %v4547_v37, 2 }
0x12a6   : > { %v4540_v56 = vadd.f32 %v4539_v40, %v4538_v0 }
0x12a7   : > { %v4549_v25 = vadd.f32 %v4548_v62, %v4547_v37  ;;  %v4636_v62 = vpop.permute.xlu0 %4635 }
0x12a8   : > { %v4541_v38 = vrot.slane %v4540_v56, 1 }
0x12a9   : > { %v4550_v30 = vrot.slane %v4549_v25, 1 }
0x12aa   : > { %v4542_v39 = vadd.f32 %v4541_v38, %v4540_v56 }
0x12ab   : > { %v4551_v15 = vadd.f32 %v4550_v30, %v4549_v25 }
0x12ac   : > { %v4552_v48 = vmul.f32 0.03125, %v4542_v39 }
0x12ad   : > { %v4553_v7 = vmul.f32 0.03125, %v4551_v15 }
0x12ae   : > { %v4558_v54 = vsub.f32 %v4530_v44, %v4552_v48  ;;  %v4560_v14 = vsub.f32 %v4532_v11, %v4552_v48  ;;  %v4554_v8 = vsub.f32 %v4526_v16, %v4552_v48  ;;  %v4556_v49 = vsub.f32 %v4528_v53, %v4552_v48  ;;  %v4608_v53 = vpop.permute.xlu1 %4607 }
0x12af   : > { %v4559_v9 = vsub.f32 %v4531_v63, %v4553_v7  ;;  %v4561_v24 = vsub.f32 %v4533_v13, %v4553_v7  ;;  %v4555_v6 = vsub.f32 %v4527_v22, %v4553_v7  ;;  %v4557_v23 = vsub.f32 %v4529_v50, %v4553_v7 }
0x12b0   : > { %v4562_v12 = vmul.f32 %v4554_v8, %v4554_v8  ;;  %v4564_v60 = vmul.f32 %v4556_v49, %v4556_v49  ;;  %v4566_v51 = vmul.f32 %v4558_v54, %v4558_v54  ;;  %v4568_v41 = vmul.f32 %v4560_v14, %v4560_v14 }
0x12b1   : > { %v4563_v36 = vmul.f32 %v4555_v6, %v4555_v6  ;;  %v4565_v3 = vmul.f32 %v4557_v23, %v4557_v23  ;;  %v4567_v42 = vmul.f32 %v4559_v9, %v4559_v9  ;;  %v4569_v19 = vmul.f32 %v4561_v24, %v4561_v24 }
0x12b2   : > { %v4570_v45 = vadd.f32 %v4564_v60, %v4562_v12  ;;  %v4628_v21 = vpop.permute.xlu1 %4627 }
0x12b3   : > { %v4579_v34 = vadd.f32 %v4565_v3, %v4563_v36 }
0x12b4   : > { %v4571_v10 = vadd.f32 %v4570_v45, %v4566_v51  ;;  %v4990_v45 = vld [vmem:[%s8475_s1 + $0x80] sm:$0xff]  }
0x12b5   : > { %v4580_v52 = vadd.f32 %v4579_v34, %v4567_v42  ;;  %v4991_v42 = vld [vmem:[%s8475_s1 + $0x88] sm:$0xff]   ;;  %v4656_v34 = vpop.permute.xlu0 %4655 }
0x12b6   : > { %v4572_v4 = vadd.f32 %v4571_v10, %v4568_v41  ;;  %v4612_v63 = vpop.permute.xlu1 %4611 }
0x12b7   : > { %v4581_v28 = vadd.f32 %v4580_v52, %v4569_v19 }
0x12b8   : > { %v4573_v33 = vrot.slane %v4572_v4, 4 }
0x12b9   : > { %v4582_v61 = vrot.slane %v4581_v28, 4 }
0x12ba   : > { %v4574_v57 = vadd.f32 %v4573_v33, %v4572_v4  ;;  %v4616_v46 = vpop.permute.xlu1 %4615 }
0x12bb   : > { %v4583_v31 = vadd.f32 %v4582_v61, %v4581_v28 }
0x12bc   : > { %v4575_v16 = vrot.slane %v4574_v57, 2 }
0x12bd   : > { %v4584_v22 = vrot.slane %v4583_v31, 2 }
0x12be   : > { %v4576_v50 = vadd.f32 %v4575_v16, %v4574_v57  ;;  %v4640_v56 = vpop.permute.xlu1 %4639 }
0x12bf   : > { %v4585_v17 = vadd.f32 %v4584_v22, %v4583_v31 }
0x12c0   : > { %v4577_v26 = vrot.slane %v4576_v50, 1 }
0x12c1   : > { %v4586_v2 = vrot.slane %v4585_v17, 1 }
0x12c2   : > { %v4578_v47 = vadd.f32 %v4577_v26, %v4576_v50  ;;  %v4660_v10 = vpop.permute.xlu1 %4659 }
0x12c3   : > { %v4587_v59 = vadd.f32 %v4586_v2, %v4585_v17 }
0x12c4   : > { %v4588_v43 = vmul.f32 0.03125, %v4578_v47  ;;  %v4668_v47 = vpop.permute.xlu0 %4667 }
0x12c5   : > { %v4589_v55 = vmul.f32 0.03125, %v4587_v59 }
0x12c6   : > { %v4590_v44 = vadd.f32 1e-05, %v4588_v43  ;;  %v4664_v22 = vpop.permute.xlu1 %4663 }
0x12c7   : > { %v4591_v5 = vadd.f32 1e-05, %v4589_v55 }
0x12c8   : > { %5764 = vrsqrt.f32 %v4590_v44 }
0x12c9   : > { %5766 = vrsqrt.f32 %v4591_v5 }
0x12d2   : > { %v5765_v11 = vpop.eup %5764 }
0x12d3   : > { %v5767_v18 = vpop.eup %5766  ;;  %v4596_v13 = vmul.f32 %v5765_v11, %v4556_v49  ;;  %v4594_v35 = vmul.f32 %v5765_v11, %v4554_v8  ;;  %v4598_v32 = vmul.f32 %v5765_v11, %v4558_v54  ;;  %v4600_v58 = vmul.f32 %v5765_v11, %v4560_v14 }
0x12d4   : > { %v4597_v29 = vmul.f32 %v5767_v18, %v4557_v23  ;;  %v4595_v0 = vmul.f32 %v5767_v18, %v4555_v6  ;;  %v4599_v37 = vmul.f32 %v5767_v18, %v4559_v9  ;;  %v4601_v40 = vmul.f32 %v5767_v18, %v4561_v24 }
0x12d5   : > { %v4620_v25 = vmul.f32 %v4608_v53, %v4596_v13  ;;  %v4618_v38 = vmul.f32 %v4604_v1, %v4594_v35  ;;  %v4622_v30 = vmul.f32 %v4612_v63, %v4598_v32  ;;  %v4624_v39 = vmul.f32 %v4616_v46, %v4600_v58 }
0x12d6   : > { %v4621_v15 = vmul.f32 %v4608_v53, %v4597_v29  ;;  %v4619_v48 = vmul.f32 %v4604_v1, %v4595_v0  ;;  %v4623_v7 = vmul.f32 %v4612_v63, %v4599_v37  ;;  %v4625_v12 = vmul.f32 %v4616_v46, %v4601_v40 }
0x12d7   : > { %v4642_v60 = vadd.f32 %v4628_v21, %v4618_v38  ;;  %v4644_v36 = vadd.f32 %v4632_v20, %v4620_v25  ;;  %v4646_v49 = vadd.f32 %v4636_v62, %v4622_v30  ;;  %v4648_v8 = vadd.f32 %v4640_v56, %v4624_v39 }
0x12d8   : > { %v4643_v54 = vadd.f32 %v4628_v21, %v4619_v48  ;;  %v4645_v14 = vadd.f32 %v4632_v20, %v4621_v15  ;;  %v4647_v23 = vadd.f32 %v4636_v62, %v4623_v7  ;;  %v4649_v9 = vadd.f32 %v4640_v56, %v4625_v12 }
0x12d9   : > { %v4650_v24 = vpack.c.bf16 %v4644_v36, %v4642_v60  ;;  %v4652_v6 = vpack.c.bf16 %v4648_v8, %v4646_v49 }
0x12da   : > { %v4651_v3 = vpack.c.bf16 %v4645_v14, %v4643_v54  ;;  %v4653_v51 = vpack.c.bf16 %v4649_v9, %v4647_v23 }
0x12dc   : > { %4686 = vmatprep.subr.bf16.mxu0 %v4651_v3 }
0x12dd   : > { %4687 = vmatpush1.bf16.msra.mxu0 %v4650_v24 }
0x12de   : > { %4688 = vmatprep.subr.bf16.mxu0 %v4653_v51 }
0x12e1   : > { %4689 = vmatpush1.bf16.msra.mxu0 %v4652_v6 }
0x12e4   : > { %4924 = vmatmul.mubr.msk.bf16.vlgmr.msra.gmra.mrb[176].mxu0 %vm413_vm2, %v4990_v45 }
0x12e5   : > { %4728 = vmatprep.mubr.bf16.mxu0 %v8913_v27 }
0x12ec   : > { %4925 = vmatmul.mubr.msk.bf16.gmra.mrb[180].mxu0 %vm413_vm2, %v4991_v42 }
0x13b7   : > { %v4720_v41 = vpop.f32.mrb[176].mxu0 }
0x13b8   : > { %v4722_v19 = vpop.f32.mrb[177].mxu0  ;;  %v4721_v52 = vadd.f32 %v4720_v41, %v4656_v34 }
0x13b9   : > { %v4724_v27 = vpop.f32.mrb[178].mxu0  ;;  %v4723_v4 = vadd.f32 %v4722_v19, %v4656_v34 }
0x13ba   : > { %v4739_v28 = vmax.f32 %v4721_v52, 0.0  ;;  %v4726_v33 = vpop.f32.mrb[179].mxu0  ;;  %v4725_v61 = vadd.f32 %v4724_v27, %v4660_v10 }
0x13bb   : > { %v4740_v57 = vmax.f32 %v4723_v4, 0.0  ;;  %v4727_v31 = vadd.f32 %v4726_v33, %v4660_v10 }
0x13bc   : > { %4747 = vst [vmem:[%s8461_s28] sm:$0xff] %v4739_v28  ;;  %v4741_v16 = vmax.f32 %v4725_v61, 0.0 }
0x13bd   : > { %4748 = vst [vmem:[%s8461_s28 + $0x8] sm:$0xff] %v4740_v57  ;;  %v4742_v53 = vmax.f32 %v4727_v31, 0.0 }
0x13be   : > { %4749 = vst [vmem:[%s8461_s28 + $0x10] sm:$0xff] %v4741_v16 }
0x13bf   : > { %4750 = vst [vmem:[%s8461_s28 + $0x18] sm:$0xff] %v4742_v53  ;;  %v4730_v50 = vpop.f32.mrb[180].mxu0 }
0x13c0   : > { %v4732_v17 = vpop.f32.mrb[181].mxu0  ;;  %v4731_v26 = vadd.f32 %v4730_v50, %v4664_v22 }
0x13c1   : > { %v4734_v2 = vpop.f32.mrb[182].mxu0  ;;  %v4733_v21 = vadd.f32 %v4732_v17, %v4664_v22 }
0x13c2   : > { %v4735_v59 = vadd.f32 %v4734_v2, %v4668_v47  ;;  %v4736_v43 = vpop.f32.mrb[183].mxu0  ;;  %v4743_v55 = vmax.f32 %v4731_v26, 0.0 }
0x13c3   : > { %v4737_v44 = vadd.f32 %v4736_v43, %v4668_v47  ;;  %v4744_v5 = vmax.f32 %v4733_v21, 0.0 }
0x13c4   : > { %v4745_v1 = vmax.f32 %v4735_v59, 0.0  ;;  %4751 = vst [vmem:[%s8461_s28 + $0x20] sm:$0xff] %v4743_v55 }
0x13c5   : > { %v4746_v63 = vmax.f32 %v4737_v44, 0.0  ;;  %4752 = vst [vmem:[%s8461_s28 + $0x28] sm:$0xff] %v4744_v5 }
0x13c6   : > { %4753 = vst [vmem:[%s8461_s28 + $0x30] sm:$0xff] %v4745_v1 }
0x13c7   : > { %4754 = vst [vmem:[%s8461_s28 + $0x38] sm:$0xff] %v4746_v63 }
0x13c8 PF: > { %s13_s12 = sadd.s32 1, %s5785_s12  }
0x13c9   : > { %p10_p4 = scmp.ge.s32.totalorder %s13_s12, 4  }
0x13cb   :  { %12 = sbr.rel (!%p10_p4) target bundleno = 1 (0x1), region = 62 }

</bundles_post_ra>
